<compile_context>
chip_gen: v7x
topology: tpu7x:2x2x1
jax: 0.10.0
libtpu: 0.0.40
codegen_flags: <defaults>
</compile_context>

<pallas_src>
import jax
import jax.numpy as jnp
from jax import lax
from jax.experimental import pallas as pl
from jax.experimental.pallas import tpu as pltpu

NUM_GROUPS = 32
EPS = 1e-6


def _swish(v):
    # x * sigmoid(x); exp and the approx reciprocal both ride the EUP slot.
    return v * pl.reciprocal(1.0 + jnp.exp(-v), approx=True)


def _make_kernel(has_nin, taps_bf16):
    def kernel(x_ref, temb_ref, mask_ref,
               g1_ref, b1g_ref, sin_ref, stin_ref,
               w1_ref, b1_ref,
               tw_ref, tb_ref,
               g2_ref, b2g_ref, sout_ref, stout_ref,
               w2_ref, b2_ref,
               *rest):
        if has_nin:
            nw_ref, nb_ref, out_ref = rest
        else:
            (out_ref,) = rest

        Bt, H, W, Cin = x_ref.shape
        Cout = out_ref.shape[3]
        HW = H * W
        M = Bt * HW

        def conv3x3(h32, w_ref):
            # out[p] += h[p + dy*W + dx] @ W[ky,kx]; shifted reads are sublane
            # rolls of the SAME resident tile + 0/1 boundary masks (the masks
            # also kill wrap-around across image/batch boundaries).
            Cn = w_ref.shape[2]
            # Hoisted cast: ONE f32->bf16 per conv (not one per tap).
            base = h32.astype(jnp.bfloat16) if taps_bf16 else h32
            acc = jnp.zeros((M, Cn), jnp.float32)
            for ky in range(3):
                for kx in range(3):
                    k = ky * 3 + kx
                    d = (ky - 1) * W + (kx - 1)
                    src = base if d == 0 else pltpu.roll(base, (-d) % M, axis=0)
                    if k != 4:
                        src = src * mask_ref[k]   # exact 0/1 mask (bf16)
                    if not taps_bf16:
                        src = src.astype(jnp.bfloat16)
                    acc = acc + jnp.dot(src, w_ref[k],
                                        preferred_element_type=jnp.float32)
            return acc

        def group_norm(h3, s_ref, st_ref, gamma, beta, gsz):
            # h3: (Bt, HW, C) f32; per-sample, per-group stats kept in f32.
            s1 = jnp.sum(h3, axis=1)               # (Bt, C)
            s2 = jnp.sum(h3 * h3, axis=1)          # (Bt, C)
            cnt = float(HW * gsz)
            gmean = jnp.dot(s1, s_ref[...], preferred_element_type=jnp.float32) / cnt
            gm2 = jnp.dot(s2, s_ref[...], preferred_element_type=jnp.float32) / cnt
            # TODO(synk): single-pass E[x^2]-E[x]^2 (f32); switch to a
            # mean-subtracted second pass if activations get large-magnitude.
            gvar = gm2 - gmean * gmean
            ginv = lax.rsqrt(gvar + EPS)
            mean_c = jnp.dot(gmean, st_ref[...], preferred_element_type=jnp.float32)
            inv_c = jnp.dot(ginv, st_ref[...], preferred_element_type=jnp.float32)
            return (h3 - mean_c[:, None, :]) * (inv_c[:, None, :] * gamma) + beta

        # ---- norm1 -> swish -> conv1 ----
        # (The f32 copy of x is only used here; the shortcut re-reads x_ref so
        #  it does not stay live across both conv loops.)
        x3 = x_ref[...].astype(jnp.float32).reshape(Bt, HW, Cin)
        h3 = _swish(group_norm(x3, sin_ref, stin_ref, g1_ref[...], b1g_ref[...],
                               Cin // NUM_GROUPS))
        h = conv3x3(h3.reshape(M, Cin), w1_ref) + b1_ref[...]

        # ---- + temb_proj(swish(temb))[:, :, None, None] ----
        t = _swish(temb_ref[...].reshape(Bt, -1).astype(jnp.float32))
        tproj = jnp.dot(t.astype(jnp.bfloat16), tw_ref[...],
                        preferred_element_type=jnp.float32) + tb_ref[...]
        h3 = h.reshape(Bt, HW, Cout) + tproj[:, None, :]

        # ---- norm2 -> swish -> (dropout) -> conv2 ----
        # TODO(synk): dropout implemented as eval-mode identity (no RNG mask).
        h3 = _swish(group_norm(h3, sout_ref, stout_ref, g2_ref[...], b2g_ref[...],
                               Cout // NUM_GROUPS))
        h = conv3x3(h3.reshape(M, Cout), w2_ref) + b2_ref[...]

        # ---- shortcut (re-read the resident input block) + residual add ----
        if has_nin:
            sc = jnp.dot(x_ref[...].reshape(M, Cin), nw_ref[...],
                         preferred_element_type=jnp.float32) + nb_ref[...]
        else:
            sc = x_ref[...].reshape(M, Cin).astype(jnp.float32)
        out_ref[...] = (sc + h).reshape(Bt, H, W, Cout).astype(out_ref.dtype)

    return kernel


def _vmem_limit_bytes():
    cap = 64 * 1024 * 1024            # conservative default (v7x per-TC VMEM)
    try:
        info = pltpu.get_tpu_info()
        cap = int(getattr(info, "vmem_capacity_bytes", cap))
    except Exception:
        pass
    # Never request the full physical VMEM: leave headroom for Pallas's own
    # pipeline buffers / semaphores / compiler scratch.
    # v5e/v6e (128 MiB) -> ~109 MiB; v7x (64 MiB) -> ~54 MiB.
    return max(32 * 1024 * 1024, min(int(cap * 0.85), cap - (8 << 20)))


def _derive_bt(B, HW, Cin, Cout, vmem_limit):
    # TODO(synk): when HW alone exceeds m_cap (big images on v7x), add a second
    # grid axis over H-row strips with a 1-row halo index_map.
    cmax = max(Cin, Cout)
    # Rough resident bytes per folded matmul row: f32 h3 + f32 acc + bf16 tap
    # base + one rolled bf16 copy, plus the double-buffered bf16 in/out blocks.
    per_row = 12 * cmax + 4 * (Cin + Cout)
    m_cap = 512
    while m_cap < 4096 and 2 * m_cap * per_row <= vmem_limit // 2:
        m_cap *= 2
    # Keep >= 2 grid steps so both v7x TensorCores get work under "parallel".
    bt_max = B if B < 2 else B // 2
    for cand in range(min(bt_max, B), 0, -1):
        if B % cand == 0 and cand * HW <= m_cap:
            return cand
    return 1


def _tap_masks(Bt, H, W):
    # Host-precomputed 0/1 boundary masks, (9, M, 1) bf16, k = ky*3 + kx.
    HW = H * W
    M = Bt * HW
    r = jnp.arange(M)
    yo = (r % HW) // W
    xo = r % W
    ym = [yo >= 1, yo >= 0, yo <= H - 2]
    xm = [xo >= 1, xo >= 0, xo <= W - 2]
    rows = [(ym[ky] & xm[kx]).astype(jnp.bfloat16)
            for ky in range(3) for kx in range(3)]
    return jnp.stack(rows, axis=0).reshape(9, M, 1)


def resnet_block_pallas_nhwc(x_nhwc, temb, p):
    B, H, W, Cin = x_nhwc.shape
    Cout = p['b1'].shape[0]
    Tc = temb.shape[1]
    HW = H * W
    assert Cin % NUM_GROUPS == 0 and Cout % NUM_GROUPS == 0

    has_nin = (Cin != Cout)
    # TODO(synk): use_conv_shortcut=True (3x3 shortcut conv) branch not implemented.

    vmem_limit = _vmem_limit_bytes()
    Bt = _derive_bt(B, HW, Cin, Cout, vmem_limit)

    def seg_mats(C):
        g = C // NUM_GROUPS
        gi = jnp.arange(C) // g
        S = (gi[:, None] == jnp.arange(NUM_GROUPS)[None, :]).astype(jnp.float32)
        return S, jnp.transpose(S)

    S_in, ST_in = seg_mats(Cin)
    S_out, ST_out = seg_mats(Cout)

    # torch Conv2d weights (O, I, kh, kw) -> (9, I, O), k = ky*3 + kx, bf16.
    w1_k = jnp.transpose(p['w1_oihw'], (2, 3, 1, 0)).reshape(9, Cin, Cout)
    w2_k = jnp.transpose(p['w2_oihw'], (2, 3, 1, 0)).reshape(9, Cout, Cout)

    row = lambda v: v.reshape(1, -1).astype(jnp.float32)
    bf16 = lambda v: v.astype(jnp.bfloat16)

    inputs = [x_nhwc.astype(jnp.bfloat16),              # bf16 activations in
              temb.reshape(B, 1, Tc).astype(jnp.float32),
              _tap_masks(Bt, H, W),
              row(p['g1']), row(p['b1g']), S_in, ST_in,
              bf16(w1_k), row(p['b1']),
              bf16(p['tw']), row(p['tb']),
              row(p['g2']), row(p['b2g']), S_out, ST_out,
              bf16(w2_k), row(p['b2'])]
    if has_nin:
        inputs += [bf16(p['nw'][:, :, 0, 0].T), row(p['nb'])]

    def build_and_run(taps_bf16, single_buffer):
        def const_spec(a):
            nd = a.ndim
            if single_buffer:
                # Constant index_map -> no point double-buffering the weights.
                return pl.BlockSpec(a.shape, lambda b: (0,) * nd,
                                    pipeline_mode=pl.Buffered(1))
            return pl.BlockSpec(a.shape, lambda b: (0,) * nd)

        in_specs = ([pl.BlockSpec((Bt, H, W, Cin), lambda b: (b, 0, 0, 0)),
                     pl.BlockSpec((Bt, 1, Tc), lambda b: (b, 0, 0))]
                    + [const_spec(a) for a in inputs[2:]])

        out = pl.pallas_call(
            _make_kernel(has_nin, taps_bf16),
            out_shape=jax.ShapeDtypeStruct((B, H, W, Cout), jnp.bfloat16),
            grid_spec=pltpu.PrefetchScalarGridSpec(
                num_scalar_prefetch=0,
                grid=(B // Bt,),
                in_specs=in_specs,
                out_specs=pl.BlockSpec((Bt, H, W, Cout), lambda b: (b, 0, 0, 0))),
            compiler_params=pltpu.CompilerParams(
                dimension_semantics=("parallel",),
                vmem_limit_bytes=vmem_limit),
        )(*inputs)
        return jax.block_until_ready(out)

    # Feature fallback: prefer bf16 tap rolls + single-buffered constants; if a
    # given Pallas build rejects either, degrade gracefully (still correct).
    last_err = None
    for taps_bf16, single_buffer in ((True, True), (True, False), (False, False)):
        try:
            return build_and_run(taps_bf16, single_buffer)
        except Exception as e:   # pragma: no cover - lowering/feature fallback
            last_err = e
    raise last_err


def resnet_block_pallas(x_nchw, temb, p):
    # NCHW adapter for PyTorch-interface parity; in a real model keep NHWC/bf16
    # across the whole block stack instead of transposing & casting per block.
    x_nhwc = jnp.transpose(x_nchw, (0, 2, 3, 1))
    out = resnet_block_pallas_nhwc(x_nhwc, temb, p)
    return jnp.transpose(out, (0, 3, 1, 2))


# ------------------------- pure-JAX reference -------------------------
def reference(x, temb, p):
    def gn(h, gamma, beta):
        B, C, H, W = h.shape
        g = C // NUM_GROUPS
        hr = h.reshape(B, NUM_GROUPS, g, H, W)
        mean = hr.mean(axis=(2, 3, 4), keepdims=True)
        var = hr.var(axis=(2, 3, 4), keepdims=True)
        hn = ((hr - mean) / jnp.sqrt(var + EPS)).reshape(B, C, H, W)
        return hn * gamma[None, :, None, None] + beta[None, :, None, None]

    def swish(v):
        return v * jax.nn.sigmoid(v)

    def conv3(h, w, b):
        out = lax.conv_general_dilated(
            h, w, (1, 1), ((1, 1), (1, 1)),
            dimension_numbers=('NCHW', 'OIHW', 'NCHW'))
        return out + b[None, :, None, None]

    h = swish(gn(x, p['g1'], p['b1g']))
    h = conv3(h, p['w1_oihw'], p['b1'])
    t = swish(temb) @ p['tw'] + p['tb']
    h = h + t[:, :, None, None]
    h = swish(gn(h, p['g2'], p['b2g']))
    h = conv3(h, p['w2_oihw'], p['b2'])
    if x.shape[1] != p['b1'].shape[0]:
        x = (jnp.einsum('bchw,oc->bohw', x, p['nw'][:, :, 0, 0])
             + p['nb'][None, :, None, None])
    return x + h


def make_params(key, Cin, Cout, Tc):
    ks = jax.random.split(key, 12)

    def rn(k, shape, scale=0.1):
        return jax.random.normal(k, shape, jnp.float32) * scale

    return {
        'g1': rn(ks[0], (Cin,), 0.2) + 1.0,
        'b1g': rn(ks[1], (Cin,)),
        'w1_oihw': rn(ks[2], (Cout, Cin, 3, 3)),
        'b1': rn(ks[3], (Cout,)),
        'tw': rn(ks[4], (Tc, Cout)),
        'tb': rn(ks[5], (Cout,)),
        'g2': rn(ks[6], (Cout,), 0.2) + 1.0,
        'b2g': rn(ks[7], (Cout,)),
        'w2_oihw': rn(ks[8], (Cout, Cout, 3, 3)),
        'b2': rn(ks[9], (Cout,)),
        'nw': rn(ks[10], (Cout, Cin, 1, 1)),
        'nb': rn(ks[11], (Cout,)),
    }


if __name__ == "__main__":
    key = jax.random.PRNGKey(0)
    kx, kt, kp = jax.random.split(key, 3)

    # GroupNorm(32 groups) requires channels % 32 == 0.
    B, Cin, Cout, H, W, Tc = 2, 32, 64, 8, 8, 128
    x = jax.random.normal(kx, (B, Cin, H, W), jnp.float32)
    temb = jax.random.normal(kt, (B, Tc), jnp.float32)
    params = make_params(kp, Cin, Cout, Tc)

    out = resnet_block_pallas(x, temb, params)
    out = jax.block_until_ready(out)

    ref = reference(x, temb, params)
    assert out.shape == (B, Cout, H, W), out.shape
    err_max = float(jnp.max(jnp.abs(out.astype(jnp.float32) - ref)))
    err_mean = float(jnp.mean(jnp.abs(out.astype(jnp.float32) - ref)))
    # bf16 I/O + bf16 matmuls + approx-reciprocal swish vs f32 reference:
    # loose but structure-catching tolerance (structural bugs give O(0.5-1)).
    assert err_max < 0.25 and err_mean < 0.05, (err_max, err_mean)
    print("KERNEL_OK")
</pallas_src>

<mosaic_0001>
module attributes {stable_mosaic.version = 11 : i64} {
  func.func @kernel(%arg0: i32, %arg1: memref<1x8x8x32xbf16, #tpu.memory_space<vmem>>, %arg2: memref<1x1x128xf32, #tpu.memory_space<vmem>>, %arg3: memref<9x64x1xbf16, #tpu.memory_space<vmem>>, %arg4: memref<1x32xf32, #tpu.memory_space<vmem>>, %arg5: memref<1x32xf32, #tpu.memory_space<vmem>>, %arg6: memref<32x32xf32, #tpu.memory_space<vmem>>, %arg7: memref<32x32xf32, #tpu.memory_space<vmem>>, %arg8: memref<9x32x64xbf16, #tpu.memory_space<vmem>>, %arg9: memref<1x64xf32, #tpu.memory_space<vmem>>, %arg10: memref<128x64xbf16, #tpu.memory_space<vmem>>, %arg11: memref<1x64xf32, #tpu.memory_space<vmem>>, %arg12: memref<1x64xf32, #tpu.memory_space<vmem>>, %arg13: memref<1x64xf32, #tpu.memory_space<vmem>>, %arg14: memref<64x32xf32, #tpu.memory_space<vmem>>, %arg15: memref<32x64xf32, #tpu.memory_space<vmem>>, %arg16: memref<9x64x64xbf16, #tpu.memory_space<vmem>>, %arg17: memref<1x64xf32, #tpu.memory_space<vmem>>, %arg18: memref<32x64xbf16, #tpu.memory_space<vmem>>, %arg19: memref<1x64xf32, #tpu.memory_space<vmem>>, %arg20: memref<1x8x8x64xbf16, #tpu.memory_space<vmem>>) attributes {dimension_semantics = [#tpu.dimension_semantics<parallel>], iteration_bounds = array<i64: 2>, scalar_prefetch = 0 : i64, scratch_operands = 0 : i64, tpu.core_type = #tpu.core_type<tc>, window_params = [{transform_indices = @transform_0, window_bounds = array<i64: 1, 8, 8, 32>}, {transform_indices = @transform_1, window_bounds = array<i64: 1, 1, 128>}, {pipeline_mode = #tpu.pipeline_mode<synchronous>, transform_indices = @transform_2, window_bounds = array<i64: 9, 64, 1>}, {pipeline_mode = #tpu.pipeline_mode<synchronous>, transform_indices = @transform_3, window_bounds = array<i64: 1, 32>}, {pipeline_mode = #tpu.pipeline_mode<synchronous>, transform_indices = @transform_4, window_bounds = array<i64: 1, 32>}, {pipeline_mode = #tpu.pipeline_mode<synchronous>, transform_indices = @transform_5, window_bounds = array<i64: 32, 32>}, {pipeline_mode = #tpu.pipeline_mode<synchronous>, transform_indices = @transform_6, window_bounds = array<i64: 32, 32>}, {pipeline_mode = #tpu.pipeline_mode<synchronous>, transform_indices = @transform_7, window_bounds = array<i64: 9, 32, 64>}, {pipeline_mode = #tpu.pipeline_mode<synchronous>, transform_indices = @transform_8, window_bounds = array<i64: 1, 64>}, {pipeline_mode = #tpu.pipeline_mode<synchronous>, transform_indices = @transform_9, window_bounds = array<i64: 128, 64>}, {pipeline_mode = #tpu.pipeline_mode<synchronous>, transform_indices = @transform_10, window_bounds = array<i64: 1, 64>}, {pipeline_mode = #tpu.pipeline_mode<synchronous>, transform_indices = @transform_11, window_bounds = array<i64: 1, 64>}, {pipeline_mode = #tpu.pipeline_mode<synchronous>, transform_indices = @transform_12, window_bounds = array<i64: 1, 64>}, {pipeline_mode = #tpu.pipeline_mode<synchronous>, transform_indices = @transform_13, window_bounds = array<i64: 64, 32>}, {pipeline_mode = #tpu.pipeline_mode<synchronous>, transform_indices = @transform_14, window_bounds = array<i64: 32, 64>}, {pipeline_mode = #tpu.pipeline_mode<synchronous>, transform_indices = @transform_15, window_bounds = array<i64: 9, 64, 64>}, {pipeline_mode = #tpu.pipeline_mode<synchronous>, transform_indices = @transform_16, window_bounds = array<i64: 1, 64>}, {pipeline_mode = #tpu.pipeline_mode<synchronous>, transform_indices = @transform_17, window_bounds = array<i64: 32, 64>}, {pipeline_mode = #tpu.pipeline_mode<synchronous>, transform_indices = @transform_18, window_bounds = array<i64: 1, 64>}, {transform_indices = @transform_19, window_bounds = array<i64: 1, 8, 8, 64>}]} {
    %c0 = arith.constant 0 : index
    %c0_0 = arith.constant 0 : index
    %c0_1 = arith.constant 0 : index
    %c0_2 = arith.constant 0 : index
    %0 = vector.load %arg1[%c0, %c0_0, %c0_1, %c0_2] : memref<1x8x8x32xbf16, #tpu.memory_space<vmem>>, vector<1x8x8x32xbf16>
    %1 = arith.extf %0 : vector<1x8x8x32xbf16> to vector<1x8x8x32xf32>
    %2 = vector.shape_cast %1 : vector<1x8x8x32xf32> to vector<1x64x32xf32>
    %c0_3 = arith.constant 0 : index
    %c0_4 = arith.constant 0 : index
    %3 = vector.load %arg4[%c0_3, %c0_4] : memref<1x32xf32, #tpu.memory_space<vmem>>, vector<1x32xf32>
    %c0_5 = arith.constant 0 : index
    %c0_6 = arith.constant 0 : index
    %4 = vector.load %arg5[%c0_5, %c0_6] : memref<1x32xf32, #tpu.memory_space<vmem>>, vector<1x32xf32>
    %cst = arith.constant dense<0.000000e+00> : vector<1x32xf32>
    %5 = vector.multi_reduction <add>, %2, %cst [1] : vector<1x64x32xf32> to vector<1x32xf32>
    %6 = arith.mulf %2, %2 : vector<1x64x32xf32>
    %cst_7 = arith.constant dense<0.000000e+00> : vector<1x32xf32>
    %7 = vector.multi_reduction <add>, %6, %cst_7 [1] : vector<1x64x32xf32> to vector<1x32xf32>
    %c0_8 = arith.constant 0 : index
    %c0_9 = arith.constant 0 : index
    %8 = vector.load %arg6[%c0_8, %c0_9] : memref<32x32xf32, #tpu.memory_space<vmem>>, vector<32x32xf32>
    %cst_10 = arith.constant dense<0.000000e+00> : vector<1x32xf32>
    %9 = tpu.matmul %5, %8, %cst_10 {dimension_numbers = #tpu.dot_dimension_numbers<[1], [0], [0], [1], [0, 0, 1, 1], [], []>} : vector<1x32xf32>, vector<32x32xf32>, vector<1x32xf32> -> vector<1x32xf32>
    %cst_11 = arith.constant 6.400000e+01 : f32
    %10 = vector.broadcast %cst_11 : f32 to vector<1x32xf32>
    %11 = arith.divf %9, %10 : vector<1x32xf32>
    %c0_12 = arith.constant 0 : index
    %c0_13 = arith.constant 0 : index
    %12 = vector.load %arg6[%c0_12, %c0_13] : memref<32x32xf32, #tpu.memory_space<vmem>>, vector<32x32xf32>
    %cst_14 = arith.constant dense<0.000000e+00> : vector<1x32xf32>
    %13 = tpu.matmul %7, %12, %cst_14 {dimension_numbers = #tpu.dot_dimension_numbers<[1], [0], [0], [1], [0, 0, 1, 1], [], []>} : vector<1x32xf32>, vector<32x32xf32>, vector<1x32xf32> -> vector<1x32xf32>
    %cst_15 = arith.constant 6.400000e+01 : f32
    %14 = vector.broadcast %cst_15 : f32 to vector<1x32xf32>
    %15 = arith.divf %13, %14 : vector<1x32xf32>
    %16 = arith.mulf %11, %11 : vector<1x32xf32>
    %17 = arith.subf %15, %16 : vector<1x32xf32>
    %cst_16 = arith.constant 9.99999997E-7 : f32
    %18 = vector.broadcast %cst_16 : f32 to vector<1x32xf32>
    %19 = arith.addf %17, %18 : vector<1x32xf32>
    %20 = math.rsqrt %19 : vector<1x32xf32>
    %c0_17 = arith.constant 0 : index
    %c0_18 = arith.constant 0 : index
    %21 = vector.load %arg7[%c0_17, %c0_18] : memref<32x32xf32, #tpu.memory_space<vmem>>, vector<32x32xf32>
    %cst_19 = arith.constant dense<0.000000e+00> : vector<1x32xf32>
    %22 = tpu.matmul %11, %21, %cst_19 {dimension_numbers = #tpu.dot_dimension_numbers<[1], [0], [0], [1], [0, 0, 1, 1], [], []>} : vector<1x32xf32>, vector<32x32xf32>, vector<1x32xf32> -> vector<1x32xf32>
    %c0_20 = arith.constant 0 : index
    %c0_21 = arith.constant 0 : index
    %23 = vector.load %arg7[%c0_20, %c0_21] : memref<32x32xf32, #tpu.memory_space<vmem>>, vector<32x32xf32>
    %cst_22 = arith.constant dense<0.000000e+00> : vector<1x32xf32>
    %24 = tpu.matmul %20, %23, %cst_22 {dimension_numbers = #tpu.dot_dimension_numbers<[1], [0], [0], [1], [0, 0, 1, 1], [], []>} : vector<1x32xf32>, vector<32x32xf32>, vector<1x32xf32> -> vector<1x32xf32>
    %25 = vector.shape_cast %22 : vector<1x32xf32> to vector<1x1x32xf32>
    %26 = vector.broadcast %25 : vector<1x1x32xf32> to vector<1x64x32xf32>
    %27 = arith.subf %2, %26 : vector<1x64x32xf32>
    %28 = vector.shape_cast %24 : vector<1x32xf32> to vector<1x1x32xf32>
    %29 = vector.shape_cast %3 : vector<1x32xf32> to vector<1x1x32xf32>
    %30 = arith.mulf %28, %29 : vector<1x1x32xf32>
    %31 = vector.broadcast %30 : vector<1x1x32xf32> to vector<1x64x32xf32>
    %32 = arith.mulf %27, %31 : vector<1x64x32xf32>
    %33 = vector.shape_cast %4 : vector<1x32xf32> to vector<1x1x32xf32>
    %34 = vector.broadcast %33 : vector<1x1x32xf32> to vector<1x64x32xf32>
    %35 = arith.addf %32, %34 : vector<1x64x32xf32>
    %cst_23 = arith.constant 0.000000e+00 : f32
    %36 = vector.broadcast %cst_23 : f32 to vector<1x64x32xf32>
    %37 = arith.subf %36, %35 : vector<1x64x32xf32>
    %38 = math.exp %37 : vector<1x64x32xf32>
    %cst_24 = arith.constant 1.000000e+00 : f32
    %39 = vector.broadcast %cst_24 : f32 to vector<1x64x32xf32>
    %40 = arith.addf %39, %38 : vector<1x64x32xf32>
    %41 = tpu.reciprocal %40 {approx = true} : vector<1x64x32xf32> -> vector<1x64x32xf32>
    %42 = arith.mulf %35, %41 : vector<1x64x32xf32>
    %43 = vector.shape_cast %42 : vector<1x64x32xf32> to vector<64x32xf32>
    %44 = arith.truncf %43 : vector<64x32xf32> to vector<64x32xbf16>
    %cst_25 = arith.constant 0.000000e+00 : f32
    %45 = vector.broadcast %cst_25 : f32 to vector<64x64xf32>
    %c9_i32 = arith.constant 9 : i32
    %46 = tpu.dynamic_rotate %44 by %c9_i32 dim 0 : vector<64x32xbf16>, i32 -> vector<64x32xbf16>
    %c0_26 = arith.constant 0 : index
    %c0_27 = arith.constant 0 : index
    %c0_28 = arith.constant 0 : index
    %47 = vector.load %arg3[%c0_26, %c0_27, %c0_28] : memref<9x64x1xbf16, #tpu.memory_space<vmem>>, vector<1x64x1xbf16>
    %48 = vector.shape_cast %47 : vector<1x64x1xbf16> to vector<64x1xbf16>
    %49 = vector.broadcast %48 : vector<64x1xbf16> to vector<64x32xbf16>
    %50 = arith.mulf %46, %49 : vector<64x32xbf16>
    %c0_29 = arith.constant 0 : index
    %c0_30 = arith.constant 0 : index
    %c0_31 = arith.constant 0 : index
    %51 = vector.load %arg8[%c0_29, %c0_30, %c0_31] : memref<9x32x64xbf16, #tpu.memory_space<vmem>>, vector<1x32x64xbf16>
    %52 = vector.shape_cast %51 : vector<1x32x64xbf16> to vector<32x64xbf16>
    %cst_32 = arith.constant dense<0.000000e+00> : vector<64x64xf32>
    %53 = tpu.matmul %50, %52, %cst_32 {dimension_numbers = #tpu.dot_dimension_numbers<[1], [0], [0], [1], [0, 0, 1, 1], [], []>} : vector<64x32xbf16>, vector<32x64xbf16>, vector<64x64xf32> -> vector<64x64xf32>
    %54 = arith.addf %45, %53 : vector<64x64xf32>
    %c8_i32 = arith.constant 8 : i32
    %55 = tpu.dynamic_rotate %44 by %c8_i32 dim 0 : vector<64x32xbf16>, i32 -> vector<64x32xbf16>
    %c1 = arith.constant 1 : index
    %c0_33 = arith.constant 0 : index
    %c0_34 = arith.constant 0 : index
    %56 = vector.load %arg3[%c1, %c0_33, %c0_34] : memref<9x64x1xbf16, #tpu.memory_space<vmem>>, vector<1x64x1xbf16>
    %57 = vector.shape_cast %56 : vector<1x64x1xbf16> to vector<64x1xbf16>
    %58 = vector.broadcast %57 : vector<64x1xbf16> to vector<64x32xbf16>
    %59 = arith.mulf %55, %58 : vector<64x32xbf16>
    %c1_35 = arith.constant 1 : index
    %c0_36 = arith.constant 0 : index
    %c0_37 = arith.constant 0 : index
    %60 = vector.load %arg8[%c1_35, %c0_36, %c0_37] : memref<9x32x64xbf16, #tpu.memory_space<vmem>>, vector<1x32x64xbf16>
    %61 = vector.shape_cast %60 : vector<1x32x64xbf16> to vector<32x64xbf16>
    %cst_38 = arith.constant dense<0.000000e+00> : vector<64x64xf32>
    %62 = tpu.matmul %59, %61, %cst_38 {dimension_numbers = #tpu.dot_dimension_numbers<[1], [0], [0], [1], [0, 0, 1, 1], [], []>} : vector<64x32xbf16>, vector<32x64xbf16>, vector<64x64xf32> -> vector<64x64xf32>
    %63 = arith.addf %54, %62 : vector<64x64xf32>
    %c7_i32 = arith.constant 7 : i32
    %64 = tpu.dynamic_rotate %44 by %c7_i32 dim 0 : vector<64x32xbf16>, i32 -> vector<64x32xbf16>
    %c2 = arith.constant 2 : index
    %c0_39 = arith.constant 0 : index
    %c0_40 = arith.constant 0 : index
    %65 = vector.load %arg3[%c2, %c0_39, %c0_40] : memref<9x64x1xbf16, #tpu.memory_space<vmem>>, vector<1x64x1xbf16>
    %66 = vector.shape_cast %65 : vector<1x64x1xbf16> to vector<64x1xbf16>
    %67 = vector.broadcast %66 : vector<64x1xbf16> to vector<64x32xbf16>
    %68 = arith.mulf %64, %67 : vector<64x32xbf16>
    %c2_41 = arith.constant 2 : index
    %c0_42 = arith.constant 0 : index
    %c0_43 = arith.constant 0 : index
    %69 = vector.load %arg8[%c2_41, %c0_42, %c0_43] : memref<9x32x64xbf16, #tpu.memory_space<vmem>>, vector<1x32x64xbf16>
    %70 = vector.shape_cast %69 : vector<1x32x64xbf16> to vector<32x64xbf16>
    %cst_44 = arith.constant dense<0.000000e+00> : vector<64x64xf32>
    %71 = tpu.matmul %68, %70, %cst_44 {dimension_numbers = #tpu.dot_dimension_numbers<[1], [0], [0], [1], [0, 0, 1, 1], [], []>} : vector<64x32xbf16>, vector<32x64xbf16>, vector<64x64xf32> -> vector<64x64xf32>
    %72 = arith.addf %63, %71 : vector<64x64xf32>
    %c1_i32 = arith.constant 1 : i32
    %73 = tpu.dynamic_rotate %44 by %c1_i32 dim 0 : vector<64x32xbf16>, i32 -> vector<64x32xbf16>
    %c3 = arith.constant 3 : index
    %c0_45 = arith.constant 0 : index
    %c0_46 = arith.constant 0 : index
    %74 = vector.load %arg3[%c3, %c0_45, %c0_46] : memref<9x64x1xbf16, #tpu.memory_space<vmem>>, vector<1x64x1xbf16>
    %75 = vector.shape_cast %74 : vector<1x64x1xbf16> to vector<64x1xbf16>
    %76 = vector.broadcast %75 : vector<64x1xbf16> to vector<64x32xbf16>
    %77 = arith.mulf %73, %76 : vector<64x32xbf16>
    %c3_47 = arith.constant 3 : index
    %c0_48 = arith.constant 0 : index
    %c0_49 = arith.constant 0 : index
    %78 = vector.load %arg8[%c3_47, %c0_48, %c0_49] : memref<9x32x64xbf16, #tpu.memory_space<vmem>>, vector<1x32x64xbf16>
    %79 = vector.shape_cast %78 : vector<1x32x64xbf16> to vector<32x64xbf16>
    %cst_50 = arith.constant dense<0.000000e+00> : vector<64x64xf32>
    %80 = tpu.matmul %77, %79, %cst_50 {dimension_numbers = #tpu.dot_dimension_numbers<[1], [0], [0], [1], [0, 0, 1, 1], [], []>} : vector<64x32xbf16>, vector<32x64xbf16>, vector<64x64xf32> -> vector<64x64xf32>
    %81 = arith.addf %72, %80 : vector<64x64xf32>
    %c4 = arith.constant 4 : index
    %c0_51 = arith.constant 0 : index
    %c0_52 = arith.constant 0 : index
    %82 = vector.load %arg8[%c4, %c0_51, %c0_52] : memref<9x32x64xbf16, #tpu.memory_space<vmem>>, vector<1x32x64xbf16>
    %83 = vector.shape_cast %82 : vector<1x32x64xbf16> to vector<32x64xbf16>
    %cst_53 = arith.constant dense<0.000000e+00> : vector<64x64xf32>
    %84 = tpu.matmul %44, %83, %cst_53 {dimension_numbers = #tpu.dot_dimension_numbers<[1], [0], [0], [1], [0, 0, 1, 1], [], []>} : vector<64x32xbf16>, vector<32x64xbf16>, vector<64x64xf32> -> vector<64x64xf32>
    %85 = arith.addf %81, %84 : vector<64x64xf32>
    %c63_i32 = arith.constant 63 : i32
    %86 = tpu.dynamic_rotate %44 by %c63_i32 dim 0 : vector<64x32xbf16>, i32 -> vector<64x32xbf16>
    %c5 = arith.constant 5 : index
    %c0_54 = arith.constant 0 : index
    %c0_55 = arith.constant 0 : index
    %87 = vector.load %arg3[%c5, %c0_54, %c0_55] : memref<9x64x1xbf16, #tpu.memory_space<vmem>>, vector<1x64x1xbf16>
    %88 = vector.shape_cast %87 : vector<1x64x1xbf16> to vector<64x1xbf16>
    %89 = vector.broadcast %88 : vector<64x1xbf16> to vector<64x32xbf16>
    %90 = arith.mulf %86, %89 : vector<64x32xbf16>
    %c5_56 = arith.constant 5 : index
    %c0_57 = arith.constant 0 : index
    %c0_58 = arith.constant 0 : index
    %91 = vector.load %arg8[%c5_56, %c0_57, %c0_58] : memref<9x32x64xbf16, #tpu.memory_space<vmem>>, vector<1x32x64xbf16>
    %92 = vector.shape_cast %91 : vector<1x32x64xbf16> to vector<32x64xbf16>
    %cst_59 = arith.constant dense<0.000000e+00> : vector<64x64xf32>
    %93 = tpu.matmul %90, %92, %cst_59 {dimension_numbers = #tpu.dot_dimension_numbers<[1], [0], [0], [1], [0, 0, 1, 1], [], []>} : vector<64x32xbf16>, vector<32x64xbf16>, vector<64x64xf32> -> vector<64x64xf32>
    %94 = arith.addf %85, %93 : vector<64x64xf32>
    %c57_i32 = arith.constant 57 : i32
    %95 = tpu.dynamic_rotate %44 by %c57_i32 dim 0 : vector<64x32xbf16>, i32 -> vector<64x32xbf16>
    %c6 = arith.constant 6 : index
    %c0_60 = arith.constant 0 : index
    %c0_61 = arith.constant 0 : index
    %96 = vector.load %arg3[%c6, %c0_60, %c0_61] : memref<9x64x1xbf16, #tpu.memory_space<vmem>>, vector<1x64x1xbf16>
    %97 = vector.shape_cast %96 : vector<1x64x1xbf16> to vector<64x1xbf16>
    %98 = vector.broadcast %97 : vector<64x1xbf16> to vector<64x32xbf16>
    %99 = arith.mulf %95, %98 : vector<64x32xbf16>
    %c6_62 = arith.constant 6 : index
    %c0_63 = arith.constant 0 : index
    %c0_64 = arith.constant 0 : index
    %100 = vector.load %arg8[%c6_62, %c0_63, %c0_64] : memref<9x32x64xbf16, #tpu.memory_space<vmem>>, vector<1x32x64xbf16>
    %101 = vector.shape_cast %100 : vector<1x32x64xbf16> to vector<32x64xbf16>
    %cst_65 = arith.constant dense<0.000000e+00> : vector<64x64xf32>
    %102 = tpu.matmul %99, %101, %cst_65 {dimension_numbers = #tpu.dot_dimension_numbers<[1], [0], [0], [1], [0, 0, 1, 1], [], []>} : vector<64x32xbf16>, vector<32x64xbf16>, vector<64x64xf32> -> vector<64x64xf32>
    %103 = arith.addf %94, %102 : vector<64x64xf32>
    %c56_i32 = arith.constant 56 : i32
    %104 = tpu.dynamic_rotate %44 by %c56_i32 dim 0 : vector<64x32xbf16>, i32 -> vector<64x32xbf16>
    %c7 = arith.constant 7 : index
    %c0_66 = arith.constant 0 : index
    %c0_67 = arith.constant 0 : index
    %105 = vector.load %arg3[%c7, %c0_66, %c0_67] : memref<9x64x1xbf16, #tpu.memory_space<vmem>>, vector<1x64x1xbf16>
    %106 = vector.shape_cast %105 : vector<1x64x1xbf16> to vector<64x1xbf16>
    %107 = vector.broadcast %106 : vector<64x1xbf16> to vector<64x32xbf16>
    %108 = arith.mulf %104, %107 : vector<64x32xbf16>
    %c7_68 = arith.constant 7 : index
    %c0_69 = arith.constant 0 : index
    %c0_70 = arith.constant 0 : index
    %109 = vector.load %arg8[%c7_68, %c0_69, %c0_70] : memref<9x32x64xbf16, #tpu.memory_space<vmem>>, vector<1x32x64xbf16>
    %110 = vector.shape_cast %109 : vector<1x32x64xbf16> to vector<32x64xbf16>
    %cst_71 = arith.constant dense<0.000000e+00> : vector<64x64xf32>
    %111 = tpu.matmul %108, %110, %cst_71 {dimension_numbers = #tpu.dot_dimension_numbers<[1], [0], [0], [1], [0, 0, 1, 1], [], []>} : vector<64x32xbf16>, vector<32x64xbf16>, vector<64x64xf32> -> vector<64x64xf32>
    %112 = arith.addf %103, %111 : vector<64x64xf32>
    %c55_i32 = arith.constant 55 : i32
    %113 = tpu.dynamic_rotate %44 by %c55_i32 dim 0 : vector<64x32xbf16>, i32 -> vector<64x32xbf16>
    %c8 = arith.constant 8 : index
    %c0_72 = arith.constant 0 : index
    %c0_73 = arith.constant 0 : index
    %114 = vector.load %arg3[%c8, %c0_72, %c0_73] : memref<9x64x1xbf16, #tpu.memory_space<vmem>>, vector<1x64x1xbf16>
    %115 = vector.shape_cast %114 : vector<1x64x1xbf16> to vector<64x1xbf16>
    %116 = vector.broadcast %115 : vector<64x1xbf16> to vector<64x32xbf16>
    %117 = arith.mulf %113, %116 : vector<64x32xbf16>
    %c8_74 = arith.constant 8 : index
    %c0_75 = arith.constant 0 : index
    %c0_76 = arith.constant 0 : index
    %118 = vector.load %arg8[%c8_74, %c0_75, %c0_76] : memref<9x32x64xbf16, #tpu.memory_space<vmem>>, vector<1x32x64xbf16>
    %119 = vector.shape_cast %118 : vector<1x32x64xbf16> to vector<32x64xbf16>
    %cst_77 = arith.constant dense<0.000000e+00> : vector<64x64xf32>
    %120 = tpu.matmul %117, %119, %cst_77 {dimension_numbers = #tpu.dot_dimension_numbers<[1], [0], [0], [1], [0, 0, 1, 1], [], []>} : vector<64x32xbf16>, vector<32x64xbf16>, vector<64x64xf32> -> vector<64x64xf32>
    %121 = arith.addf %112, %120 : vector<64x64xf32>
    %c0_78 = arith.constant 0 : index
    %c0_79 = arith.constant 0 : index
    %122 = vector.load %arg9[%c0_78, %c0_79] : memref<1x64xf32, #tpu.memory_space<vmem>>, vector<1x64xf32>
    %123 = vector.broadcast %122 : vector<1x64xf32> to vector<64x64xf32>
    %124 = arith.addf %121, %123 : vector<64x64xf32>
    %c0_80 = arith.constant 0 : index
    %c0_81 = arith.constant 0 : index
    %c0_82 = arith.constant 0 : index
    %125 = vector.load %arg2[%c0_80, %c0_81, %c0_82] : memref<1x1x128xf32, #tpu.memory_space<vmem>>, vector<1x1x128xf32>
    %126 = vector.shape_cast %125 : vector<1x1x128xf32> to vector<1x128xf32>
    %cst_83 = arith.constant 0.000000e+00 : f32
    %127 = vector.broadcast %cst_83 : f32 to vector<1x128xf32>
    %128 = arith.subf %127, %126 : vector<1x128xf32>
    %129 = math.exp %128 : vector<1x128xf32>
    %cst_84 = arith.constant 1.000000e+00 : f32
    %130 = vector.broadcast %cst_84 : f32 to vector<1x128xf32>
    %131 = arith.addf %130, %129 : vector<1x128xf32>
    %132 = tpu.reciprocal %131 {approx = true} : vector<1x128xf32> -> vector<1x128xf32>
    %133 = arith.mulf %126, %132 : vector<1x128xf32>
    %134 = arith.truncf %133 : vector<1x128xf32> to vector<1x128xbf16>
    %c0_85 = arith.constant 0 : index
    %c0_86 = arith.constant 0 : index
    %135 = vector.load %arg10[%c0_85, %c0_86] : memref<128x64xbf16, #tpu.memory_space<vmem>>, vector<128x64xbf16>
    %cst_87 = arith.constant dense<0.000000e+00> : vector<1x64xf32>
    %136 = tpu.matmul %134, %135, %cst_87 {dimension_numbers = #tpu.dot_dimension_numbers<[1], [0], [0], [1], [0, 0, 1, 1], [], []>} : vector<1x128xbf16>, vector<128x64xbf16>, vector<1x64xf32> -> vector<1x64xf32>
    %c0_88 = arith.constant 0 : index
    %c0_89 = arith.constant 0 : index
    %137 = vector.load %arg11[%c0_88, %c0_89] : memref<1x64xf32, #tpu.memory_space<vmem>>, vector<1x64xf32>
    %138 = arith.addf %136, %137 : vector<1x64xf32>
    %139 = vector.shape_cast %124 : vector<64x64xf32> to vector<1x64x64xf32>
    %140 = vector.shape_cast %138 : vector<1x64xf32> to vector<1x1x64xf32>
    %141 = vector.broadcast %140 : vector<1x1x64xf32> to vector<1x64x64xf32>
    %142 = arith.addf %139, %141 : vector<1x64x64xf32>
    %c0_90 = arith.constant 0 : index
    %c0_91 = arith.constant 0 : index
    %143 = vector.load %arg12[%c0_90, %c0_91] : memref<1x64xf32, #tpu.memory_space<vmem>>, vector<1x64xf32>
    %c0_92 = arith.constant 0 : index
    %c0_93 = arith.constant 0 : index
    %144 = vector.load %arg13[%c0_92, %c0_93] : memref<1x64xf32, #tpu.memory_space<vmem>>, vector<1x64xf32>
    %cst_94 = arith.constant dense<0.000000e+00> : vector<1x64xf32>
    %145 = vector.multi_reduction <add>, %142, %cst_94 [1] : vector<1x64x64xf32> to vector<1x64xf32>
    %146 = arith.mulf %142, %142 : vector<1x64x64xf32>
    %cst_95 = arith.constant dense<0.000000e+00> : vector<1x64xf32>
    %147 = vector.multi_reduction <add>, %146, %cst_95 [1] : vector<1x64x64xf32> to vector<1x64xf32>
    %c0_96 = arith.constant 0 : index
    %c0_97 = arith.constant 0 : index
    %148 = vector.load %arg14[%c0_96, %c0_97] : memref<64x32xf32, #tpu.memory_space<vmem>>, vector<64x32xf32>
    %cst_98 = arith.constant dense<0.000000e+00> : vector<1x32xf32>
    %149 = tpu.matmul %145, %148, %cst_98 {dimension_numbers = #tpu.dot_dimension_numbers<[1], [0], [0], [1], [0, 0, 1, 1], [], []>} : vector<1x64xf32>, vector<64x32xf32>, vector<1x32xf32> -> vector<1x32xf32>
    %cst_99 = arith.constant 1.280000e+02 : f32
    %150 = vector.broadcast %cst_99 : f32 to vector<1x32xf32>
    %151 = arith.divf %149, %150 : vector<1x32xf32>
    %c0_100 = arith.constant 0 : index
    %c0_101 = arith.constant 0 : index
    %152 = vector.load %arg14[%c0_100, %c0_101] : memref<64x32xf32, #tpu.memory_space<vmem>>, vector<64x32xf32>
    %cst_102 = arith.constant dense<0.000000e+00> : vector<1x32xf32>
    %153 = tpu.matmul %147, %152, %cst_102 {dimension_numbers = #tpu.dot_dimension_numbers<[1], [0], [0], [1], [0, 0, 1, 1], [], []>} : vector<1x64xf32>, vector<64x32xf32>, vector<1x32xf32> -> vector<1x32xf32>
    %cst_103 = arith.constant 1.280000e+02 : f32
    %154 = vector.broadcast %cst_103 : f32 to vector<1x32xf32>
    %155 = arith.divf %153, %154 : vector<1x32xf32>
    %156 = arith.mulf %151, %151 : vector<1x32xf32>
    %157 = arith.subf %155, %156 : vector<1x32xf32>
    %cst_104 = arith.constant 9.99999997E-7 : f32
    %158 = vector.broadcast %cst_104 : f32 to vector<1x32xf32>
    %159 = arith.addf %157, %158 : vector<1x32xf32>
    %160 = math.rsqrt %159 : vector<1x32xf32>
    %c0_105 = arith.constant 0 : index
    %c0_106 = arith.constant 0 : index
    %161 = vector.load %arg15[%c0_105, %c0_106] : memref<32x64xf32, #tpu.memory_space<vmem>>, vector<32x64xf32>
    %cst_107 = arith.constant dense<0.000000e+00> : vector<1x64xf32>
    %162 = tpu.matmul %151, %161, %cst_107 {dimension_numbers = #tpu.dot_dimension_numbers<[1], [0], [0], [1], [0, 0, 1, 1], [], []>} : vector<1x32xf32>, vector<32x64xf32>, vector<1x64xf32> -> vector<1x64xf32>
    %c0_108 = arith.constant 0 : index
    %c0_109 = arith.constant 0 : index
    %163 = vector.load %arg15[%c0_108, %c0_109] : memref<32x64xf32, #tpu.memory_space<vmem>>, vector<32x64xf32>
    %cst_110 = arith.constant dense<0.000000e+00> : vector<1x64xf32>
    %164 = tpu.matmul %160, %163, %cst_110 {dimension_numbers = #tpu.dot_dimension_numbers<[1], [0], [0], [1], [0, 0, 1, 1], [], []>} : vector<1x32xf32>, vector<32x64xf32>, vector<1x64xf32> -> vector<1x64xf32>
    %165 = vector.shape_cast %162 : vector<1x64xf32> to vector<1x1x64xf32>
    %166 = vector.broadcast %165 : vector<1x1x64xf32> to vector<1x64x64xf32>
    %167 = arith.subf %142, %166 : vector<1x64x64xf32>
    %168 = vector.shape_cast %164 : vector<1x64xf32> to vector<1x1x64xf32>
    %169 = vector.shape_cast %143 : vector<1x64xf32> to vector<1x1x64xf32>
    %170 = arith.mulf %168, %169 : vector<1x1x64xf32>
    %171 = vector.broadcast %170 : vector<1x1x64xf32> to vector<1x64x64xf32>
    %172 = arith.mulf %167, %171 : vector<1x64x64xf32>
    %173 = vector.shape_cast %144 : vector<1x64xf32> to vector<1x1x64xf32>
    %174 = vector.broadcast %173 : vector<1x1x64xf32> to vector<1x64x64xf32>
    %175 = arith.addf %172, %174 : vector<1x64x64xf32>
    %cst_111 = arith.constant 0.000000e+00 : f32
    %176 = vector.broadcast %cst_111 : f32 to vector<1x64x64xf32>
    %177 = arith.subf %176, %175 : vector<1x64x64xf32>
    %178 = math.exp %177 : vector<1x64x64xf32>
    %cst_112 = arith.constant 1.000000e+00 : f32
    %179 = vector.broadcast %cst_112 : f32 to vector<1x64x64xf32>
    %180 = arith.addf %179, %178 : vector<1x64x64xf32>
    %181 = tpu.reciprocal %180 {approx = true} : vector<1x64x64xf32> -> vector<1x64x64xf32>
    %182 = arith.mulf %175, %181 : vector<1x64x64xf32>
    %183 = vector.shape_cast %182 : vector<1x64x64xf32> to vector<64x64xf32>
    %184 = arith.truncf %183 : vector<64x64xf32> to vector<64x64xbf16>
    %cst_113 = arith.constant 0.000000e+00 : f32
    %185 = vector.broadcast %cst_113 : f32 to vector<64x64xf32>
    %c9_i32_114 = arith.constant 9 : i32
    %186 = tpu.dynamic_rotate %184 by %c9_i32_114 dim 0 : vector<64x64xbf16>, i32 -> vector<64x64xbf16>
    %c0_115 = arith.constant 0 : index
    %c0_116 = arith.constant 0 : index
    %c0_117 = arith.constant 0 : index
    %187 = vector.load %arg3[%c0_115, %c0_116, %c0_117] : memref<9x64x1xbf16, #tpu.memory_space<vmem>>, vector<1x64x1xbf16>
    %188 = vector.shape_cast %187 : vector<1x64x1xbf16> to vector<64x1xbf16>
    %189 = vector.broadcast %188 : vector<64x1xbf16> to vector<64x64xbf16>
    %190 = arith.mulf %186, %189 : vector<64x64xbf16>
    %c0_118 = arith.constant 0 : index
    %c0_119 = arith.constant 0 : index
    %c0_120 = arith.constant 0 : index
    %191 = vector.load %arg16[%c0_118, %c0_119, %c0_120] : memref<9x64x64xbf16, #tpu.memory_space<vmem>>, vector<1x64x64xbf16>
    %192 = vector.shape_cast %191 : vector<1x64x64xbf16> to vector<64x64xbf16>
    %cst_121 = arith.constant dense<0.000000e+00> : vector<64x64xf32>
    %193 = tpu.matmul %190, %192, %cst_121 {dimension_numbers = #tpu.dot_dimension_numbers<[1], [0], [0], [1], [0, 0, 1, 1], [], []>} : vector<64x64xbf16>, vector<64x64xbf16>, vector<64x64xf32> -> vector<64x64xf32>
    %194 = arith.addf %185, %193 : vector<64x64xf32>
    %c8_i32_122 = arith.constant 8 : i32
    %195 = tpu.dynamic_rotate %184 by %c8_i32_122 dim 0 : vector<64x64xbf16>, i32 -> vector<64x64xbf16>
    %c1_123 = arith.constant 1 : index
    %c0_124 = arith.constant 0 : index
    %c0_125 = arith.constant 0 : index
    %196 = vector.load %arg3[%c1_123, %c0_124, %c0_125] : memref<9x64x1xbf16, #tpu.memory_space<vmem>>, vector<1x64x1xbf16>
    %197 = vector.shape_cast %196 : vector<1x64x1xbf16> to vector<64x1xbf16>
    %198 = vector.broadcast %197 : vector<64x1xbf16> to vector<64x64xbf16>
    %199 = arith.mulf %195, %198 : vector<64x64xbf16>
    %c1_126 = arith.constant 1 : index
    %c0_127 = arith.constant 0 : index
    %c0_128 = arith.constant 0 : index
    %200 = vector.load %arg16[%c1_126, %c0_127, %c0_128] : memref<9x64x64xbf16, #tpu.memory_space<vmem>>, vector<1x64x64xbf16>
    %201 = vector.shape_cast %200 : vector<1x64x64xbf16> to vector<64x64xbf16>
    %cst_129 = arith.constant dense<0.000000e+00> : vector<64x64xf32>
    %202 = tpu.matmul %199, %201, %cst_129 {dimension_numbers = #tpu.dot_dimension_numbers<[1], [0], [0], [1], [0, 0, 1, 1], [], []>} : vector<64x64xbf16>, vector<64x64xbf16>, vector<64x64xf32> -> vector<64x64xf32>
    %203 = arith.addf %194, %202 : vector<64x64xf32>
    %c7_i32_130 = arith.constant 7 : i32
    %204 = tpu.dynamic_rotate %184 by %c7_i32_130 dim 0 : vector<64x64xbf16>, i32 -> vector<64x64xbf16>
    %c2_131 = arith.constant 2 : index
    %c0_132 = arith.constant 0 : index
    %c0_133 = arith.constant 0 : index
    %205 = vector.load %arg3[%c2_131, %c0_132, %c0_133] : memref<9x64x1xbf16, #tpu.memory_space<vmem>>, vector<1x64x1xbf16>
    %206 = vector.shape_cast %205 : vector<1x64x1xbf16> to vector<64x1xbf16>
    %207 = vector.broadcast %206 : vector<64x1xbf16> to vector<64x64xbf16>
    %208 = arith.mulf %204, %207 : vector<64x64xbf16>
    %c2_134 = arith.constant 2 : index
    %c0_135 = arith.constant 0 : index
    %c0_136 = arith.constant 0 : index
    %209 = vector.load %arg16[%c2_134, %c0_135, %c0_136] : memref<9x64x64xbf16, #tpu.memory_space<vmem>>, vector<1x64x64xbf16>
    %210 = vector.shape_cast %209 : vector<1x64x64xbf16> to vector<64x64xbf16>
    %cst_137 = arith.constant dense<0.000000e+00> : vector<64x64xf32>
    %211 = tpu.matmul %208, %210, %cst_137 {dimension_numbers = #tpu.dot_dimension_numbers<[1], [0], [0], [1], [0, 0, 1, 1], [], []>} : vector<64x64xbf16>, vector<64x64xbf16>, vector<64x64xf32> -> vector<64x64xf32>
    %212 = arith.addf %203, %211 : vector<64x64xf32>
    %c1_i32_138 = arith.constant 1 : i32
    %213 = tpu.dynamic_rotate %184 by %c1_i32_138 dim 0 : vector<64x64xbf16>, i32 -> vector<64x64xbf16>
    %c3_139 = arith.constant 3 : index
    %c0_140 = arith.constant 0 : index
    %c0_141 = arith.constant 0 : index
    %214 = vector.load %arg3[%c3_139, %c0_140, %c0_141] : memref<9x64x1xbf16, #tpu.memory_space<vmem>>, vector<1x64x1xbf16>
    %215 = vector.shape_cast %214 : vector<1x64x1xbf16> to vector<64x1xbf16>
    %216 = vector.broadcast %215 : vector<64x1xbf16> to vector<64x64xbf16>
    %217 = arith.mulf %213, %216 : vector<64x64xbf16>
    %c3_142 = arith.constant 3 : index
    %c0_143 = arith.constant 0 : index
    %c0_144 = arith.constant 0 : index
    %218 = vector.load %arg16[%c3_142, %c0_143, %c0_144] : memref<9x64x64xbf16, #tpu.memory_space<vmem>>, vector<1x64x64xbf16>
    %219 = vector.shape_cast %218 : vector<1x64x64xbf16> to vector<64x64xbf16>
    %cst_145 = arith.constant dense<0.000000e+00> : vector<64x64xf32>
    %220 = tpu.matmul %217, %219, %cst_145 {dimension_numbers = #tpu.dot_dimension_numbers<[1], [0], [0], [1], [0, 0, 1, 1], [], []>} : vector<64x64xbf16>, vector<64x64xbf16>, vector<64x64xf32> -> vector<64x64xf32>
    %221 = arith.addf %212, %220 : vector<64x64xf32>
    %c4_146 = arith.constant 4 : index
    %c0_147 = arith.constant 0 : index
    %c0_148 = arith.constant 0 : index
    %222 = vector.load %arg16[%c4_146, %c0_147, %c0_148] : memref<9x64x64xbf16, #tpu.memory_space<vmem>>, vector<1x64x64xbf16>
    %223 = vector.shape_cast %222 : vector<1x64x64xbf16> to vector<64x64xbf16>
    %cst_149 = arith.constant dense<0.000000e+00> : vector<64x64xf32>
    %224 = tpu.matmul %184, %223, %cst_149 {dimension_numbers = #tpu.dot_dimension_numbers<[1], [0], [0], [1], [0, 0, 1, 1], [], []>} : vector<64x64xbf16>, vector<64x64xbf16>, vector<64x64xf32> -> vector<64x64xf32>
    %225 = arith.addf %221, %224 : vector<64x64xf32>
    %c63_i32_150 = arith.constant 63 : i32
    %226 = tpu.dynamic_rotate %184 by %c63_i32_150 dim 0 : vector<64x64xbf16>, i32 -> vector<64x64xbf16>
    %c5_151 = arith.constant 5 : index
    %c0_152 = arith.constant 0 : index
    %c0_153 = arith.constant 0 : index
    %227 = vector.load %arg3[%c5_151, %c0_152, %c0_153] : memref<9x64x1xbf16, #tpu.memory_space<vmem>>, vector<1x64x1xbf16>
    %228 = vector.shape_cast %227 : vector<1x64x1xbf16> to vector<64x1xbf16>
    %229 = vector.broadcast %228 : vector<64x1xbf16> to vector<64x64xbf16>
    %230 = arith.mulf %226, %229 : vector<64x64xbf16>
    %c5_154 = arith.constant 5 : index
    %c0_155 = arith.constant 0 : index
    %c0_156 = arith.constant 0 : index
    %231 = vector.load %arg16[%c5_154, %c0_155, %c0_156] : memref<9x64x64xbf16, #tpu.memory_space<vmem>>, vector<1x64x64xbf16>
    %232 = vector.shape_cast %231 : vector<1x64x64xbf16> to vector<64x64xbf16>
    %cst_157 = arith.constant dense<0.000000e+00> : vector<64x64xf32>
    %233 = tpu.matmul %230, %232, %cst_157 {dimension_numbers = #tpu.dot_dimension_numbers<[1], [0], [0], [1], [0, 0, 1, 1], [], []>} : vector<64x64xbf16>, vector<64x64xbf16>, vector<64x64xf32> -> vector<64x64xf32>
    %234 = arith.addf %225, %233 : vector<64x64xf32>
    %c57_i32_158 = arith.constant 57 : i32
    %235 = tpu.dynamic_rotate %184 by %c57_i32_158 dim 0 : vector<64x64xbf16>, i32 -> vector<64x64xbf16>
    %c6_159 = arith.constant 6 : index
    %c0_160 = arith.constant 0 : index
    %c0_161 = arith.constant 0 : index
    %236 = vector.load %arg3[%c6_159, %c0_160, %c0_161] : memref<9x64x1xbf16, #tpu.memory_space<vmem>>, vector<1x64x1xbf16>
    %237 = vector.shape_cast %236 : vector<1x64x1xbf16> to vector<64x1xbf16>
    %238 = vector.broadcast %237 : vector<64x1xbf16> to vector<64x64xbf16>
    %239 = arith.mulf %235, %238 : vector<64x64xbf16>
    %c6_162 = arith.constant 6 : index
    %c0_163 = arith.constant 0 : index
    %c0_164 = arith.constant 0 : index
    %240 = vector.load %arg16[%c6_162, %c0_163, %c0_164] : memref<9x64x64xbf16, #tpu.memory_space<vmem>>, vector<1x64x64xbf16>
    %241 = vector.shape_cast %240 : vector<1x64x64xbf16> to vector<64x64xbf16>
    %cst_165 = arith.constant dense<0.000000e+00> : vector<64x64xf32>
    %242 = tpu.matmul %239, %241, %cst_165 {dimension_numbers = #tpu.dot_dimension_numbers<[1], [0], [0], [1], [0, 0, 1, 1], [], []>} : vector<64x64xbf16>, vector<64x64xbf16>, vector<64x64xf32> -> vector<64x64xf32>
    %243 = arith.addf %234, %242 : vector<64x64xf32>
    %c56_i32_166 = arith.constant 56 : i32
    %244 = tpu.dynamic_rotate %184 by %c56_i32_166 dim 0 : vector<64x64xbf16>, i32 -> vector<64x64xbf16>
    %c7_167 = arith.constant 7 : index
    %c0_168 = arith.constant 0 : index
    %c0_169 = arith.constant 0 : index
    %245 = vector.load %arg3[%c7_167, %c0_168, %c0_169] : memref<9x64x1xbf16, #tpu.memory_space<vmem>>, vector<1x64x1xbf16>
    %246 = vector.shape_cast %245 : vector<1x64x1xbf16> to vector<64x1xbf16>
    %247 = vector.broadcast %246 : vector<64x1xbf16> to vector<64x64xbf16>
    %248 = arith.mulf %244, %247 : vector<64x64xbf16>
    %c7_170 = arith.constant 7 : index
    %c0_171 = arith.constant 0 : index
    %c0_172 = arith.constant 0 : index
    %249 = vector.load %arg16[%c7_170, %c0_171, %c0_172] : memref<9x64x64xbf16, #tpu.memory_space<vmem>>, vector<1x64x64xbf16>
    %250 = vector.shape_cast %249 : vector<1x64x64xbf16> to vector<64x64xbf16>
    %cst_173 = arith.constant dense<0.000000e+00> : vector<64x64xf32>
    %251 = tpu.matmul %248, %250, %cst_173 {dimension_numbers = #tpu.dot_dimension_numbers<[1], [0], [0], [1], [0, 0, 1, 1], [], []>} : vector<64x64xbf16>, vector<64x64xbf16>, vector<64x64xf32> -> vector<64x64xf32>
    %252 = arith.addf %243, %251 : vector<64x64xf32>
    %c55_i32_174 = arith.constant 55 : i32
    %253 = tpu.dynamic_rotate %184 by %c55_i32_174 dim 0 : vector<64x64xbf16>, i32 -> vector<64x64xbf16>
    %c8_175 = arith.constant 8 : index
    %c0_176 = arith.constant 0 : index
    %c0_177 = arith.constant 0 : index
    %254 = vector.load %arg3[%c8_175, %c0_176, %c0_177] : memref<9x64x1xbf16, #tpu.memory_space<vmem>>, vector<1x64x1xbf16>
    %255 = vector.shape_cast %254 : vector<1x64x1xbf16> to vector<64x1xbf16>
    %256 = vector.broadcast %255 : vector<64x1xbf16> to vector<64x64xbf16>
    %257 = arith.mulf %253, %256 : vector<64x64xbf16>
    %c8_178 = arith.constant 8 : index
    %c0_179 = arith.constant 0 : index
    %c0_180 = arith.constant 0 : index
    %258 = vector.load %arg16[%c8_178, %c0_179, %c0_180] : memref<9x64x64xbf16, #tpu.memory_space<vmem>>, vector<1x64x64xbf16>
    %259 = vector.shape_cast %258 : vector<1x64x64xbf16> to vector<64x64xbf16>
    %cst_181 = arith.constant dense<0.000000e+00> : vector<64x64xf32>
    %260 = tpu.matmul %257, %259, %cst_181 {dimension_numbers = #tpu.dot_dimension_numbers<[1], [0], [0], [1], [0, 0, 1, 1], [], []>} : vector<64x64xbf16>, vector<64x64xbf16>, vector<64x64xf32> -> vector<64x64xf32>
    %261 = arith.addf %252, %260 : vector<64x64xf32>
    %c0_182 = arith.constant 0 : index
    %c0_183 = arith.constant 0 : index
    %262 = vector.load %arg17[%c0_182, %c0_183] : memref<1x64xf32, #tpu.memory_space<vmem>>, vector<1x64xf32>
    %263 = vector.broadcast %262 : vector<1x64xf32> to vector<64x64xf32>
    %264 = arith.addf %261, %263 : vector<64x64xf32>
    %c0_184 = arith.constant 0 : index
    %c0_185 = arith.constant 0 : index
    %c0_186 = arith.constant 0 : index
    %c0_187 = arith.constant 0 : index
    %265 = vector.load %arg1[%c0_184, %c0_185, %c0_186, %c0_187] : memref<1x8x8x32xbf16, #tpu.memory_space<vmem>>, vector<1x8x8x32xbf16>
    %266 = vector.shape_cast %265 : vector<1x8x8x32xbf16> to vector<64x32xbf16>
    %c0_188 = arith.constant 0 : index
    %c0_189 = arith.constant 0 : index
    %267 = vector.load %arg18[%c0_188, %c0_189] : memref<32x64xbf16, #tpu.memory_space<vmem>>, vector<32x64xbf16>
    %cst_190 = arith.constant dense<0.000000e+00> : vector<64x64xf32>
    %268 = tpu.matmul %266, %267, %cst_190 {dimension_numbers = #tpu.dot_dimension_numbers<[1], [0], [0], [1], [0, 0, 1, 1], [], []>} : vector<64x32xbf16>, vector<32x64xbf16>, vector<64x64xf32> -> vector<64x64xf32>
    %c0_191 = arith.constant 0 : index
    %c0_192 = arith.constant 0 : index
    %269 = vector.load %arg19[%c0_191, %c0_192] : memref<1x64xf32, #tpu.memory_space<vmem>>, vector<1x64xf32>
    %270 = vector.broadcast %269 : vector<1x64xf32> to vector<64x64xf32>
    %271 = arith.addf %268, %270 : vector<64x64xf32>
    %272 = arith.addf %271, %264 : vector<64x64xf32>
    %273 = vector.shape_cast %272 : vector<64x64xf32> to vector<1x8x8x64xf32>
    %274 = arith.truncf %273 : vector<1x8x8x64xf32> to vector<1x8x8x64xbf16>
    %c0_193 = arith.constant 0 : index
    %c0_194 = arith.constant 0 : index
    %c0_195 = arith.constant 0 : index
    %c0_196 = arith.constant 0 : index
    %275 = vector.load %arg20[%c0_193, %c0_194, %c0_195, %c0_196] : memref<1x8x8x64xbf16, #tpu.memory_space<vmem>>, vector<1x8x8x64xbf16>
    tpu.vector_store %arg20[%c0_193, %c0_194, %c0_195, %c0_196], %274 {strides = array<i32>} : memref<1x8x8x64xbf16, #tpu.memory_space<vmem>>, vector<1x8x8x64xbf16>,
    return
  }
  func.func @transform_0(%arg0: i32) -> (i32, i32, i32, i32) {
    %c0_i32 = arith.constant 0 : i32
    %c0_i32_0 = arith.constant 0 : i32
    %c0_i32_1 = arith.constant 0 : i32
    %c0_i32_2 = arith.constant 0 : i32
    return %arg0, %c0_i32, %c0_i32_0, %c0_i32_1 : i32, i32, i32, i32
  }
  func.func @transform_1(%arg0: i32) -> (i32, i32, i32) {
    %c0_i32 = arith.constant 0 : i32
    %c0_i32_0 = arith.constant 0 : i32
    %c0_i32_1 = arith.constant 0 : i32
    return %arg0, %c0_i32, %c0_i32_0 : i32, i32, i32
  }
  func.func @transform_2(%arg0: i32) -> (i32, i32, i32) {
    %c0_i32 = arith.constant 0 : i32
    %c0_i32_0 = arith.constant 0 : i32
    %c0_i32_1 = arith.constant 0 : i32
    %c0_i32_2 = arith.constant 0 : i32
    return %c0_i32, %c0_i32_0, %c0_i32_1 : i32, i32, i32
  }
  func.func @transform_3(%arg0: i32) -> (i32, i32) {
    %c0_i32 = arith.constant 0 : i32
    %c0_i32_0 = arith.constant 0 : i32
    %c0_i32_1 = arith.constant 0 : i32
    return %c0_i32, %c0_i32_0 : i32, i32
  }
  func.func @transform_4(%arg0: i32) -> (i32, i32) {
    %c0_i32 = arith.constant 0 : i32
    %c0_i32_0 = arith.constant 0 : i32
    %c0_i32_1 = arith.constant 0 : i32
    return %c0_i32, %c0_i32_0 : i32, i32
  }
  func.func @transform_5(%arg0: i32) -> (i32, i32) {
    %c0_i32 = arith.constant 0 : i32
    %c0_i32_0 = arith.constant 0 : i32
    %c0_i32_1 = arith.constant 0 : i32
    return %c0_i32, %c0_i32_0 : i32, i32
  }
  func.func @transform_6(%arg0: i32) -> (i32, i32) {
    %c0_i32 = arith.constant 0 : i32
    %c0_i32_0 = arith.constant 0 : i32
    %c0_i32_1 = arith.constant 0 : i32
    return %c0_i32, %c0_i32_0 : i32, i32
  }
  func.func @transform_7(%arg0: i32) -> (i32, i32, i32) {
    %c0_i32 = arith.constant 0 : i32
    %c0_i32_0 = arith.constant 0 : i32
    %c0_i32_1 = arith.constant 0 : i32
    %c0_i32_2 = arith.constant 0 : i32
    return %c0_i32, %c0_i32_0, %c0_i32_1 : i32, i32, i32
  }
  func.func @transform_8(%arg0: i32) -> (i32, i32) {
    %c0_i32 = arith.constant 0 : i32
    %c0_i32_0 = arith.constant 0 : i32
    %c0_i32_1 = arith.constant 0 : i32
    return %c0_i32, %c0_i32_0 : i32, i32
  }
  func.func @transform_9(%arg0: i32) -> (i32, i32) {
    %c0_i32 = arith.constant 0 : i32
    %c0_i32_0 = arith.constant 0 : i32
    %c0_i32_1 = arith.constant 0 : i32
    return %c0_i32, %c0_i32_0 : i32, i32
  }
  func.func @transform_10(%arg0: i32) -> (i32, i32) {
    %c0_i32 = arith.constant 0 : i32
    %c0_i32_0 = arith.constant 0 : i32
    %c0_i32_1 = arith.constant 0 : i32
    return %c0_i32, %c0_i32_0 : i32, i32
  }
  func.func @transform_11(%arg0: i32) -> (i32, i32) {
    %c0_i32 = arith.constant 0 : i32
    %c0_i32_0 = arith.constant 0 : i32
    %c0_i32_1 = arith.constant 0 : i32
    return %c0_i32, %c0_i32_0 : i32, i32
  }
  func.func @transform_12(%arg0: i32) -> (i32, i32) {
    %c0_i32 = arith.constant 0 : i32
    %c0_i32_0 = arith.constant 0 : i32
    %c0_i32_1 = arith.constant 0 : i32
    return %c0_i32, %c0_i32_0 : i32, i32
  }
  func.func @transform_13(%arg0: i32) -> (i32, i32) {
    %c0_i32 = arith.constant 0 : i32
    %c0_i32_0 = arith.constant 0 : i32
    %c0_i32_1 = arith.constant 0 : i32
    return %c0_i32, %c0_i32_0 : i32, i32
  }
  func.func @transform_14(%arg0: i32) -> (i32, i32) {
    %c0_i32 = arith.constant 0 : i32
    %c0_i32_0 = arith.constant 0 : i32
    %c0_i32_1 = arith.constant 0 : i32
    return %c0_i32, %c0_i32_0 : i32, i32
  }
  func.func @transform_15(%arg0: i32) -> (i32, i32, i32) {
    %c0_i32 = arith.constant 0 : i32
    %c0_i32_0 = arith.constant 0 : i32
    %c0_i32_1 = arith.constant 0 : i32
    %c0_i32_2 = arith.constant 0 : i32
    return %c0_i32, %c0_i32_0, %c0_i32_1 : i32, i32, i32
  }
  func.func @transform_16(%arg0: i32) -> (i32, i32) {
    %c0_i32 = arith.constant 0 : i32
    %c0_i32_0 = arith.constant 0 : i32
    %c0_i32_1 = arith.constant 0 : i32
    return %c0_i32, %c0_i32_0 : i32, i32
  }
  func.func @transform_17(%arg0: i32) -> (i32, i32) {
    %c0_i32 = arith.constant 0 : i32
    %c0_i32_0 = arith.constant 0 : i32
    %c0_i32_1 = arith.constant 0 : i32
    return %c0_i32, %c0_i32_0 : i32, i32
  }
  func.func @transform_18(%arg0: i32) -> (i32, i32) {
    %c0_i32 = arith.constant 0 : i32
    %c0_i32_0 = arith.constant 0 : i32
    %c0_i32_1 = arith.constant 0 : i32
    return %c0_i32, %c0_i32_0 : i32, i32
  }
  func.func @transform_19(%arg0: i32) -> (i32, i32, i32, i32) {
    %c0_i32 = arith.constant 0 : i32
    %c0_i32_0 = arith.constant 0 : i32
    %c0_i32_1 = arith.constant 0 : i32
    %c0_i32_2 = arith.constant 0 : i32
    return %arg0, %c0_i32, %c0_i32_0, %c0_i32_1 : i32, i32, i32, i32
  }
}

module attributes {stable_mosaic.version = 11 : i64} {
  func.func @kernel(%arg0: i32, %arg1: memref<1x8x8x32xbf16, #tpu.memory_space<vmem>>, %arg2: memref<1x1x128xf32, #tpu.memory_space<vmem>>, %arg3: memref<9x64x1xbf16, #tpu.memory_space<vmem>>, %arg4: memref<1x32xf32, #tpu.memory_space<vmem>>, %arg5: memref<1x32xf32, #tpu.memory_space<vmem>>, %arg6: memref<32x32xf32, #tpu.memory_space<vmem>>, %arg7: memref<32x32xf32, #tpu.memory_space<vmem>>, %arg8: memref<9x32x64xbf16, #tpu.memory_space<vmem>>, %arg9: memref<1x64xf32, #tpu.memory_space<vmem>>, %arg10: memref<128x64xbf16, #tpu.memory_space<vmem>>, %arg11: memref<1x64xf32, #tpu.memory_space<vmem>>, %arg12: memref<1x64xf32, #tpu.memory_space<vmem>>, %arg13: memref<1x64xf32, #tpu.memory_space<vmem>>, %arg14: memref<64x32xf32, #tpu.memory_space<vmem>>, %arg15: memref<32x64xf32, #tpu.memory_space<vmem>>, %arg16: memref<9x64x64xbf16, #tpu.memory_space<vmem>>, %arg17: memref<1x64xf32, #tpu.memory_space<vmem>>, %arg18: memref<32x64xbf16, #tpu.memory_space<vmem>>, %arg19: memref<1x64xf32, #tpu.memory_space<vmem>>, %arg20: memref<1x8x8x64xbf16, #tpu.memory_space<vmem>>) attributes {dimension_semantics = [#tpu.dimension_semantics<parallel>], iteration_bounds = array<i64: 2>, scalar_prefetch = 0 : i64, scratch_operands = 0 : i64, tpu.core_type = #tpu.core_type<tc>, window_params = [{transform_indices = @transform_0, window_bounds = array<i64: 1, 8, 8, 32>}, {transform_indices = @transform_1, window_bounds = array<i64: 1, 1, 128>}, {pipeline_mode = #tpu.pipeline_mode<synchronous>, transform_indices = @transform_2, window_bounds = array<i64: 9, 64, 1>}, {pipeline_mode = #tpu.pipeline_mode<synchronous>, transform_indices = @transform_3, window_bounds = array<i64: 1, 32>}, {pipeline_mode = #tpu.pipeline_mode<synchronous>, transform_indices = @transform_4, window_bounds = array<i64: 1, 32>}, {pipeline_mode = #tpu.pipeline_mode<synchronous>, transform_indices = @transform_5, window_bounds = array<i64: 32, 32>}, {pipeline_mode = #tpu.pipeline_mode<synchronous>, transform_indices = @transform_6, window_bounds = array<i64: 32, 32>}, {pipeline_mode = #tpu.pipeline_mode<synchronous>, transform_indices = @transform_7, window_bounds = array<i64: 9, 32, 64>}, {pipeline_mode = #tpu.pipeline_mode<synchronous>, transform_indices = @transform_8, window_bounds = array<i64: 1, 64>}, {pipeline_mode = #tpu.pipeline_mode<synchronous>, transform_indices = @transform_9, window_bounds = array<i64: 128, 64>}, {pipeline_mode = #tpu.pipeline_mode<synchronous>, transform_indices = @transform_10, window_bounds = array<i64: 1, 64>}, {pipeline_mode = #tpu.pipeline_mode<synchronous>, transform_indices = @transform_11, window_bounds = array<i64: 1, 64>}, {pipeline_mode = #tpu.pipeline_mode<synchronous>, transform_indices = @transform_12, window_bounds = array<i64: 1, 64>}, {pipeline_mode = #tpu.pipeline_mode<synchronous>, transform_indices = @transform_13, window_bounds = array<i64: 64, 32>}, {pipeline_mode = #tpu.pipeline_mode<synchronous>, transform_indices = @transform_14, window_bounds = array<i64: 32, 64>}, {pipeline_mode = #tpu.pipeline_mode<synchronous>, transform_indices = @transform_15, window_bounds = array<i64: 9, 64, 64>}, {pipeline_mode = #tpu.pipeline_mode<synchronous>, transform_indices = @transform_16, window_bounds = array<i64: 1, 64>}, {pipeline_mode = #tpu.pipeline_mode<synchronous>, transform_indices = @transform_17, window_bounds = array<i64: 32, 64>}, {pipeline_mode = #tpu.pipeline_mode<synchronous>, transform_indices = @transform_18, window_bounds = array<i64: 1, 64>}, {transform_indices = @transform_19, window_bounds = array<i64: 1, 8, 8, 64>}]} {
    %c0 = arith.constant 0 : index
    %c0_0 = arith.constant 0 : index
    %c0_1 = arith.constant 0 : index
    %c0_2 = arith.constant 0 : index
    %0 = vector.load %arg1[%c0, %c0_0, %c0_1, %c0_2] : memref<1x8x8x32xbf16, #tpu.memory_space<vmem>>, vector<1x8x8x32xbf16>
    %1 = arith.extf %0 : vector<1x8x8x32xbf16> to vector<1x8x8x32xf32>
    %2 = vector.shape_cast %1 : vector<1x8x8x32xf32> to vector<1x64x32xf32>
    %c0_3 = arith.constant 0 : index
    %c0_4 = arith.constant 0 : index
    %3 = vector.load %arg4[%c0_3, %c0_4] : memref<1x32xf32, #tpu.memory_space<vmem>>, vector<1x32xf32>
    %c0_5 = arith.constant 0 : index
    %c0_6 = arith.constant 0 : index
    %4 = vector.load %arg5[%c0_5, %c0_6] : memref<1x32xf32, #tpu.memory_space<vmem>>, vector<1x32xf32>
    %cst = arith.constant dense<0.000000e+00> : vector<1x32xf32>
    %5 = vector.multi_reduction <add>, %2, %cst [1] : vector<1x64x32xf32> to vector<1x32xf32>
    %6 = arith.mulf %2, %2 : vector<1x64x32xf32>
    %cst_7 = arith.constant dense<0.000000e+00> : vector<1x32xf32>
    %7 = vector.multi_reduction <add>, %6, %cst_7 [1] : vector<1x64x32xf32> to vector<1x32xf32>
    %c0_8 = arith.constant 0 : index
    %c0_9 = arith.constant 0 : index
    %8 = vector.load %arg6[%c0_8, %c0_9] : memref<32x32xf32, #tpu.memory_space<vmem>>, vector<32x32xf32>
    %cst_10 = arith.constant dense<0.000000e+00> : vector<1x32xf32>
    %9 = tpu.matmul %5, %8, %cst_10 {dimension_numbers = #tpu.dot_dimension_numbers<[1], [0], [0], [1], [0, 0, 1, 1], [], []>} : vector<1x32xf32>, vector<32x32xf32>, vector<1x32xf32> -> vector<1x32xf32>
    %cst_11 = arith.constant 6.400000e+01 : f32
    %10 = vector.broadcast %cst_11 : f32 to vector<1x32xf32>
    %11 = arith.divf %9, %10 : vector<1x32xf32>
    %c0_12 = arith.constant 0 : index
    %c0_13 = arith.constant 0 : index
    %12 = vector.load %arg6[%c0_12, %c0_13] : memref<32x32xf32, #tpu.memory_space<vmem>>, vector<32x32xf32>
    %cst_14 = arith.constant dense<0.000000e+00> : vector<1x32xf32>
    %13 = tpu.matmul %7, %12, %cst_14 {dimension_numbers = #tpu.dot_dimension_numbers<[1], [0], [0], [1], [0, 0, 1, 1], [], []>} : vector<1x32xf32>, vector<32x32xf32>, vector<1x32xf32> -> vector<1x32xf32>
    %cst_15 = arith.constant 6.400000e+01 : f32
    %14 = vector.broadcast %cst_15 : f32 to vector<1x32xf32>
    %15 = arith.divf %13, %14 : vector<1x32xf32>
    %16 = arith.mulf %11, %11 : vector<1x32xf32>
    %17 = arith.subf %15, %16 : vector<1x32xf32>
    %cst_16 = arith.constant 9.99999997E-7 : f32
    %18 = vector.broadcast %cst_16 : f32 to vector<1x32xf32>
    %19 = arith.addf %17, %18 : vector<1x32xf32>
    %20 = math.rsqrt %19 : vector<1x32xf32>
    %c0_17 = arith.constant 0 : index
    %c0_18 = arith.constant 0 : index
    %21 = vector.load %arg7[%c0_17, %c0_18] : memref<32x32xf32, #tpu.memory_space<vmem>>, vector<32x32xf32>
    %cst_19 = arith.constant dense<0.000000e+00> : vector<1x32xf32>
    %22 = tpu.matmul %11, %21, %cst_19 {dimension_numbers = #tpu.dot_dimension_numbers<[1], [0], [0], [1], [0, 0, 1, 1], [], []>} : vector<1x32xf32>, vector<32x32xf32>, vector<1x32xf32> -> vector<1x32xf32>
    %c0_20 = arith.constant 0 : index
    %c0_21 = arith.constant 0 : index
    %23 = vector.load %arg7[%c0_20, %c0_21] : memref<32x32xf32, #tpu.memory_space<vmem>>, vector<32x32xf32>
    %cst_22 = arith.constant dense<0.000000e+00> : vector<1x32xf32>
    %24 = tpu.matmul %20, %23, %cst_22 {dimension_numbers = #tpu.dot_dimension_numbers<[1], [0], [0], [1], [0, 0, 1, 1], [], []>} : vector<1x32xf32>, vector<32x32xf32>, vector<1x32xf32> -> vector<1x32xf32>
    %25 = vector.shape_cast %22 : vector<1x32xf32> to vector<1x1x32xf32>
    %26 = vector.broadcast %25 : vector<1x1x32xf32> to vector<1x64x32xf32>
    %27 = arith.subf %2, %26 : vector<1x64x32xf32>
    %28 = vector.shape_cast %24 : vector<1x32xf32> to vector<1x1x32xf32>
    %29 = vector.shape_cast %3 : vector<1x32xf32> to vector<1x1x32xf32>
    %30 = arith.mulf %28, %29 : vector<1x1x32xf32>
    %31 = vector.broadcast %30 : vector<1x1x32xf32> to vector<1x64x32xf32>
    %32 = arith.mulf %27, %31 : vector<1x64x32xf32>
    %33 = vector.shape_cast %4 : vector<1x32xf32> to vector<1x1x32xf32>
    %34 = vector.broadcast %33 : vector<1x1x32xf32> to vector<1x64x32xf32>
    %35 = arith.addf %32, %34 : vector<1x64x32xf32>
    %cst_23 = arith.constant 0.000000e+00 : f32
    %36 = vector.broadcast %cst_23 : f32 to vector<1x64x32xf32>
    %37 = arith.subf %36, %35 : vector<1x64x32xf32>
    %38 = math.exp %37 : vector<1x64x32xf32>
    %cst_24 = arith.constant 1.000000e+00 : f32
    %39 = vector.broadcast %cst_24 : f32 to vector<1x64x32xf32>
    %40 = arith.addf %39, %38 : vector<1x64x32xf32>
    %41 = tpu.reciprocal %40 {approx = true} : vector<1x64x32xf32> -> vector<1x64x32xf32>
    %42 = arith.mulf %35, %41 : vector<1x64x32xf32>
    %43 = vector.shape_cast %42 : vector<1x64x32xf32> to vector<64x32xf32>
    %44 = arith.truncf %43 : vector<64x32xf32> to vector<64x32xbf16>
    %cst_25 = arith.constant 0.000000e+00 : f32
    %45 = vector.broadcast %cst_25 : f32 to vector<64x64xf32>
    %c9_i32 = arith.constant 9 : i32
    %46 = tpu.dynamic_rotate %44 by %c9_i32 dim 0 : vector<64x32xbf16>, i32 -> vector<64x32xbf16>
    %c0_26 = arith.constant 0 : index
    %c0_27 = arith.constant 0 : index
    %c0_28 = arith.constant 0 : index
    %47 = vector.load %arg3[%c0_26, %c0_27, %c0_28] : memref<9x64x1xbf16, #tpu.memory_space<vmem>>, vector<1x64x1xbf16>
    %48 = vector.shape_cast %47 : vector<1x64x1xbf16> to vector<64x1xbf16>
    %49 = vector.broadcast %48 : vector<64x1xbf16> to vector<64x32xbf16>
    %50 = arith.mulf %46, %49 : vector<64x32xbf16>
    %c0_29 = arith.constant 0 : index
    %c0_30 = arith.constant 0 : index
    %c0_31 = arith.constant 0 : index
    %51 = vector.load %arg8[%c0_29, %c0_30, %c0_31] : memref<9x32x64xbf16, #tpu.memory_space<vmem>>, vector<1x32x64xbf16>
    %52 = vector.shape_cast %51 : vector<1x32x64xbf16> to vector<32x64xbf16>
    %cst_32 = arith.constant dense<0.000000e+00> : vector<64x64xf32>
    %53 = tpu.matmul %50, %52, %cst_32 {dimension_numbers = #tpu.dot_dimension_numbers<[1], [0], [0], [1], [0, 0, 1, 1], [], []>} : vector<64x32xbf16>, vector<32x64xbf16>, vector<64x64xf32> -> vector<64x64xf32>
    %54 = arith.addf %45, %53 : vector<64x64xf32>
    %c8_i32 = arith.constant 8 : i32
    %55 = tpu.dynamic_rotate %44 by %c8_i32 dim 0 : vector<64x32xbf16>, i32 -> vector<64x32xbf16>
    %c1 = arith.constant 1 : index
    %c0_33 = arith.constant 0 : index
    %c0_34 = arith.constant 0 : index
    %56 = vector.load %arg3[%c1, %c0_33, %c0_34] : memref<9x64x1xbf16, #tpu.memory_space<vmem>>, vector<1x64x1xbf16>
    %57 = vector.shape_cast %56 : vector<1x64x1xbf16> to vector<64x1xbf16>
    %58 = vector.broadcast %57 : vector<64x1xbf16> to vector<64x32xbf16>
    %59 = arith.mulf %55, %58 : vector<64x32xbf16>
    %c1_35 = arith.constant 1 : index
    %c0_36 = arith.constant 0 : index
    %c0_37 = arith.constant 0 : index
    %60 = vector.load %arg8[%c1_35, %c0_36, %c0_37] : memref<9x32x64xbf16, #tpu.memory_space<vmem>>, vector<1x32x64xbf16>
    %61 = vector.shape_cast %60 : vector<1x32x64xbf16> to vector<32x64xbf16>
    %cst_38 = arith.constant dense<0.000000e+00> : vector<64x64xf32>
    %62 = tpu.matmul %59, %61, %cst_38 {dimension_numbers = #tpu.dot_dimension_numbers<[1], [0], [0], [1], [0, 0, 1, 1], [], []>} : vector<64x32xbf16>, vector<32x64xbf16>, vector<64x64xf32> -> vector<64x64xf32>
    %63 = arith.addf %54, %62 : vector<64x64xf32>
    %c7_i32 = arith.constant 7 : i32
    %64 = tpu.dynamic_rotate %44 by %c7_i32 dim 0 : vector<64x32xbf16>, i32 -> vector<64x32xbf16>
    %c2 = arith.constant 2 : index
    %c0_39 = arith.constant 0 : index
    %c0_40 = arith.constant 0 : index
    %65 = vector.load %arg3[%c2, %c0_39, %c0_40] : memref<9x64x1xbf16, #tpu.memory_space<vmem>>, vector<1x64x1xbf16>
    %66 = vector.shape_cast %65 : vector<1x64x1xbf16> to vector<64x1xbf16>
    %67 = vector.broadcast %66 : vector<64x1xbf16> to vector<64x32xbf16>
    %68 = arith.mulf %64, %67 : vector<64x32xbf16>
    %c2_41 = arith.constant 2 : index
    %c0_42 = arith.constant 0 : index
    %c0_43 = arith.constant 0 : index
    %69 = vector.load %arg8[%c2_41, %c0_42, %c0_43] : memref<9x32x64xbf16, #tpu.memory_space<vmem>>, vector<1x32x64xbf16>
    %70 = vector.shape_cast %69 : vector<1x32x64xbf16> to vector<32x64xbf16>
    %cst_44 = arith.constant dense<0.000000e+00> : vector<64x64xf32>
    %71 = tpu.matmul %68, %70, %cst_44 {dimension_numbers = #tpu.dot_dimension_numbers<[1], [0], [0], [1], [0, 0, 1, 1], [], []>} : vector<64x32xbf16>, vector<32x64xbf16>, vector<64x64xf32> -> vector<64x64xf32>
    %72 = arith.addf %63, %71 : vector<64x64xf32>
    %c1_i32 = arith.constant 1 : i32
    %73 = tpu.dynamic_rotate %44 by %c1_i32 dim 0 : vector<64x32xbf16>, i32 -> vector<64x32xbf16>
    %c3 = arith.constant 3 : index
    %c0_45 = arith.constant 0 : index
    %c0_46 = arith.constant 0 : index
    %74 = vector.load %arg3[%c3, %c0_45, %c0_46] : memref<9x64x1xbf16, #tpu.memory_space<vmem>>, vector<1x64x1xbf16>
    %75 = vector.shape_cast %74 : vector<1x64x1xbf16> to vector<64x1xbf16>
    %76 = vector.broadcast %75 : vector<64x1xbf16> to vector<64x32xbf16>
    %77 = arith.mulf %73, %76 : vector<64x32xbf16>
    %c3_47 = arith.constant 3 : index
    %c0_48 = arith.constant 0 : index
    %c0_49 = arith.constant 0 : index
    %78 = vector.load %arg8[%c3_47, %c0_48, %c0_49] : memref<9x32x64xbf16, #tpu.memory_space<vmem>>, vector<1x32x64xbf16>
    %79 = vector.shape_cast %78 : vector<1x32x64xbf16> to vector<32x64xbf16>
    %cst_50 = arith.constant dense<0.000000e+00> : vector<64x64xf32>
    %80 = tpu.matmul %77, %79, %cst_50 {dimension_numbers = #tpu.dot_dimension_numbers<[1], [0], [0], [1], [0, 0, 1, 1], [], []>} : vector<64x32xbf16>, vector<32x64xbf16>, vector<64x64xf32> -> vector<64x64xf32>
    %81 = arith.addf %72, %80 : vector<64x64xf32>
    %c4 = arith.constant 4 : index
    %c0_51 = arith.constant 0 : index
    %c0_52 = arith.constant 0 : index
    %82 = vector.load %arg8[%c4, %c0_51, %c0_52] : memref<9x32x64xbf16, #tpu.memory_space<vmem>>, vector<1x32x64xbf16>
    %83 = vector.shape_cast %82 : vector<1x32x64xbf16> to vector<32x64xbf16>
    %cst_53 = arith.constant dense<0.000000e+00> : vector<64x64xf32>
    %84 = tpu.matmul %44, %83, %cst_53 {dimension_numbers = #tpu.dot_dimension_numbers<[1], [0], [0], [1], [0, 0, 1, 1], [], []>} : vector<64x32xbf16>, vector<32x64xbf16>, vector<64x64xf32> -> vector<64x64xf32>
    %85 = arith.addf %81, %84 : vector<64x64xf32>
    %c63_i32 = arith.constant 63 : i32
    %86 = tpu.dynamic_rotate %44 by %c63_i32 dim 0 : vector<64x32xbf16>, i32 -> vector<64x32xbf16>
    %c5 = arith.constant 5 : index
    %c0_54 = arith.constant 0 : index
    %c0_55 = arith.constant 0 : index
    %87 = vector.load %arg3[%c5, %c0_54, %c0_55] : memref<9x64x1xbf16, #tpu.memory_space<vmem>>, vector<1x64x1xbf16>
    %88 = vector.shape_cast %87 : vector<1x64x1xbf16> to vector<64x1xbf16>
    %89 = vector.broadcast %88 : vector<64x1xbf16> to vector<64x32xbf16>
    %90 = arith.mulf %86, %89 : vector<64x32xbf16>
    %c5_56 = arith.constant 5 : index
    %c0_57 = arith.constant 0 : index
    %c0_58 = arith.constant 0 : index
    %91 = vector.load %arg8[%c5_56, %c0_57, %c0_58] : memref<9x32x64xbf16, #tpu.memory_space<vmem>>, vector<1x32x64xbf16>
    %92 = vector.shape_cast %91 : vector<1x32x64xbf16> to vector<32x64xbf16>
    %cst_59 = arith.constant dense<0.000000e+00> : vector<64x64xf32>
    %93 = tpu.matmul %90, %92, %cst_59 {dimension_numbers = #tpu.dot_dimension_numbers<[1], [0], [0], [1], [0, 0, 1, 1], [], []>} : vector<64x32xbf16>, vector<32x64xbf16>, vector<64x64xf32> -> vector<64x64xf32>
    %94 = arith.addf %85, %93 : vector<64x64xf32>
    %c57_i32 = arith.constant 57 : i32
    %95 = tpu.dynamic_rotate %44 by %c57_i32 dim 0 : vector<64x32xbf16>, i32 -> vector<64x32xbf16>
    %c6 = arith.constant 6 : index
    %c0_60 = arith.constant 0 : index
    %c0_61 = arith.constant 0 : index
    %96 = vector.load %arg3[%c6, %c0_60, %c0_61] : memref<9x64x1xbf16, #tpu.memory_space<vmem>>, vector<1x64x1xbf16>
    %97 = vector.shape_cast %96 : vector<1x64x1xbf16> to vector<64x1xbf16>
    %98 = vector.broadcast %97 : vector<64x1xbf16> to vector<64x32xbf16>
    %99 = arith.mulf %95, %98 : vector<64x32xbf16>
    %c6_62 = arith.constant 6 : index
    %c0_63 = arith.constant 0 : index
    %c0_64 = arith.constant 0 : index
    %100 = vector.load %arg8[%c6_62, %c0_63, %c0_64] : memref<9x32x64xbf16, #tpu.memory_space<vmem>>, vector<1x32x64xbf16>
    %101 = vector.shape_cast %100 : vector<1x32x64xbf16> to vector<32x64xbf16>
    %cst_65 = arith.constant dense<0.000000e+00> : vector<64x64xf32>
    %102 = tpu.matmul %99, %101, %cst_65 {dimension_numbers = #tpu.dot_dimension_numbers<[1], [0], [0], [1], [0, 0, 1, 1], [], []>} : vector<64x32xbf16>, vector<32x64xbf16>, vector<64x64xf32> -> vector<64x64xf32>
    %103 = arith.addf %94, %102 : vector<64x64xf32>
    %c56_i32 = arith.constant 56 : i32
    %104 = tpu.dynamic_rotate %44 by %c56_i32 dim 0 : vector<64x32xbf16>, i32 -> vector<64x32xbf16>
    %c7 = arith.constant 7 : index
    %c0_66 = arith.constant 0 : index
    %c0_67 = arith.constant 0 : index
    %105 = vector.load %arg3[%c7, %c0_66, %c0_67] : memref<9x64x1xbf16, #tpu.memory_space<vmem>>, vector<1x64x1xbf16>
    %106 = vector.shape_cast %105 : vector<1x64x1xbf16> to vector<64x1xbf16>
    %107 = vector.broadcast %106 : vector<64x1xbf16> to vector<64x32xbf16>
    %108 = arith.mulf %104, %107 : vector<64x32xbf16>
    %c7_68 = arith.constant 7 : index
    %c0_69 = arith.constant 0 : index
    %c0_70 = arith.constant 0 : index
    %109 = vector.load %arg8[%c7_68, %c0_69, %c0_70] : memref<9x32x64xbf16, #tpu.memory_space<vmem>>, vector<1x32x64xbf16>
    %110 = vector.shape_cast %109 : vector<1x32x64xbf16> to vector<32x64xbf16>
    %cst_71 = arith.constant dense<0.000000e+00> : vector<64x64xf32>
    %111 = tpu.matmul %108, %110, %cst_71 {dimension_numbers = #tpu.dot_dimension_numbers<[1], [0], [0], [1], [0, 0, 1, 1], [], []>} : vector<64x32xbf16>, vector<32x64xbf16>, vector<64x64xf32> -> vector<64x64xf32>
    %112 = arith.addf %103, %111 : vector<64x64xf32>
    %c55_i32 = arith.constant 55 : i32
    %113 = tpu.dynamic_rotate %44 by %c55_i32 dim 0 : vector<64x32xbf16>, i32 -> vector<64x32xbf16>
    %c8 = arith.constant 8 : index
    %c0_72 = arith.constant 0 : index
    %c0_73 = arith.constant 0 : index
    %114 = vector.load %arg3[%c8, %c0_72, %c0_73] : memref<9x64x1xbf16, #tpu.memory_space<vmem>>, vector<1x64x1xbf16>
    %115 = vector.shape_cast %114 : vector<1x64x1xbf16> to vector<64x1xbf16>
    %116 = vector.broadcast %115 : vector<64x1xbf16> to vector<64x32xbf16>
    %117 = arith.mulf %113, %116 : vector<64x32xbf16>
    %c8_74 = arith.constant 8 : index
    %c0_75 = arith.constant 0 : index
    %c0_76 = arith.constant 0 : index
    %118 = vector.load %arg8[%c8_74, %c0_75, %c0_76] : memref<9x32x64xbf16, #tpu.memory_space<vmem>>, vector<1x32x64xbf16>
    %119 = vector.shape_cast %118 : vector<1x32x64xbf16> to vector<32x64xbf16>
    %cst_77 = arith.constant dense<0.000000e+00> : vector<64x64xf32>
    %120 = tpu.matmul %117, %119, %cst_77 {dimension_numbers = #tpu.dot_dimension_numbers<[1], [0], [0], [1], [0, 0, 1, 1], [], []>} : vector<64x32xbf16>, vector<32x64xbf16>, vector<64x64xf32> -> vector<64x64xf32>
    %121 = arith.addf %112, %120 : vector<64x64xf32>
    %c0_78 = arith.constant 0 : index
    %c0_79 = arith.constant 0 : index
    %122 = vector.load %arg9[%c0_78, %c0_79] : memref<1x64xf32, #tpu.memory_space<vmem>>, vector<1x64xf32>
    %123 = vector.broadcast %122 : vector<1x64xf32> to vector<64x64xf32>
    %124 = arith.addf %121, %123 : vector<64x64xf32>
    %c0_80 = arith.constant 0 : index
    %c0_81 = arith.constant 0 : index
    %c0_82 = arith.constant 0 : index
    %125 = vector.load %arg2[%c0_80, %c0_81, %c0_82] : memref<1x1x128xf32, #tpu.memory_space<vmem>>, vector<1x1x128xf32>
    %126 = vector.shape_cast %125 : vector<1x1x128xf32> to vector<1x128xf32>
    %cst_83 = arith.constant 0.000000e+00 : f32
    %127 = vector.broadcast %cst_83 : f32 to vector<1x128xf32>
    %128 = arith.subf %127, %126 : vector<1x128xf32>
    %129 = math.exp %128 : vector<1x128xf32>
    %cst_84 = arith.constant 1.000000e+00 : f32
    %130 = vector.broadcast %cst_84 : f32 to vector<1x128xf32>
    %131 = arith.addf %130, %129 : vector<1x128xf32>
    %132 = tpu.reciprocal %131 {approx = true} : vector<1x128xf32> -> vector<1x128xf32>
    %133 = arith.mulf %126, %132 : vector<1x128xf32>
    %134 = arith.truncf %133 : vector<1x128xf32> to vector<1x128xbf16>
    %c0_85 = arith.constant 0 : index
    %c0_86 = arith.constant 0 : index
    %135 = vector.load %arg10[%c0_85, %c0_86] : memref<128x64xbf16, #tpu.memory_space<vmem>>, vector<128x64xbf16>
    %cst_87 = arith.constant dense<0.000000e+00> : vector<1x64xf32>
    %136 = tpu.matmul %134, %135, %cst_87 {dimension_numbers = #tpu.dot_dimension_numbers<[1], [0], [0], [1], [0, 0, 1, 1], [], []>} : vector<1x128xbf16>, vector<128x64xbf16>, vector<1x64xf32> -> vector<1x64xf32>
    %c0_88 = arith.constant 0 : index
    %c0_89 = arith.constant 0 : index
    %137 = vector.load %arg11[%c0_88, %c0_89] : memref<1x64xf32, #tpu.memory_space<vmem>>, vector<1x64xf32>
    %138 = arith.addf %136, %137 : vector<1x64xf32>
    %139 = vector.shape_cast %124 : vector<64x64xf32> to vector<1x64x64xf32>
    %140 = vector.shape_cast %138 : vector<1x64xf32> to vector<1x1x64xf32>
    %141 = vector.broadcast %140 : vector<1x1x64xf32> to vector<1x64x64xf32>
    %142 = arith.addf %139, %141 : vector<1x64x64xf32>
    %c0_90 = arith.constant 0 : index
    %c0_91 = arith.constant 0 : index
    %143 = vector.load %arg12[%c0_90, %c0_91] : memref<1x64xf32, #tpu.memory_space<vmem>>, vector<1x64xf32>
    %c0_92 = arith.constant 0 : index
    %c0_93 = arith.constant 0 : index
    %144 = vector.load %arg13[%c0_92, %c0_93] : memref<1x64xf32, #tpu.memory_space<vmem>>, vector<1x64xf32>
    %cst_94 = arith.constant dense<0.000000e+00> : vector<1x64xf32>
    %145 = vector.multi_reduction <add>, %142, %cst_94 [1] : vector<1x64x64xf32> to vector<1x64xf32>
    %146 = arith.mulf %142, %142 : vector<1x64x64xf32>
    %cst_95 = arith.constant dense<0.000000e+00> : vector<1x64xf32>
    %147 = vector.multi_reduction <add>, %146, %cst_95 [1] : vector<1x64x64xf32> to vector<1x64xf32>
    %c0_96 = arith.constant 0 : index
    %c0_97 = arith.constant 0 : index
    %148 = vector.load %arg14[%c0_96, %c0_97] : memref<64x32xf32, #tpu.memory_space<vmem>>, vector<64x32xf32>
    %cst_98 = arith.constant dense<0.000000e+00> : vector<1x32xf32>
    %149 = tpu.matmul %145, %148, %cst_98 {dimension_numbers = #tpu.dot_dimension_numbers<[1], [0], [0], [1], [0, 0, 1, 1], [], []>} : vector<1x64xf32>, vector<64x32xf32>, vector<1x32xf32> -> vector<1x32xf32>
    %cst_99 = arith.constant 1.280000e+02 : f32
    %150 = vector.broadcast %cst_99 : f32 to vector<1x32xf32>
    %151 = arith.divf %149, %150 : vector<1x32xf32>
    %c0_100 = arith.constant 0 : index
    %c0_101 = arith.constant 0 : index
    %152 = vector.load %arg14[%c0_100, %c0_101] : memref<64x32xf32, #tpu.memory_space<vmem>>, vector<64x32xf32>
    %cst_102 = arith.constant dense<0.000000e+00> : vector<1x32xf32>
    %153 = tpu.matmul %147, %152, %cst_102 {dimension_numbers = #tpu.dot_dimension_numbers<[1], [0], [0], [1], [0, 0, 1, 1], [], []>} : vector<1x64xf32>, vector<64x32xf32>, vector<1x32xf32> -> vector<1x32xf32>
    %cst_103 = arith.constant 1.280000e+02 : f32
    %154 = vector.broadcast %cst_103 : f32 to vector<1x32xf32>
    %155 = arith.divf %153, %154 : vector<1x32xf32>
    %156 = arith.mulf %151, %151 : vector<1x32xf32>
    %157 = arith.subf %155, %156 : vector<1x32xf32>
    %cst_104 = arith.constant 9.99999997E-7 : f32
    %158 = vector.broadcast %cst_104 : f32 to vector<1x32xf32>
    %159 = arith.addf %157, %158 : vector<1x32xf32>
    %160 = math.rsqrt %159 : vector<1x32xf32>
    %c0_105 = arith.constant 0 : index
    %c0_106 = arith.constant 0 : index
    %161 = vector.load %arg15[%c0_105, %c0_106] : memref<32x64xf32, #tpu.memory_space<vmem>>, vector<32x64xf32>
    %cst_107 = arith.constant dense<0.000000e+00> : vector<1x64xf32>
    %162 = tpu.matmul %151, %161, %cst_107 {dimension_numbers = #tpu.dot_dimension_numbers<[1], [0], [0], [1], [0, 0, 1, 1], [], []>} : vector<1x32xf32>, vector<32x64xf32>, vector<1x64xf32> -> vector<1x64xf32>
    %c0_108 = arith.constant 0 : index
    %c0_109 = arith.constant 0 : index
    %163 = vector.load %arg15[%c0_108, %c0_109] : memref<32x64xf32, #tpu.memory_space<vmem>>, vector<32x64xf32>
    %cst_110 = arith.constant dense<0.000000e+00> : vector<1x64xf32>
    %164 = tpu.matmul %160, %163, %cst_110 {dimension_numbers = #tpu.dot_dimension_numbers<[1], [0], [0], [1], [0, 0, 1, 1], [], []>} : vector<1x32xf32>, vector<32x64xf32>, vector<1x64xf32> -> vector<1x64xf32>
    %165 = vector.shape_cast %162 : vector<1x64xf32> to vector<1x1x64xf32>
    %166 = vector.broadcast %165 : vector<1x1x64xf32> to vector<1x64x64xf32>
    %167 = arith.subf %142, %166 : vector<1x64x64xf32>
    %168 = vector.shape_cast %164 : vector<1x64xf32> to vector<1x1x64xf32>
    %169 = vector.shape_cast %143 : vector<1x64xf32> to vector<1x1x64xf32>
    %170 = arith.mulf %168, %169 : vector<1x1x64xf32>
    %171 = vector.broadcast %170 : vector<1x1x64xf32> to vector<1x64x64xf32>
    %172 = arith.mulf %167, %171 : vector<1x64x64xf32>
    %173 = vector.shape_cast %144 : vector<1x64xf32> to vector<1x1x64xf32>
    %174 = vector.broadcast %173 : vector<1x1x64xf32> to vector<1x64x64xf32>
    %175 = arith.addf %172, %174 : vector<1x64x64xf32>
    %cst_111 = arith.constant 0.000000e+00 : f32
    %176 = vector.broadcast %cst_111 : f32 to vector<1x64x64xf32>
    %177 = arith.subf %176, %175 : vector<1x64x64xf32>
    %178 = math.exp %177 : vector<1x64x64xf32>
    %cst_112 = arith.constant 1.000000e+00 : f32
    %179 = vector.broadcast %cst_112 : f32 to vector<1x64x64xf32>
    %180 = arith.addf %179, %178 : vector<1x64x64xf32>
    %181 = tpu.reciprocal %180 {approx = true} : vector<1x64x64xf32> -> vector<1x64x64xf32>
    %182 = arith.mulf %175, %181 : vector<1x64x64xf32>
    %183 = vector.shape_cast %182 : vector<1x64x64xf32> to vector<64x64xf32>
    %184 = arith.truncf %183 : vector<64x64xf32> to vector<64x64xbf16>
    %cst_113 = arith.constant 0.000000e+00 : f32
    %185 = vector.broadcast %cst_113 : f32 to vector<64x64xf32>
    %c9_i32_114 = arith.constant 9 : i32
    %186 = tpu.dynamic_rotate %184 by %c9_i32_114 dim 0 : vector<64x64xbf16>, i32 -> vector<64x64xbf16>
    %c0_115 = arith.constant 0 : index
    %c0_116 = arith.constant 0 : index
    %c0_117 = arith.constant 0 : index
    %187 = vector.load %arg3[%c0_115, %c0_116, %c0_117] : memref<9x64x1xbf16, #tpu.memory_space<vmem>>, vector<1x64x1xbf16>
    %188 = vector.shape_cast %187 : vector<1x64x1xbf16> to vector<64x1xbf16>
    %189 = vector.broadcast %188 : vector<64x1xbf16> to vector<64x64xbf16>
    %190 = arith.mulf %186, %189 : vector<64x64xbf16>
    %c0_118 = arith.constant 0 : index
    %c0_119 = arith.constant 0 : index
    %c0_120 = arith.constant 0 : index
    %191 = vector.load %arg16[%c0_118, %c0_119, %c0_120] : memref<9x64x64xbf16, #tpu.memory_space<vmem>>, vector<1x64x64xbf16>
    %192 = vector.shape_cast %191 : vector<1x64x64xbf16> to vector<64x64xbf16>
    %cst_121 = arith.constant dense<0.000000e+00> : vector<64x64xf32>
    %193 = tpu.matmul %190, %192, %cst_121 {dimension_numbers = #tpu.dot_dimension_numbers<[1], [0], [0], [1], [0, 0, 1, 1], [], []>} : vector<64x64xbf16>, vector<64x64xbf16>, vector<64x64xf32> -> vector<64x64xf32>
    %194 = arith.addf %185, %193 : vector<64x64xf32>
    %c8_i32_122 = arith.constant 8 : i32
    %195 = tpu.dynamic_rotate %184 by %c8_i32_122 dim 0 : vector<64x64xbf16>, i32 -> vector<64x64xbf16>
    %c1_123 = arith.constant 1 : index
    %c0_124 = arith.constant 0 : index
    %c0_125 = arith.constant 0 : index
    %196 = vector.load %arg3[%c1_123, %c0_124, %c0_125] : memref<9x64x1xbf16, #tpu.memory_space<vmem>>, vector<1x64x1xbf16>
    %197 = vector.shape_cast %196 : vector<1x64x1xbf16> to vector<64x1xbf16>
    %198 = vector.broadcast %197 : vector<64x1xbf16> to vector<64x64xbf16>
    %199 = arith.mulf %195, %198 : vector<64x64xbf16>
    %c1_126 = arith.constant 1 : index
    %c0_127 = arith.constant 0 : index
    %c0_128 = arith.constant 0 : index
    %200 = vector.load %arg16[%c1_126, %c0_127, %c0_128] : memref<9x64x64xbf16, #tpu.memory_space<vmem>>, vector<1x64x64xbf16>
    %201 = vector.shape_cast %200 : vector<1x64x64xbf16> to vector<64x64xbf16>
    %cst_129 = arith.constant dense<0.000000e+00> : vector<64x64xf32>
    %202 = tpu.matmul %199, %201, %cst_129 {dimension_numbers = #tpu.dot_dimension_numbers<[1], [0], [0], [1], [0, 0, 1, 1], [], []>} : vector<64x64xbf16>, vector<64x64xbf16>, vector<64x64xf32> -> vector<64x64xf32>
    %203 = arith.addf %194, %202 : vector<64x64xf32>
    %c7_i32_130 = arith.constant 7 : i32
    %204 = tpu.dynamic_rotate %184 by %c7_i32_130 dim 0 : vector<64x64xbf16>, i32 -> vector<64x64xbf16>
    %c2_131 = arith.constant 2 : index
    %c0_132 = arith.constant 0 : index
    %c0_133 = arith.constant 0 : index
    %205 = vector.load %arg3[%c2_131, %c0_132, %c0_133] : memref<9x64x1xbf16, #tpu.memory_space<vmem>>, vector<1x64x1xbf16>
    %206 = vector.shape_cast %205 : vector<1x64x1xbf16> to vector<64x1xbf16>
    %207 = vector.broadcast %206 : vector<64x1xbf16> to vector<64x64xbf16>
    %208 = arith.mulf %204, %207 : vector<64x64xbf16>
    %c2_134 = arith.constant 2 : index
    %c0_135 = arith.constant 0 : index
    %c0_136 = arith.constant 0 : index
    %209 = vector.load %arg16[%c2_134, %c0_135, %c0_136] : memref<9x64x64xbf16, #tpu.memory_space<vmem>>, vector<1x64x64xbf16>
    %210 = vector.shape_cast %209 : vector<1x64x64xbf16> to vector<64x64xbf16>
    %cst_137 = arith.constant dense<0.000000e+00> : vector<64x64xf32>
    %211 = tpu.matmul %208, %210, %cst_137 {dimension_numbers = #tpu.dot_dimension_numbers<[1], [0], [0], [1], [0, 0, 1, 1], [], []>} : vector<64x64xbf16>, vector<64x64xbf16>, vector<64x64xf32> -> vector<64x64xf32>
    %212 = arith.addf %203, %211 : vector<64x64xf32>
    %c1_i32_138 = arith.constant 1 : i32
    %213 = tpu.dynamic_rotate %184 by %c1_i32_138 dim 0 : vector<64x64xbf16>, i32 -> vector<64x64xbf16>
    %c3_139 = arith.constant 3 : index
    %c0_140 = arith.constant 0 : index
    %c0_141 = arith.constant 0 : index
    %214 = vector.load %arg3[%c3_139, %c0_140, %c0_141] : memref<9x64x1xbf16, #tpu.memory_space<vmem>>, vector<1x64x1xbf16>
    %215 = vector.shape_cast %214 : vector<1x64x1xbf16> to vector<64x1xbf16>
    %216 = vector.broadcast %215 : vector<64x1xbf16> to vector<64x64xbf16>
    %217 = arith.mulf %213, %216 : vector<64x64xbf16>
    %c3_142 = arith.constant 3 : index
    %c0_143 = arith.constant 0 : index
    %c0_144 = arith.constant 0 : index
    %218 = vector.load %arg16[%c3_142, %c0_143, %c0_144] : memref<9x64x64xbf16, #tpu.memory_space<vmem>>, vector<1x64x64xbf16>
    %219 = vector.shape_cast %218 : vector<1x64x64xbf16> to vector<64x64xbf16>
    %cst_145 = arith.constant dense<0.000000e+00> : vector<64x64xf32>
    %220 = tpu.matmul %217, %219, %cst_145 {dimension_numbers = #tpu.dot_dimension_numbers<[1], [0], [0], [1], [0, 0, 1, 1], [], []>} : vector<64x64xbf16>, vector<64x64xbf16>, vector<64x64xf32> -> vector<64x64xf32>
    %221 = arith.addf %212, %220 : vector<64x64xf32>
    %c4_146 = arith.constant 4 : index
    %c0_147 = arith.constant 0 : index
    %c0_148 = arith.constant 0 : index
    %222 = vector.load %arg16[%c4_146, %c0_147, %c0_148] : memref<9x64x64xbf16, #tpu.memory_space<vmem>>, vector<1x64x64xbf16>
    %223 = vector.shape_cast %222 : vector<1x64x64xbf16> to vector<64x64xbf16>
    %cst_149 = arith.constant dense<0.000000e+00> : vector<64x64xf32>
    %224 = tpu.matmul %184, %223, %cst_149 {dimension_numbers = #tpu.dot_dimension_numbers<[1], [0], [0], [1], [0, 0, 1, 1], [], []>} : vector<64x64xbf16>, vector<64x64xbf16>, vector<64x64xf32> -> vector<64x64xf32>
    %225 = arith.addf %221, %224 : vector<64x64xf32>
    %c63_i32_150 = arith.constant 63 : i32
    %226 = tpu.dynamic_rotate %184 by %c63_i32_150 dim 0 : vector<64x64xbf16>, i32 -> vector<64x64xbf16>
    %c5_151 = arith.constant 5 : index
    %c0_152 = arith.constant 0 : index
    %c0_153 = arith.constant 0 : index
    %227 = vector.load %arg3[%c5_151, %c0_152, %c0_153] : memref<9x64x1xbf16, #tpu.memory_space<vmem>>, vector<1x64x1xbf16>
    %228 = vector.shape_cast %227 : vector<1x64x1xbf16> to vector<64x1xbf16>
    %229 = vector.broadcast %228 : vector<64x1xbf16> to vector<64x64xbf16>
    %230 = arith.mulf %226, %229 : vector<64x64xbf16>
    %c5_154 = arith.constant 5 : index
    %c0_155 = arith.constant 0 : index
    %c0_156 = arith.constant 0 : index
    %231 = vector.load %arg16[%c5_154, %c0_155, %c0_156] : memref<9x64x64xbf16, #tpu.memory_space<vmem>>, vector<1x64x64xbf16>
    %232 = vector.shape_cast %231 : vector<1x64x64xbf16> to vector<64x64xbf16>
    %cst_157 = arith.constant dense<0.000000e+00> : vector<64x64xf32>
    %233 = tpu.matmul %230, %232, %cst_157 {dimension_numbers = #tpu.dot_dimension_numbers<[1], [0], [0], [1], [0, 0, 1, 1], [], []>} : vector<64x64xbf16>, vector<64x64xbf16>, vector<64x64xf32> -> vector<64x64xf32>
    %234 = arith.addf %225, %233 : vector<64x64xf32>
    %c57_i32_158 = arith.constant 57 : i32
    %235 = tpu.dynamic_rotate %184 by %c57_i32_158 dim 0 : vector<64x64xbf16>, i32 -> vector<64x64xbf16>
    %c6_159 = arith.constant 6 : index
    %c0_160 = arith.constant 0 : index
    %c0_161 = arith.constant 0 : index
    %236 = vector.load %arg3[%c6_159, %c0_160, %c0_161] : memref<9x64x1xbf16, #tpu.memory_space<vmem>>, vector<1x64x1xbf16>
    %237 = vector.shape_cast %236 : vector<1x64x1xbf16> to vector<64x1xbf16>
    %238 = vector.broadcast %237 : vector<64x1xbf16> to vector<64x64xbf16>
    %239 = arith.mulf %235, %238 : vector<64x64xbf16>
    %c6_162 = arith.constant 6 : index
    %c0_163 = arith.constant 0 : index
    %c0_164 = arith.constant 0 : index
    %240 = vector.load %arg16[%c6_162, %c0_163, %c0_164] : memref<9x64x64xbf16, #tpu.memory_space<vmem>>, vector<1x64x64xbf16>
    %241 = vector.shape_cast %240 : vector<1x64x64xbf16> to vector<64x64xbf16>
    %cst_165 = arith.constant dense<0.000000e+00> : vector<64x64xf32>
    %242 = tpu.matmul %239, %241, %cst_165 {dimension_numbers = #tpu.dot_dimension_numbers<[1], [0], [0], [1], [0, 0, 1, 1], [], []>} : vector<64x64xbf16>, vector<64x64xbf16>, vector<64x64xf32> -> vector<64x64xf32>
    %243 = arith.addf %234, %242 : vector<64x64xf32>
    %c56_i32_166 = arith.constant 56 : i32
    %244 = tpu.dynamic_rotate %184 by %c56_i32_166 dim 0 : vector<64x64xbf16>, i32 -> vector<64x64xbf16>
    %c7_167 = arith.constant 7 : index
    %c0_168 = arith.constant 0 : index
    %c0_169 = arith.constant 0 : index
    %245 = vector.load %arg3[%c7_167, %c0_168, %c0_169] : memref<9x64x1xbf16, #tpu.memory_space<vmem>>, vector<1x64x1xbf16>
    %246 = vector.shape_cast %245 : vector<1x64x1xbf16> to vector<64x1xbf16>
    %247 = vector.broadcast %246 : vector<64x1xbf16> to vector<64x64xbf16>
    %248 = arith.mulf %244, %247 : vector<64x64xbf16>
    %c7_170 = arith.constant 7 : index
    %c0_171 = arith.constant 0 : index
    %c0_172 = arith.constant 0 : index
    %249 = vector.load %arg16[%c7_170, %c0_171, %c0_172] : memref<9x64x64xbf16, #tpu.memory_space<vmem>>, vector<1x64x64xbf16>
    %250 = vector.shape_cast %249 : vector<1x64x64xbf16> to vector<64x64xbf16>
    %cst_173 = arith.constant dense<0.000000e+00> : vector<64x64xf32>
    %251 = tpu.matmul %248, %250, %cst_173 {dimension_numbers = #tpu.dot_dimension_numbers<[1], [0], [0], [1], [0, 0, 1, 1], [], []>} : vector<64x64xbf16>, vector<64x64xbf16>, vector<64x64xf32> -> vector<64x64xf32>
    %252 = arith.addf %243, %251 : vector<64x64xf32>
    %c55_i32_174 = arith.constant 55 : i32
    %253 = tpu.dynamic_rotate %184 by %c55_i32_174 dim 0 : vector<64x64xbf16>, i32 -> vector<64x64xbf16>
    %c8_175 = arith.constant 8 : index
    %c0_176 = arith.constant 0 : index
    %c0_177 = arith.constant 0 : index
    %254 = vector.load %arg3[%c8_175, %c0_176, %c0_177] : memref<9x64x1xbf16, #tpu.memory_space<vmem>>, vector<1x64x1xbf16>
    %255 = vector.shape_cast %254 : vector<1x64x1xbf16> to vector<64x1xbf16>
    %256 = vector.broadcast %255 : vector<64x1xbf16> to vector<64x64xbf16>
    %257 = arith.mulf %253, %256 : vector<64x64xbf16>
    %c8_178 = arith.constant 8 : index
    %c0_179 = arith.constant 0 : index
    %c0_180 = arith.constant 0 : index
    %258 = vector.load %arg16[%c8_178, %c0_179, %c0_180] : memref<9x64x64xbf16, #tpu.memory_space<vmem>>, vector<1x64x64xbf16>
    %259 = vector.shape_cast %258 : vector<1x64x64xbf16> to vector<64x64xbf16>
    %cst_181 = arith.constant dense<0.000000e+00> : vector<64x64xf32>
    %260 = tpu.matmul %257, %259, %cst_181 {dimension_numbers = #tpu.dot_dimension_numbers<[1], [0], [0], [1], [0, 0, 1, 1], [], []>} : vector<64x64xbf16>, vector<64x64xbf16>, vector<64x64xf32> -> vector<64x64xf32>
    %261 = arith.addf %252, %260 : vector<64x64xf32>
    %c0_182 = arith.constant 0 : index
    %c0_183 = arith.constant 0 : index
    %262 = vector.load %arg17[%c0_182, %c0_183] : memref<1x64xf32, #tpu.memory_space<vmem>>, vector<1x64xf32>
    %263 = vector.broadcast %262 : vector<1x64xf32> to vector<64x64xf32>
    %264 = arith.addf %261, %263 : vector<64x64xf32>
    %c0_184 = arith.constant 0 : index
    %c0_185 = arith.constant 0 : index
    %c0_186 = arith.constant 0 : index
    %c0_187 = arith.constant 0 : index
    %265 = vector.load %arg1[%c0_184, %c0_185, %c0_186, %c0_187] : memref<1x8x8x32xbf16, #tpu.memory_space<vmem>>, vector<1x8x8x32xbf16>
    %266 = vector.shape_cast %265 : vector<1x8x8x32xbf16> to vector<64x32xbf16>
    %c0_188 = arith.constant 0 : index
    %c0_189 = arith.constant 0 : index
    %267 = vector.load %arg18[%c0_188, %c0_189] : memref<32x64xbf16, #tpu.memory_space<vmem>>, vector<32x64xbf16>
    %cst_190 = arith.constant dense<0.000000e+00> : vector<64x64xf32>
    %268 = tpu.matmul %266, %267, %cst_190 {dimension_numbers = #tpu.dot_dimension_numbers<[1], [0], [0], [1], [0, 0, 1, 1], [], []>} : vector<64x32xbf16>, vector<32x64xbf16>, vector<64x64xf32> -> vector<64x64xf32>
    %c0_191 = arith.constant 0 : index
    %c0_192 = arith.constant 0 : index
    %269 = vector.load %arg19[%c0_191, %c0_192] : memref<1x64xf32, #tpu.memory_space<vmem>>, vector<1x64xf32>
    %270 = vector.broadcast %269 : vector<1x64xf32> to vector<64x64xf32>
    %271 = arith.addf %268, %270 : vector<64x64xf32>
    %272 = arith.addf %271, %264 : vector<64x64xf32>
    %273 = vector.shape_cast %272 : vector<64x64xf32> to vector<1x8x8x64xf32>
    %274 = arith.truncf %273 : vector<1x8x8x64xf32> to vector<1x8x8x64xbf16>
    %c0_193 = arith.constant 0 : index
    %c0_194 = arith.constant 0 : index
    %c0_195 = arith.constant 0 : index
    %c0_196 = arith.constant 0 : index
    %275 = vector.load %arg20[%c0_193, %c0_194, %c0_195, %c0_196] : memref<1x8x8x64xbf16, #tpu.memory_space<vmem>>, vector<1x8x8x64xbf16>
    tpu.vector_store %arg20[%c0_193, %c0_194, %c0_195, %c0_196], %274 {strides = array<i32>} : memref<1x8x8x64xbf16, #tpu.memory_space<vmem>>, vector<1x8x8x64xbf16>,
    return
  }
  func.func @transform_0(%arg0: i32) -> (i32, i32, i32, i32) {
    %c0_i32 = arith.constant 0 : i32
    %c0_i32_0 = arith.constant 0 : i32
    %c0_i32_1 = arith.constant 0 : i32
    %c0_i32_2 = arith.constant 0 : i32
    return %arg0, %c0_i32, %c0_i32_0, %c0_i32_1 : i32, i32, i32, i32
  }
  func.func @transform_1(%arg0: i32) -> (i32, i32, i32) {
    %c0_i32 = arith.constant 0 : i32
    %c0_i32_0 = arith.constant 0 : i32
    %c0_i32_1 = arith.constant 0 : i32
    return %arg0, %c0_i32, %c0_i32_0 : i32, i32, i32
  }
  func.func @transform_2(%arg0: i32) -> (i32, i32, i32) {
    %c0_i32 = arith.constant 0 : i32
    %c0_i32_0 = arith.constant 0 : i32
    %c0_i32_1 = arith.constant 0 : i32
    %c0_i32_2 = arith.constant 0 : i32
    return %c0_i32, %c0_i32_0, %c0_i32_1 : i32, i32, i32
  }
  func.func @transform_3(%arg0: i32) -> (i32, i32) {
    %c0_i32 = arith.constant 0 : i32
    %c0_i32_0 = arith.constant 0 : i32
    %c0_i32_1 = arith.constant 0 : i32
    return %c0_i32, %c0_i32_0 : i32, i32
  }
  func.func @transform_4(%arg0: i32) -> (i32, i32) {
    %c0_i32 = arith.constant 0 : i32
    %c0_i32_0 = arith.constant 0 : i32
    %c0_i32_1 = arith.constant 0 : i32
    return %c0_i32, %c0_i32_0 : i32, i32
  }
  func.func @transform_5(%arg0: i32) -> (i32, i32) {
    %c0_i32 = arith.constant 0 : i32
    %c0_i32_0 = arith.constant 0 : i32
    %c0_i32_1 = arith.constant 0 : i32
    return %c0_i32, %c0_i32_0 : i32, i32
  }
  func.func @transform_6(%arg0: i32) -> (i32, i32) {
    %c0_i32 = arith.constant 0 : i32
    %c0_i32_0 = arith.constant 0 : i32
    %c0_i32_1 = arith.constant 0 : i32
    return %c0_i32, %c0_i32_0 : i32, i32
  }
  func.func @transform_7(%arg0: i32) -> (i32, i32, i32) {
    %c0_i32 = arith.constant 0 : i32
    %c0_i32_0 = arith.constant 0 : i32
    %c0_i32_1 = arith.constant 0 : i32
    %c0_i32_2 = arith.constant 0 : i32
    return %c0_i32, %c0_i32_0, %c0_i32_1 : i32, i32, i32
  }
  func.func @transform_8(%arg0: i32) -> (i32, i32) {
    %c0_i32 = arith.constant 0 : i32
    %c0_i32_0 = arith.constant 0 : i32
    %c0_i32_1 = arith.constant 0 : i32
    return %c0_i32, %c0_i32_0 : i32, i32
  }
  func.func @transform_9(%arg0: i32) -> (i32, i32) {
    %c0_i32 = arith.constant 0 : i32
    %c0_i32_0 = arith.constant 0 : i32
    %c0_i32_1 = arith.constant 0 : i32
    return %c0_i32, %c0_i32_0 : i32, i32
  }
  func.func @transform_10(%arg0: i32) -> (i32, i32) {
    %c0_i32 = arith.constant 0 : i32
    %c0_i32_0 = arith.constant 0 : i32
    %c0_i32_1 = arith.constant 0 : i32
    return %c0_i32, %c0_i32_0 : i32, i32
  }
  func.func @transform_11(%arg0: i32) -> (i32, i32) {
    %c0_i32 = arith.constant 0 : i32
    %c0_i32_0 = arith.constant 0 : i32
    %c0_i32_1 = arith.constant 0 : i32
    return %c0_i32, %c0_i32_0 : i32, i32
  }
  func.func @transform_12(%arg0: i32) -> (i32, i32) {
    %c0_i32 = arith.constant 0 : i32
    %c0_i32_0 = arith.constant 0 : i32
    %c0_i32_1 = arith.constant 0 : i32
    return %c0_i32, %c0_i32_0 : i32, i32
  }
  func.func @transform_13(%arg0: i32) -> (i32, i32) {
    %c0_i32 = arith.constant 0 : i32
    %c0_i32_0 = arith.constant 0 : i32
    %c0_i32_1 = arith.constant 0 : i32
    return %c0_i32, %c0_i32_0 : i32, i32
  }
  func.func @transform_14(%arg0: i32) -> (i32, i32) {
    %c0_i32 = arith.constant 0 : i32
    %c0_i32_0 = arith.constant 0 : i32
    %c0_i32_1 = arith.constant 0 : i32
    return %c0_i32, %c0_i32_0 : i32, i32
  }
  func.func @transform_15(%arg0: i32) -> (i32, i32, i32) {
    %c0_i32 = arith.constant 0 : i32
    %c0_i32_0 = arith.constant 0 : i32
    %c0_i32_1 = arith.constant 0 : i32
    %c0_i32_2 = arith.constant 0 : i32
    return %c0_i32, %c0_i32_0, %c0_i32_1 : i32, i32, i32
  }
  func.func @transform_16(%arg0: i32) -> (i32, i32) {
    %c0_i32 = arith.constant 0 : i32
    %c0_i32_0 = arith.constant 0 : i32
    %c0_i32_1 = arith.constant 0 : i32
    return %c0_i32, %c0_i32_0 : i32, i32
  }
  func.func @transform_17(%arg0: i32) -> (i32, i32) {
    %c0_i32 = arith.constant 0 : i32
    %c0_i32_0 = arith.constant 0 : i32
    %c0_i32_1 = arith.constant 0 : i32
    return %c0_i32, %c0_i32_0 : i32, i32
  }
  func.func @transform_18(%arg0: i32) -> (i32, i32) {
    %c0_i32 = arith.constant 0 : i32
    %c0_i32_0 = arith.constant 0 : i32
    %c0_i32_1 = arith.constant 0 : i32
    return %c0_i32, %c0_i32_0 : i32, i32
  }
  func.func @transform_19(%arg0: i32) -> (i32, i32, i32, i32) {
    %c0_i32 = arith.constant 0 : i32
    %c0_i32_0 = arith.constant 0 : i32
    %c0_i32_1 = arith.constant 0 : i32
    %c0_i32_2 = arith.constant 0 : i32
    return %arg0, %c0_i32, %c0_i32_0, %c0_i32_1 : i32, i32, i32, i32
  }
}

module attributes {stable_mosaic.version = 11 : i64} {
  func.func @kernel(%arg0: i32, %arg1: memref<1x8x8x32xbf16, #tpu.memory_space<vmem>>, %arg2: memref<1x1x128xf32, #tpu.memory_space<vmem>>, %arg3: memref<9x64x1xbf16, #tpu.memory_space<vmem>>, %arg4: memref<1x32xf32, #tpu.memory_space<vmem>>, %arg5: memref<1x32xf32, #tpu.memory_space<vmem>>, %arg6: memref<32x32xf32, #tpu.memory_space<vmem>>, %arg7: memref<32x32xf32, #tpu.memory_space<vmem>>, %arg8: memref<9x32x64xbf16, #tpu.memory_space<vmem>>, %arg9: memref<1x64xf32, #tpu.memory_space<vmem>>, %arg10: memref<128x64xbf16, #tpu.memory_space<vmem>>, %arg11: memref<1x64xf32, #tpu.memory_space<vmem>>, %arg12: memref<1x64xf32, #tpu.memory_space<vmem>>, %arg13: memref<1x64xf32, #tpu.memory_space<vmem>>, %arg14: memref<64x32xf32, #tpu.memory_space<vmem>>, %arg15: memref<32x64xf32, #tpu.memory_space<vmem>>, %arg16: memref<9x64x64xbf16, #tpu.memory_space<vmem>>, %arg17: memref<1x64xf32, #tpu.memory_space<vmem>>, %arg18: memref<32x64xbf16, #tpu.memory_space<vmem>>, %arg19: memref<1x64xf32, #tpu.memory_space<vmem>>, %arg20: memref<1x8x8x64xbf16, #tpu.memory_space<vmem>>) attributes {dimension_semantics = [#tpu.dimension_semantics<parallel>], iteration_bounds = array<i64: 2>, scalar_prefetch = 0 : i64, scratch_operands = 0 : i64, tpu.core_type = #tpu.core_type<tc>, window_params = [{transform_indices = @transform_0, window_bounds = array<i64: 1, 8, 8, 32>}, {transform_indices = @transform_1, window_bounds = array<i64: 1, 1, 128>}, {pipeline_mode = #tpu.pipeline_mode<synchronous>, transform_indices = @transform_2, window_bounds = array<i64: 9, 64, 1>}, {pipeline_mode = #tpu.pipeline_mode<synchronous>, transform_indices = @transform_3, window_bounds = array<i64: 1, 32>}, {pipeline_mode = #tpu.pipeline_mode<synchronous>, transform_indices = @transform_4, window_bounds = array<i64: 1, 32>}, {pipeline_mode = #tpu.pipeline_mode<synchronous>, transform_indices = @transform_5, window_bounds = array<i64: 32, 32>}, {pipeline_mode = #tpu.pipeline_mode<synchronous>, transform_indices = @transform_6, window_bounds = array<i64: 32, 32>}, {pipeline_mode = #tpu.pipeline_mode<synchronous>, transform_indices = @transform_7, window_bounds = array<i64: 9, 32, 64>}, {pipeline_mode = #tpu.pipeline_mode<synchronous>, transform_indices = @transform_8, window_bounds = array<i64: 1, 64>}, {pipeline_mode = #tpu.pipeline_mode<synchronous>, transform_indices = @transform_9, window_bounds = array<i64: 128, 64>}, {pipeline_mode = #tpu.pipeline_mode<synchronous>, transform_indices = @transform_10, window_bounds = array<i64: 1, 64>}, {pipeline_mode = #tpu.pipeline_mode<synchronous>, transform_indices = @transform_11, window_bounds = array<i64: 1, 64>}, {pipeline_mode = #tpu.pipeline_mode<synchronous>, transform_indices = @transform_12, window_bounds = array<i64: 1, 64>}, {pipeline_mode = #tpu.pipeline_mode<synchronous>, transform_indices = @transform_13, window_bounds = array<i64: 64, 32>}, {pipeline_mode = #tpu.pipeline_mode<synchronous>, transform_indices = @transform_14, window_bounds = array<i64: 32, 64>}, {pipeline_mode = #tpu.pipeline_mode<synchronous>, transform_indices = @transform_15, window_bounds = array<i64: 9, 64, 64>}, {pipeline_mode = #tpu.pipeline_mode<synchronous>, transform_indices = @transform_16, window_bounds = array<i64: 1, 64>}, {pipeline_mode = #tpu.pipeline_mode<synchronous>, transform_indices = @transform_17, window_bounds = array<i64: 32, 64>}, {pipeline_mode = #tpu.pipeline_mode<synchronous>, transform_indices = @transform_18, window_bounds = array<i64: 1, 64>}, {transform_indices = @transform_19, window_bounds = array<i64: 1, 8, 8, 64>}]} {
    %c0 = arith.constant 0 : index
    %c0_0 = arith.constant 0 : index
    %c0_1 = arith.constant 0 : index
    %c0_2 = arith.constant 0 : index
    %0 = vector.load %arg1[%c0, %c0_0, %c0_1, %c0_2] : memref<1x8x8x32xbf16, #tpu.memory_space<vmem>>, vector<1x8x8x32xbf16>
    %1 = arith.extf %0 : vector<1x8x8x32xbf16> to vector<1x8x8x32xf32>
    %2 = vector.shape_cast %1 : vector<1x8x8x32xf32> to vector<1x64x32xf32>
    %c0_3 = arith.constant 0 : index
    %c0_4 = arith.constant 0 : index
    %3 = vector.load %arg4[%c0_3, %c0_4] : memref<1x32xf32, #tpu.memory_space<vmem>>, vector<1x32xf32>
    %c0_5 = arith.constant 0 : index
    %c0_6 = arith.constant 0 : index
    %4 = vector.load %arg5[%c0_5, %c0_6] : memref<1x32xf32, #tpu.memory_space<vmem>>, vector<1x32xf32>
    %cst = arith.constant dense<0.000000e+00> : vector<1x32xf32>
    %5 = vector.multi_reduction <add>, %2, %cst [1] : vector<1x64x32xf32> to vector<1x32xf32>
    %6 = arith.mulf %2, %2 : vector<1x64x32xf32>
    %cst_7 = arith.constant dense<0.000000e+00> : vector<1x32xf32>
    %7 = vector.multi_reduction <add>, %6, %cst_7 [1] : vector<1x64x32xf32> to vector<1x32xf32>
    %c0_8 = arith.constant 0 : index
    %c0_9 = arith.constant 0 : index
    %8 = vector.load %arg6[%c0_8, %c0_9] : memref<32x32xf32, #tpu.memory_space<vmem>>, vector<32x32xf32>
    %cst_10 = arith.constant dense<0.000000e+00> : vector<1x32xf32>
    %9 = tpu.matmul %5, %8, %cst_10 {dimension_numbers = #tpu.dot_dimension_numbers<[1], [0], [0], [1], [0, 0, 1, 1], [], []>} : vector<1x32xf32>, vector<32x32xf32>, vector<1x32xf32> -> vector<1x32xf32>
    %cst_11 = arith.constant 6.400000e+01 : f32
    %10 = vector.broadcast %cst_11 : f32 to vector<1x32xf32>
    %11 = arith.divf %9, %10 : vector<1x32xf32>
    %c0_12 = arith.constant 0 : index
    %c0_13 = arith.constant 0 : index
    %12 = vector.load %arg6[%c0_12, %c0_13] : memref<32x32xf32, #tpu.memory_space<vmem>>, vector<32x32xf32>
    %cst_14 = arith.constant dense<0.000000e+00> : vector<1x32xf32>
    %13 = tpu.matmul %7, %12, %cst_14 {dimension_numbers = #tpu.dot_dimension_numbers<[1], [0], [0], [1], [0, 0, 1, 1], [], []>} : vector<1x32xf32>, vector<32x32xf32>, vector<1x32xf32> -> vector<1x32xf32>
    %cst_15 = arith.constant 6.400000e+01 : f32
    %14 = vector.broadcast %cst_15 : f32 to vector<1x32xf32>
    %15 = arith.divf %13, %14 : vector<1x32xf32>
    %16 = arith.mulf %11, %11 : vector<1x32xf32>
    %17 = arith.subf %15, %16 : vector<1x32xf32>
    %cst_16 = arith.constant 9.99999997E-7 : f32
    %18 = vector.broadcast %cst_16 : f32 to vector<1x32xf32>
    %19 = arith.addf %17, %18 : vector<1x32xf32>
    %20 = math.rsqrt %19 : vector<1x32xf32>
    %c0_17 = arith.constant 0 : index
    %c0_18 = arith.constant 0 : index
    %21 = vector.load %arg7[%c0_17, %c0_18] : memref<32x32xf32, #tpu.memory_space<vmem>>, vector<32x32xf32>
    %cst_19 = arith.constant dense<0.000000e+00> : vector<1x32xf32>
    %22 = tpu.matmul %11, %21, %cst_19 {dimension_numbers = #tpu.dot_dimension_numbers<[1], [0], [0], [1], [0, 0, 1, 1], [], []>} : vector<1x32xf32>, vector<32x32xf32>, vector<1x32xf32> -> vector<1x32xf32>
    %c0_20 = arith.constant 0 : index
    %c0_21 = arith.constant 0 : index
    %23 = vector.load %arg7[%c0_20, %c0_21] : memref<32x32xf32, #tpu.memory_space<vmem>>, vector<32x32xf32>
    %cst_22 = arith.constant dense<0.000000e+00> : vector<1x32xf32>
    %24 = tpu.matmul %20, %23, %cst_22 {dimension_numbers = #tpu.dot_dimension_numbers<[1], [0], [0], [1], [0, 0, 1, 1], [], []>} : vector<1x32xf32>, vector<32x32xf32>, vector<1x32xf32> -> vector<1x32xf32>
    %25 = vector.shape_cast %22 : vector<1x32xf32> to vector<1x1x32xf32>
    %26 = vector.broadcast %25 : vector<1x1x32xf32> to vector<1x64x32xf32>
    %27 = arith.subf %2, %26 : vector<1x64x32xf32>
    %28 = vector.shape_cast %24 : vector<1x32xf32> to vector<1x1x32xf32>
    %29 = vector.shape_cast %3 : vector<1x32xf32> to vector<1x1x32xf32>
    %30 = arith.mulf %28, %29 : vector<1x1x32xf32>
    %31 = vector.broadcast %30 : vector<1x1x32xf32> to vector<1x64x32xf32>
    %32 = arith.mulf %27, %31 : vector<1x64x32xf32>
    %33 = vector.shape_cast %4 : vector<1x32xf32> to vector<1x1x32xf32>
    %34 = vector.broadcast %33 : vector<1x1x32xf32> to vector<1x64x32xf32>
    %35 = arith.addf %32, %34 : vector<1x64x32xf32>
    %cst_23 = arith.constant 0.000000e+00 : f32
    %36 = vector.broadcast %cst_23 : f32 to vector<1x64x32xf32>
    %37 = arith.subf %36, %35 : vector<1x64x32xf32>
    %38 = math.exp %37 : vector<1x64x32xf32>
    %cst_24 = arith.constant 1.000000e+00 : f32
    %39 = vector.broadcast %cst_24 : f32 to vector<1x64x32xf32>
    %40 = arith.addf %39, %38 : vector<1x64x32xf32>
    %41 = tpu.reciprocal %40 {approx = true} : vector<1x64x32xf32> -> vector<1x64x32xf32>
    %42 = arith.mulf %35, %41 : vector<1x64x32xf32>
    %43 = vector.shape_cast %42 : vector<1x64x32xf32> to vector<64x32xf32>
    %cst_25 = arith.constant 0.000000e+00 : f32
    %44 = vector.broadcast %cst_25 : f32 to vector<64x64xf32>
    %c9_i32 = arith.constant 9 : i32
    %45 = tpu.dynamic_rotate %43 by %c9_i32 dim 0 : vector<64x32xf32>, i32 -> vector<64x32xf32>
    %c0_26 = arith.constant 0 : index
    %c0_27 = arith.constant 0 : index
    %c0_28 = arith.constant 0 : index
    %46 = vector.load %arg3[%c0_26, %c0_27, %c0_28] : memref<9x64x1xbf16, #tpu.memory_space<vmem>>, vector<1x64x1xbf16>
    %47 = vector.shape_cast %46 : vector<1x64x1xbf16> to vector<64x1xbf16>
    %48 = arith.extf %47 : vector<64x1xbf16> to vector<64x1xf32>
    %49 = vector.broadcast %48 : vector<64x1xf32> to vector<64x32xf32>
    %50 = arith.mulf %45, %49 : vector<64x32xf32>
    %51 = arith.truncf %50 : vector<64x32xf32> to vector<64x32xbf16>
    %c0_29 = arith.constant 0 : index
    %c0_30 = arith.constant 0 : index
    %c0_31 = arith.constant 0 : index
    %52 = vector.load %arg8[%c0_29, %c0_30, %c0_31] : memref<9x32x64xbf16, #tpu.memory_space<vmem>>, vector<1x32x64xbf16>
    %53 = vector.shape_cast %52 : vector<1x32x64xbf16> to vector<32x64xbf16>
    %cst_32 = arith.constant dense<0.000000e+00> : vector<64x64xf32>
    %54 = tpu.matmul %51, %53, %cst_32 {dimension_numbers = #tpu.dot_dimension_numbers<[1], [0], [0], [1], [0, 0, 1, 1], [], []>} : vector<64x32xbf16>, vector<32x64xbf16>, vector<64x64xf32> -> vector<64x64xf32>
    %55 = arith.addf %44, %54 : vector<64x64xf32>
    %c8_i32 = arith.constant 8 : i32
    %56 = tpu.dynamic_rotate %43 by %c8_i32 dim 0 : vector<64x32xf32>, i32 -> vector<64x32xf32>
    %c1 = arith.constant 1 : index
    %c0_33 = arith.constant 0 : index
    %c0_34 = arith.constant 0 : index
    %57 = vector.load %arg3[%c1, %c0_33, %c0_34] : memref<9x64x1xbf16, #tpu.memory_space<vmem>>, vector<1x64x1xbf16>
    %58 = vector.shape_cast %57 : vector<1x64x1xbf16> to vector<64x1xbf16>
    %59 = arith.extf %58 : vector<64x1xbf16> to vector<64x1xf32>
    %60 = vector.broadcast %59 : vector<64x1xf32> to vector<64x32xf32>
    %61 = arith.mulf %56, %60 : vector<64x32xf32>
    %62 = arith.truncf %61 : vector<64x32xf32> to vector<64x32xbf16>
    %c1_35 = arith.constant 1 : index
    %c0_36 = arith.constant 0 : index
    %c0_37 = arith.constant 0 : index
    %63 = vector.load %arg8[%c1_35, %c0_36, %c0_37] : memref<9x32x64xbf16, #tpu.memory_space<vmem>>, vector<1x32x64xbf16>
    %64 = vector.shape_cast %63 : vector<1x32x64xbf16> to vector<32x64xbf16>
    %cst_38 = arith.constant dense<0.000000e+00> : vector<64x64xf32>
    %65 = tpu.matmul %62, %64, %cst_38 {dimension_numbers = #tpu.dot_dimension_numbers<[1], [0], [0], [1], [0, 0, 1, 1], [], []>} : vector<64x32xbf16>, vector<32x64xbf16>, vector<64x64xf32> -> vector<64x64xf32>
    %66 = arith.addf %55, %65 : vector<64x64xf32>
    %c7_i32 = arith.constant 7 : i32
    %67 = tpu.dynamic_rotate %43 by %c7_i32 dim 0 : vector<64x32xf32>, i32 -> vector<64x32xf32>
    %c2 = arith.constant 2 : index
    %c0_39 = arith.constant 0 : index
    %c0_40 = arith.constant 0 : index
    %68 = vector.load %arg3[%c2, %c0_39, %c0_40] : memref<9x64x1xbf16, #tpu.memory_space<vmem>>, vector<1x64x1xbf16>
    %69 = vector.shape_cast %68 : vector<1x64x1xbf16> to vector<64x1xbf16>
    %70 = arith.extf %69 : vector<64x1xbf16> to vector<64x1xf32>
    %71 = vector.broadcast %70 : vector<64x1xf32> to vector<64x32xf32>
    %72 = arith.mulf %67, %71 : vector<64x32xf32>
    %73 = arith.truncf %72 : vector<64x32xf32> to vector<64x32xbf16>
    %c2_41 = arith.constant 2 : index
    %c0_42 = arith.constant 0 : index
    %c0_43 = arith.constant 0 : index
    %74 = vector.load %arg8[%c2_41, %c0_42, %c0_43] : memref<9x32x64xbf16, #tpu.memory_space<vmem>>, vector<1x32x64xbf16>
    %75 = vector.shape_cast %74 : vector<1x32x64xbf16> to vector<32x64xbf16>
    %cst_44 = arith.constant dense<0.000000e+00> : vector<64x64xf32>
    %76 = tpu.matmul %73, %75, %cst_44 {dimension_numbers = #tpu.dot_dimension_numbers<[1], [0], [0], [1], [0, 0, 1, 1], [], []>} : vector<64x32xbf16>, vector<32x64xbf16>, vector<64x64xf32> -> vector<64x64xf32>
    %77 = arith.addf %66, %76 : vector<64x64xf32>
    %c1_i32 = arith.constant 1 : i32
    %78 = tpu.dynamic_rotate %43 by %c1_i32 dim 0 : vector<64x32xf32>, i32 -> vector<64x32xf32>
    %c3 = arith.constant 3 : index
    %c0_45 = arith.constant 0 : index
    %c0_46 = arith.constant 0 : index
    %79 = vector.load %arg3[%c3, %c0_45, %c0_46] : memref<9x64x1xbf16, #tpu.memory_space<vmem>>, vector<1x64x1xbf16>
    %80 = vector.shape_cast %79 : vector<1x64x1xbf16> to vector<64x1xbf16>
    %81 = arith.extf %80 : vector<64x1xbf16> to vector<64x1xf32>
    %82 = vector.broadcast %81 : vector<64x1xf32> to vector<64x32xf32>
    %83 = arith.mulf %78, %82 : vector<64x32xf32>
    %84 = arith.truncf %83 : vector<64x32xf32> to vector<64x32xbf16>
    %c3_47 = arith.constant 3 : index
    %c0_48 = arith.constant 0 : index
    %c0_49 = arith.constant 0 : index
    %85 = vector.load %arg8[%c3_47, %c0_48, %c0_49] : memref<9x32x64xbf16, #tpu.memory_space<vmem>>, vector<1x32x64xbf16>
    %86 = vector.shape_cast %85 : vector<1x32x64xbf16> to vector<32x64xbf16>
    %cst_50 = arith.constant dense<0.000000e+00> : vector<64x64xf32>
    %87 = tpu.matmul %84, %86, %cst_50 {dimension_numbers = #tpu.dot_dimension_numbers<[1], [0], [0], [1], [0, 0, 1, 1], [], []>} : vector<64x32xbf16>, vector<32x64xbf16>, vector<64x64xf32> -> vector<64x64xf32>
    %88 = arith.addf %77, %87 : vector<64x64xf32>
    %89 = arith.truncf %43 : vector<64x32xf32> to vector<64x32xbf16>
    %c4 = arith.constant 4 : index
    %c0_51 = arith.constant 0 : index
    %c0_52 = arith.constant 0 : index
    %90 = vector.load %arg8[%c4, %c0_51, %c0_52] : memref<9x32x64xbf16, #tpu.memory_space<vmem>>, vector<1x32x64xbf16>
    %91 = vector.shape_cast %90 : vector<1x32x64xbf16> to vector<32x64xbf16>
    %cst_53 = arith.constant dense<0.000000e+00> : vector<64x64xf32>
    %92 = tpu.matmul %89, %91, %cst_53 {dimension_numbers = #tpu.dot_dimension_numbers<[1], [0], [0], [1], [0, 0, 1, 1], [], []>} : vector<64x32xbf16>, vector<32x64xbf16>, vector<64x64xf32> -> vector<64x64xf32>
    %93 = arith.addf %88, %92 : vector<64x64xf32>
    %c63_i32 = arith.constant 63 : i32
    %94 = tpu.dynamic_rotate %43 by %c63_i32 dim 0 : vector<64x32xf32>, i32 -> vector<64x32xf32>
    %c5 = arith.constant 5 : index
    %c0_54 = arith.constant 0 : index
    %c0_55 = arith.constant 0 : index
    %95 = vector.load %arg3[%c5, %c0_54, %c0_55] : memref<9x64x1xbf16, #tpu.memory_space<vmem>>, vector<1x64x1xbf16>
    %96 = vector.shape_cast %95 : vector<1x64x1xbf16> to vector<64x1xbf16>
    %97 = arith.extf %96 : vector<64x1xbf16> to vector<64x1xf32>
    %98 = vector.broadcast %97 : vector<64x1xf32> to vector<64x32xf32>
    %99 = arith.mulf %94, %98 : vector<64x32xf32>
    %100 = arith.truncf %99 : vector<64x32xf32> to vector<64x32xbf16>
    %c5_56 = arith.constant 5 : index
    %c0_57 = arith.constant 0 : index
    %c0_58 = arith.constant 0 : index
    %101 = vector.load %arg8[%c5_56, %c0_57, %c0_58] : memref<9x32x64xbf16, #tpu.memory_space<vmem>>, vector<1x32x64xbf16>
    %102 = vector.shape_cast %101 : vector<1x32x64xbf16> to vector<32x64xbf16>
    %cst_59 = arith.constant dense<0.000000e+00> : vector<64x64xf32>
    %103 = tpu.matmul %100, %102, %cst_59 {dimension_numbers = #tpu.dot_dimension_numbers<[1], [0], [0], [1], [0, 0, 1, 1], [], []>} : vector<64x32xbf16>, vector<32x64xbf16>, vector<64x64xf32> -> vector<64x64xf32>
    %104 = arith.addf %93, %103 : vector<64x64xf32>
    %c57_i32 = arith.constant 57 : i32
    %105 = tpu.dynamic_rotate %43 by %c57_i32 dim 0 : vector<64x32xf32>, i32 -> vector<64x32xf32>
    %c6 = arith.constant 6 : index
    %c0_60 = arith.constant 0 : index
    %c0_61 = arith.constant 0 : index
    %106 = vector.load %arg3[%c6, %c0_60, %c0_61] : memref<9x64x1xbf16, #tpu.memory_space<vmem>>, vector<1x64x1xbf16>
    %107 = vector.shape_cast %106 : vector<1x64x1xbf16> to vector<64x1xbf16>
    %108 = arith.extf %107 : vector<64x1xbf16> to vector<64x1xf32>
    %109 = vector.broadcast %108 : vector<64x1xf32> to vector<64x32xf32>
    %110 = arith.mulf %105, %109 : vector<64x32xf32>
    %111 = arith.truncf %110 : vector<64x32xf32> to vector<64x32xbf16>
    %c6_62 = arith.constant 6 : index
    %c0_63 = arith.constant 0 : index
    %c0_64 = arith.constant 0 : index
    %112 = vector.load %arg8[%c6_62, %c0_63, %c0_64] : memref<9x32x64xbf16, #tpu.memory_space<vmem>>, vector<1x32x64xbf16>
    %113 = vector.shape_cast %112 : vector<1x32x64xbf16> to vector<32x64xbf16>
    %cst_65 = arith.constant dense<0.000000e+00> : vector<64x64xf32>
    %114 = tpu.matmul %111, %113, %cst_65 {dimension_numbers = #tpu.dot_dimension_numbers<[1], [0], [0], [1], [0, 0, 1, 1], [], []>} : vector<64x32xbf16>, vector<32x64xbf16>, vector<64x64xf32> -> vector<64x64xf32>
    %115 = arith.addf %104, %114 : vector<64x64xf32>
    %c56_i32 = arith.constant 56 : i32
    %116 = tpu.dynamic_rotate %43 by %c56_i32 dim 0 : vector<64x32xf32>, i32 -> vector<64x32xf32>
    %c7 = arith.constant 7 : index
    %c0_66 = arith.constant 0 : index
    %c0_67 = arith.constant 0 : index
    %117 = vector.load %arg3[%c7, %c0_66, %c0_67] : memref<9x64x1xbf16, #tpu.memory_space<vmem>>, vector<1x64x1xbf16>
    %118 = vector.shape_cast %117 : vector<1x64x1xbf16> to vector<64x1xbf16>
    %119 = arith.extf %118 : vector<64x1xbf16> to vector<64x1xf32>
    %120 = vector.broadcast %119 : vector<64x1xf32> to vector<64x32xf32>
    %121 = arith.mulf %116, %120 : vector<64x32xf32>
    %122 = arith.truncf %121 : vector<64x32xf32> to vector<64x32xbf16>
    %c7_68 = arith.constant 7 : index
    %c0_69 = arith.constant 0 : index
    %c0_70 = arith.constant 0 : index
    %123 = vector.load %arg8[%c7_68, %c0_69, %c0_70] : memref<9x32x64xbf16, #tpu.memory_space<vmem>>, vector<1x32x64xbf16>
    %124 = vector.shape_cast %123 : vector<1x32x64xbf16> to vector<32x64xbf16>
    %cst_71 = arith.constant dense<0.000000e+00> : vector<64x64xf32>
    %125 = tpu.matmul %122, %124, %cst_71 {dimension_numbers = #tpu.dot_dimension_numbers<[1], [0], [0], [1], [0, 0, 1, 1], [], []>} : vector<64x32xbf16>, vector<32x64xbf16>, vector<64x64xf32> -> vector<64x64xf32>
    %126 = arith.addf %115, %125 : vector<64x64xf32>
    %c55_i32 = arith.constant 55 : i32
    %127 = tpu.dynamic_rotate %43 by %c55_i32 dim 0 : vector<64x32xf32>, i32 -> vector<64x32xf32>
    %c8 = arith.constant 8 : index
    %c0_72 = arith.constant 0 : index
    %c0_73 = arith.constant 0 : index
    %128 = vector.load %arg3[%c8, %c0_72, %c0_73] : memref<9x64x1xbf16, #tpu.memory_space<vmem>>, vector<1x64x1xbf16>
    %129 = vector.shape_cast %128 : vector<1x64x1xbf16> to vector<64x1xbf16>
    %130 = arith.extf %129 : vector<64x1xbf16> to vector<64x1xf32>
    %131 = vector.broadcast %130 : vector<64x1xf32> to vector<64x32xf32>
    %132 = arith.mulf %127, %131 : vector<64x32xf32>
    %133 = arith.truncf %132 : vector<64x32xf32> to vector<64x32xbf16>
    %c8_74 = arith.constant 8 : index
    %c0_75 = arith.constant 0 : index
    %c0_76 = arith.constant 0 : index
    %134 = vector.load %arg8[%c8_74, %c0_75, %c0_76] : memref<9x32x64xbf16, #tpu.memory_space<vmem>>, vector<1x32x64xbf16>
    %135 = vector.shape_cast %134 : vector<1x32x64xbf16> to vector<32x64xbf16>
    %cst_77 = arith.constant dense<0.000000e+00> : vector<64x64xf32>
    %136 = tpu.matmul %133, %135, %cst_77 {dimension_numbers = #tpu.dot_dimension_numbers<[1], [0], [0], [1], [0, 0, 1, 1], [], []>} : vector<64x32xbf16>, vector<32x64xbf16>, vector<64x64xf32> -> vector<64x64xf32>
    %137 = arith.addf %126, %136 : vector<64x64xf32>
    %c0_78 = arith.constant 0 : index
    %c0_79 = arith.constant 0 : index
    %138 = vector.load %arg9[%c0_78, %c0_79] : memref<1x64xf32, #tpu.memory_space<vmem>>, vector<1x64xf32>
    %139 = vector.broadcast %138 : vector<1x64xf32> to vector<64x64xf32>
    %140 = arith.addf %137, %139 : vector<64x64xf32>
    %c0_80 = arith.constant 0 : index
    %c0_81 = arith.constant 0 : index
    %c0_82 = arith.constant 0 : index
    %141 = vector.load %arg2[%c0_80, %c0_81, %c0_82] : memref<1x1x128xf32, #tpu.memory_space<vmem>>, vector<1x1x128xf32>
    %142 = vector.shape_cast %141 : vector<1x1x128xf32> to vector<1x128xf32>
    %cst_83 = arith.constant 0.000000e+00 : f32
    %143 = vector.broadcast %cst_83 : f32 to vector<1x128xf32>
    %144 = arith.subf %143, %142 : vector<1x128xf32>
    %145 = math.exp %144 : vector<1x128xf32>
    %cst_84 = arith.constant 1.000000e+00 : f32
    %146 = vector.broadcast %cst_84 : f32 to vector<1x128xf32>
    %147 = arith.addf %146, %145 : vector<1x128xf32>
    %148 = tpu.reciprocal %147 {approx = true} : vector<1x128xf32> -> vector<1x128xf32>
    %149 = arith.mulf %142, %148 : vector<1x128xf32>
    %150 = arith.truncf %149 : vector<1x128xf32> to vector<1x128xbf16>
    %c0_85 = arith.constant 0 : index
    %c0_86 = arith.constant 0 : index
    %151 = vector.load %arg10[%c0_85, %c0_86] : memref<128x64xbf16, #tpu.memory_space<vmem>>, vector<128x64xbf16>
    %cst_87 = arith.constant dense<0.000000e+00> : vector<1x64xf32>
    %152 = tpu.matmul %150, %151, %cst_87 {dimension_numbers = #tpu.dot_dimension_numbers<[1], [0], [0], [1], [0, 0, 1, 1], [], []>} : vector<1x128xbf16>, vector<128x64xbf16>, vector<1x64xf32> -> vector<1x64xf32>
    %c0_88 = arith.constant 0 : index
    %c0_89 = arith.constant 0 : index
    %153 = vector.load %arg11[%c0_88, %c0_89] : memref<1x64xf32, #tpu.memory_space<vmem>>, vector<1x64xf32>
    %154 = arith.addf %152, %153 : vector<1x64xf32>
    %155 = vector.shape_cast %140 : vector<64x64xf32> to vector<1x64x64xf32>
    %156 = vector.shape_cast %154 : vector<1x64xf32> to vector<1x1x64xf32>
    %157 = vector.broadcast %156 : vector<1x1x64xf32> to vector<1x64x64xf32>
    %158 = arith.addf %155, %157 : vector<1x64x64xf32>
    %c0_90 = arith.constant 0 : index
    %c0_91 = arith.constant 0 : index
    %159 = vector.load %arg12[%c0_90, %c0_91] : memref<1x64xf32, #tpu.memory_space<vmem>>, vector<1x64xf32>
    %c0_92 = arith.constant 0 : index
    %c0_93 = arith.constant 0 : index
    %160 = vector.load %arg13[%c0_92, %c0_93] : memref<1x64xf32, #tpu.memory_space<vmem>>, vector<1x64xf32>
    %cst_94 = arith.constant dense<0.000000e+00> : vector<1x64xf32>
    %161 = vector.multi_reduction <add>, %158, %cst_94 [1] : vector<1x64x64xf32> to vector<1x64xf32>
    %162 = arith.mulf %158, %158 : vector<1x64x64xf32>
    %cst_95 = arith.constant dense<0.000000e+00> : vector<1x64xf32>
    %163 = vector.multi_reduction <add>, %162, %cst_95 [1] : vector<1x64x64xf32> to vector<1x64xf32>
    %c0_96 = arith.constant 0 : index
    %c0_97 = arith.constant 0 : index
    %164 = vector.load %arg14[%c0_96, %c0_97] : memref<64x32xf32, #tpu.memory_space<vmem>>, vector<64x32xf32>
    %cst_98 = arith.constant dense<0.000000e+00> : vector<1x32xf32>
    %165 = tpu.matmul %161, %164, %cst_98 {dimension_numbers = #tpu.dot_dimension_numbers<[1], [0], [0], [1], [0, 0, 1, 1], [], []>} : vector<1x64xf32>, vector<64x32xf32>, vector<1x32xf32> -> vector<1x32xf32>
    %cst_99 = arith.constant 1.280000e+02 : f32
    %166 = vector.broadcast %cst_99 : f32 to vector<1x32xf32>
    %167 = arith.divf %165, %166 : vector<1x32xf32>
    %c0_100 = arith.constant 0 : index
    %c0_101 = arith.constant 0 : index
    %168 = vector.load %arg14[%c0_100, %c0_101] : memref<64x32xf32, #tpu.memory_space<vmem>>, vector<64x32xf32>
    %cst_102 = arith.constant dense<0.000000e+00> : vector<1x32xf32>
    %169 = tpu.matmul %163, %168, %cst_102 {dimension_numbers = #tpu.dot_dimension_numbers<[1], [0], [0], [1], [0, 0, 1, 1], [], []>} : vector<1x64xf32>, vector<64x32xf32>, vector<1x32xf32> -> vector<1x32xf32>
    %cst_103 = arith.constant 1.280000e+02 : f32
    %170 = vector.broadcast %cst_103 : f32 to vector<1x32xf32>
    %171 = arith.divf %169, %170 : vector<1x32xf32>
    %172 = arith.mulf %167, %167 : vector<1x32xf32>
    %173 = arith.subf %171, %172 : vector<1x32xf32>
    %cst_104 = arith.constant 9.99999997E-7 : f32
    %174 = vector.broadcast %cst_104 : f32 to vector<1x32xf32>
    %175 = arith.addf %173, %174 : vector<1x32xf32>
    %176 = math.rsqrt %175 : vector<1x32xf32>
    %c0_105 = arith.constant 0 : index
    %c0_106 = arith.constant 0 : index
    %177 = vector.load %arg15[%c0_105, %c0_106] : memref<32x64xf32, #tpu.memory_space<vmem>>, vector<32x64xf32>
    %cst_107 = arith.constant dense<0.000000e+00> : vector<1x64xf32>
    %178 = tpu.matmul %167, %177, %cst_107 {dimension_numbers = #tpu.dot_dimension_numbers<[1], [0], [0], [1], [0, 0, 1, 1], [], []>} : vector<1x32xf32>, vector<32x64xf32>, vector<1x64xf32> -> vector<1x64xf32>
    %c0_108 = arith.constant 0 : index
    %c0_109 = arith.constant 0 : index
    %179 = vector.load %arg15[%c0_108, %c0_109] : memref<32x64xf32, #tpu.memory_space<vmem>>, vector<32x64xf32>
    %cst_110 = arith.constant dense<0.000000e+00> : vector<1x64xf32>
    %180 = tpu.matmul %176, %179, %cst_110 {dimension_numbers = #tpu.dot_dimension_numbers<[1], [0], [0], [1], [0, 0, 1, 1], [], []>} : vector<1x32xf32>, vector<32x64xf32>, vector<1x64xf32> -> vector<1x64xf32>
    %181 = vector.shape_cast %178 : vector<1x64xf32> to vector<1x1x64xf32>
    %182 = vector.broadcast %181 : vector<1x1x64xf32> to vector<1x64x64xf32>
    %183 = arith.subf %158, %182 : vector<1x64x64xf32>
    %184 = vector.shape_cast %180 : vector<1x64xf32> to vector<1x1x64xf32>
    %185 = vector.shape_cast %159 : vector<1x64xf32> to vector<1x1x64xf32>
    %186 = arith.mulf %184, %185 : vector<1x1x64xf32>
    %187 = vector.broadcast %186 : vector<1x1x64xf32> to vector<1x64x64xf32>
    %188 = arith.mulf %183, %187 : vector<1x64x64xf32>
    %189 = vector.shape_cast %160 : vector<1x64xf32> to vector<1x1x64xf32>
    %190 = vector.broadcast %189 : vector<1x1x64xf32> to vector<1x64x64xf32>
    %191 = arith.addf %188, %190 : vector<1x64x64xf32>
    %cst_111 = arith.constant 0.000000e+00 : f32
    %192 = vector.broadcast %cst_111 : f32 to vector<1x64x64xf32>
    %193 = arith.subf %192, %191 : vector<1x64x64xf32>
    %194 = math.exp %193 : vector<1x64x64xf32>
    %cst_112 = arith.constant 1.000000e+00 : f32
    %195 = vector.broadcast %cst_112 : f32 to vector<1x64x64xf32>
    %196 = arith.addf %195, %194 : vector<1x64x64xf32>
    %197 = tpu.reciprocal %196 {approx = true} : vector<1x64x64xf32> -> vector<1x64x64xf32>
    %198 = arith.mulf %191, %197 : vector<1x64x64xf32>
    %199 = vector.shape_cast %198 : vector<1x64x64xf32> to vector<64x64xf32>
    %cst_113 = arith.constant 0.000000e+00 : f32
    %200 = vector.broadcast %cst_113 : f32 to vector<64x64xf32>
    %c9_i32_114 = arith.constant 9 : i32
    %201 = tpu.dynamic_rotate %199 by %c9_i32_114 dim 0 : vector<64x64xf32>, i32 -> vector<64x64xf32>
    %c0_115 = arith.constant 0 : index
    %c0_116 = arith.constant 0 : index
    %c0_117 = arith.constant 0 : index
    %202 = vector.load %arg3[%c0_115, %c0_116, %c0_117] : memref<9x64x1xbf16, #tpu.memory_space<vmem>>, vector<1x64x1xbf16>
    %203 = vector.shape_cast %202 : vector<1x64x1xbf16> to vector<64x1xbf16>
    %204 = arith.extf %203 : vector<64x1xbf16> to vector<64x1xf32>
    %205 = vector.broadcast %204 : vector<64x1xf32> to vector<64x64xf32>
    %206 = arith.mulf %201, %205 : vector<64x64xf32>
    %207 = arith.truncf %206 : vector<64x64xf32> to vector<64x64xbf16>
    %c0_118 = arith.constant 0 : index
    %c0_119 = arith.constant 0 : index
    %c0_120 = arith.constant 0 : index
    %208 = vector.load %arg16[%c0_118, %c0_119, %c0_120] : memref<9x64x64xbf16, #tpu.memory_space<vmem>>, vector<1x64x64xbf16>
    %209 = vector.shape_cast %208 : vector<1x64x64xbf16> to vector<64x64xbf16>
    %cst_121 = arith.constant dense<0.000000e+00> : vector<64x64xf32>
    %210 = tpu.matmul %207, %209, %cst_121 {dimension_numbers = #tpu.dot_dimension_numbers<[1], [0], [0], [1], [0, 0, 1, 1], [], []>} : vector<64x64xbf16>, vector<64x64xbf16>, vector<64x64xf32> -> vector<64x64xf32>
    %211 = arith.addf %200, %210 : vector<64x64xf32>
    %c8_i32_122 = arith.constant 8 : i32
    %212 = tpu.dynamic_rotate %199 by %c8_i32_122 dim 0 : vector<64x64xf32>, i32 -> vector<64x64xf32>
    %c1_123 = arith.constant 1 : index
    %c0_124 = arith.constant 0 : index
    %c0_125 = arith.constant 0 : index
    %213 = vector.load %arg3[%c1_123, %c0_124, %c0_125] : memref<9x64x1xbf16, #tpu.memory_space<vmem>>, vector<1x64x1xbf16>
    %214 = vector.shape_cast %213 : vector<1x64x1xbf16> to vector<64x1xbf16>
    %215 = arith.extf %214 : vector<64x1xbf16> to vector<64x1xf32>
    %216 = vector.broadcast %215 : vector<64x1xf32> to vector<64x64xf32>
    %217 = arith.mulf %212, %216 : vector<64x64xf32>
    %218 = arith.truncf %217 : vector<64x64xf32> to vector<64x64xbf16>
    %c1_126 = arith.constant 1 : index
    %c0_127 = arith.constant 0 : index
    %c0_128 = arith.constant 0 : index
    %219 = vector.load %arg16[%c1_126, %c0_127, %c0_128] : memref<9x64x64xbf16, #tpu.memory_space<vmem>>, vector<1x64x64xbf16>
    %220 = vector.shape_cast %219 : vector<1x64x64xbf16> to vector<64x64xbf16>
    %cst_129 = arith.constant dense<0.000000e+00> : vector<64x64xf32>
    %221 = tpu.matmul %218, %220, %cst_129 {dimension_numbers = #tpu.dot_dimension_numbers<[1], [0], [0], [1], [0, 0, 1, 1], [], []>} : vector<64x64xbf16>, vector<64x64xbf16>, vector<64x64xf32> -> vector<64x64xf32>
    %222 = arith.addf %211, %221 : vector<64x64xf32>
    %c7_i32_130 = arith.constant 7 : i32
    %223 = tpu.dynamic_rotate %199 by %c7_i32_130 dim 0 : vector<64x64xf32>, i32 -> vector<64x64xf32>
    %c2_131 = arith.constant 2 : index
    %c0_132 = arith.constant 0 : index
    %c0_133 = arith.constant 0 : index
    %224 = vector.load %arg3[%c2_131, %c0_132, %c0_133] : memref<9x64x1xbf16, #tpu.memory_space<vmem>>, vector<1x64x1xbf16>
    %225 = vector.shape_cast %224 : vector<1x64x1xbf16> to vector<64x1xbf16>
    %226 = arith.extf %225 : vector<64x1xbf16> to vector<64x1xf32>
    %227 = vector.broadcast %226 : vector<64x1xf32> to vector<64x64xf32>
    %228 = arith.mulf %223, %227 : vector<64x64xf32>
    %229 = arith.truncf %228 : vector<64x64xf32> to vector<64x64xbf16>
    %c2_134 = arith.constant 2 : index
    %c0_135 = arith.constant 0 : index
    %c0_136 = arith.constant 0 : index
    %230 = vector.load %arg16[%c2_134, %c0_135, %c0_136] : memref<9x64x64xbf16, #tpu.memory_space<vmem>>, vector<1x64x64xbf16>
    %231 = vector.shape_cast %230 : vector<1x64x64xbf16> to vector<64x64xbf16>
    %cst_137 = arith.constant dense<0.000000e+00> : vector<64x64xf32>
    %232 = tpu.matmul %229, %231, %cst_137 {dimension_numbers = #tpu.dot_dimension_numbers<[1], [0], [0], [1], [0, 0, 1, 1], [], []>} : vector<64x64xbf16>, vector<64x64xbf16>, vector<64x64xf32> -> vector<64x64xf32>
    %233 = arith.addf %222, %232 : vector<64x64xf32>
    %c1_i32_138 = arith.constant 1 : i32
    %234 = tpu.dynamic_rotate %199 by %c1_i32_138 dim 0 : vector<64x64xf32>, i32 -> vector<64x64xf32>
    %c3_139 = arith.constant 3 : index
    %c0_140 = arith.constant 0 : index
    %c0_141 = arith.constant 0 : index
    %235 = vector.load %arg3[%c3_139, %c0_140, %c0_141] : memref<9x64x1xbf16, #tpu.memory_space<vmem>>, vector<1x64x1xbf16>
    %236 = vector.shape_cast %235 : vector<1x64x1xbf16> to vector<64x1xbf16>
    %237 = arith.extf %236 : vector<64x1xbf16> to vector<64x1xf32>
    %238 = vector.broadcast %237 : vector<64x1xf32> to vector<64x64xf32>
    %239 = arith.mulf %234, %238 : vector<64x64xf32>
    %240 = arith.truncf %239 : vector<64x64xf32> to vector<64x64xbf16>
    %c3_142 = arith.constant 3 : index
    %c0_143 = arith.constant 0 : index
    %c0_144 = arith.constant 0 : index
    %241 = vector.load %arg16[%c3_142, %c0_143, %c0_144] : memref<9x64x64xbf16, #tpu.memory_space<vmem>>, vector<1x64x64xbf16>
    %242 = vector.shape_cast %241 : vector<1x64x64xbf16> to vector<64x64xbf16>
    %cst_145 = arith.constant dense<0.000000e+00> : vector<64x64xf32>
    %243 = tpu.matmul %240, %242, %cst_145 {dimension_numbers = #tpu.dot_dimension_numbers<[1], [0], [0], [1], [0, 0, 1, 1], [], []>} : vector<64x64xbf16>, vector<64x64xbf16>, vector<64x64xf32> -> vector<64x64xf32>
    %244 = arith.addf %233, %243 : vector<64x64xf32>
    %245 = arith.truncf %199 : vector<64x64xf32> to vector<64x64xbf16>
    %c4_146 = arith.constant 4 : index
    %c0_147 = arith.constant 0 : index
    %c0_148 = arith.constant 0 : index
    %246 = vector.load %arg16[%c4_146, %c0_147, %c0_148] : memref<9x64x64xbf16, #tpu.memory_space<vmem>>, vector<1x64x64xbf16>
    %247 = vector.shape_cast %246 : vector<1x64x64xbf16> to vector<64x64xbf16>
    %cst_149 = arith.constant dense<0.000000e+00> : vector<64x64xf32>
    %248 = tpu.matmul %245, %247, %cst_149 {dimension_numbers = #tpu.dot_dimension_numbers<[1], [0], [0], [1], [0, 0, 1, 1], [], []>} : vector<64x64xbf16>, vector<64x64xbf16>, vector<64x64xf32> -> vector<64x64xf32>
    %249 = arith.addf %244, %248 : vector<64x64xf32>
    %c63_i32_150 = arith.constant 63 : i32
    %250 = tpu.dynamic_rotate %199 by %c63_i32_150 dim 0 : vector<64x64xf32>, i32 -> vector<64x64xf32>
    %c5_151 = arith.constant 5 : index
    %c0_152 = arith.constant 0 : index
    %c0_153 = arith.constant 0 : index
    %251 = vector.load %arg3[%c5_151, %c0_152, %c0_153] : memref<9x64x1xbf16, #tpu.memory_space<vmem>>, vector<1x64x1xbf16>
    %252 = vector.shape_cast %251 : vector<1x64x1xbf16> to vector<64x1xbf16>
    %253 = arith.extf %252 : vector<64x1xbf16> to vector<64x1xf32>
    %254 = vector.broadcast %253 : vector<64x1xf32> to vector<64x64xf32>
    %255 = arith.mulf %250, %254 : vector<64x64xf32>
    %256 = arith.truncf %255 : vector<64x64xf32> to vector<64x64xbf16>
    %c5_154 = arith.constant 5 : index
    %c0_155 = arith.constant 0 : index
    %c0_156 = arith.constant 0 : index
    %257 = vector.load %arg16[%c5_154, %c0_155, %c0_156] : memref<9x64x64xbf16, #tpu.memory_space<vmem>>, vector<1x64x64xbf16>
    %258 = vector.shape_cast %257 : vector<1x64x64xbf16> to vector<64x64xbf16>
    %cst_157 = arith.constant dense<0.000000e+00> : vector<64x64xf32>
    %259 = tpu.matmul %256, %258, %cst_157 {dimension_numbers = #tpu.dot_dimension_numbers<[1], [0], [0], [1], [0, 0, 1, 1], [], []>} : vector<64x64xbf16>, vector<64x64xbf16>, vector<64x64xf32> -> vector<64x64xf32>
    %260 = arith.addf %249, %259 : vector<64x64xf32>
    %c57_i32_158 = arith.constant 57 : i32
    %261 = tpu.dynamic_rotate %199 by %c57_i32_158 dim 0 : vector<64x64xf32>, i32 -> vector<64x64xf32>
    %c6_159 = arith.constant 6 : index
    %c0_160 = arith.constant 0 : index
    %c0_161 = arith.constant 0 : index
    %262 = vector.load %arg3[%c6_159, %c0_160, %c0_161] : memref<9x64x1xbf16, #tpu.memory_space<vmem>>, vector<1x64x1xbf16>
    %263 = vector.shape_cast %262 : vector<1x64x1xbf16> to vector<64x1xbf16>
    %264 = arith.extf %263 : vector<64x1xbf16> to vector<64x1xf32>
    %265 = vector.broadcast %264 : vector<64x1xf32> to vector<64x64xf32>
    %266 = arith.mulf %261, %265 : vector<64x64xf32>
    %267 = arith.truncf %266 : vector<64x64xf32> to vector<64x64xbf16>
    %c6_162 = arith.constant 6 : index
    %c0_163 = arith.constant 0 : index
    %c0_164 = arith.constant 0 : index
    %268 = vector.load %arg16[%c6_162, %c0_163, %c0_164] : memref<9x64x64xbf16, #tpu.memory_space<vmem>>, vector<1x64x64xbf16>
    %269 = vector.shape_cast %268 : vector<1x64x64xbf16> to vector<64x64xbf16>
    %cst_165 = arith.constant dense<0.000000e+00> : vector<64x64xf32>
    %270 = tpu.matmul %267, %269, %cst_165 {dimension_numbers = #tpu.dot_dimension_numbers<[1], [0], [0], [1], [0, 0, 1, 1], [], []>} : vector<64x64xbf16>, vector<64x64xbf16>, vector<64x64xf32> -> vector<64x64xf32>
    %271 = arith.addf %260, %270 : vector<64x64xf32>
    %c56_i32_166 = arith.constant 56 : i32
    %272 = tpu.dynamic_rotate %199 by %c56_i32_166 dim 0 : vector<64x64xf32>, i32 -> vector<64x64xf32>
    %c7_167 = arith.constant 7 : index
    %c0_168 = arith.constant 0 : index
    %c0_169 = arith.constant 0 : index
    %273 = vector.load %arg3[%c7_167, %c0_168, %c0_169] : memref<9x64x1xbf16, #tpu.memory_space<vmem>>, vector<1x64x1xbf16>
    %274 = vector.shape_cast %273 : vector<1x64x1xbf16> to vector<64x1xbf16>
    %275 = arith.extf %274 : vector<64x1xbf16> to vector<64x1xf32>
    %276 = vector.broadcast %275 : vector<64x1xf32> to vector<64x64xf32>
    %277 = arith.mulf %272, %276 : vector<64x64xf32>
    %278 = arith.truncf %277 : vector<64x64xf32> to vector<64x64xbf16>
    %c7_170 = arith.constant 7 : index
    %c0_171 = arith.constant 0 : index
    %c0_172 = arith.constant 0 : index
    %279 = vector.load %arg16[%c7_170, %c0_171, %c0_172] : memref<9x64x64xbf16, #tpu.memory_space<vmem>>, vector<1x64x64xbf16>
    %280 = vector.shape_cast %279 : vector<1x64x64xbf16> to vector<64x64xbf16>
    %cst_173 = arith.constant dense<0.000000e+00> : vector<64x64xf32>
    %281 = tpu.matmul %278, %280, %cst_173 {dimension_numbers = #tpu.dot_dimension_numbers<[1], [0], [0], [1], [0, 0, 1, 1], [], []>} : vector<64x64xbf16>, vector<64x64xbf16>, vector<64x64xf32> -> vector<64x64xf32>
    %282 = arith.addf %271, %281 : vector<64x64xf32>
    %c55_i32_174 = arith.constant 55 : i32
    %283 = tpu.dynamic_rotate %199 by %c55_i32_174 dim 0 : vector<64x64xf32>, i32 -> vector<64x64xf32>
    %c8_175 = arith.constant 8 : index
    %c0_176 = arith.constant 0 : index
    %c0_177 = arith.constant 0 : index
    %284 = vector.load %arg3[%c8_175, %c0_176, %c0_177] : memref<9x64x1xbf16, #tpu.memory_space<vmem>>, vector<1x64x1xbf16>
    %285 = vector.shape_cast %284 : vector<1x64x1xbf16> to vector<64x1xbf16>
    %286 = arith.extf %285 : vector<64x1xbf16> to vector<64x1xf32>
    %287 = vector.broadcast %286 : vector<64x1xf32> to vector<64x64xf32>
    %288 = arith.mulf %283, %287 : vector<64x64xf32>
    %289 = arith.truncf %288 : vector<64x64xf32> to vector<64x64xbf16>
    %c8_178 = arith.constant 8 : index
    %c0_179 = arith.constant 0 : index
    %c0_180 = arith.constant 0 : index
    %290 = vector.load %arg16[%c8_178, %c0_179, %c0_180] : memref<9x64x64xbf16, #tpu.memory_space<vmem>>, vector<1x64x64xbf16>
    %291 = vector.shape_cast %290 : vector<1x64x64xbf16> to vector<64x64xbf16>
    %cst_181 = arith.constant dense<0.000000e+00> : vector<64x64xf32>
    %292 = tpu.matmul %289, %291, %cst_181 {dimension_numbers = #tpu.dot_dimension_numbers<[1], [0], [0], [1], [0, 0, 1, 1], [], []>} : vector<64x64xbf16>, vector<64x64xbf16>, vector<64x64xf32> -> vector<64x64xf32>
    %293 = arith.addf %282, %292 : vector<64x64xf32>
    %c0_182 = arith.constant 0 : index
    %c0_183 = arith.constant 0 : index
    %294 = vector.load %arg17[%c0_182, %c0_183] : memref<1x64xf32, #tpu.memory_space<vmem>>, vector<1x64xf32>
    %295 = vector.broadcast %294 : vector<1x64xf32> to vector<64x64xf32>
    %296 = arith.addf %293, %295 : vector<64x64xf32>
    %c0_184 = arith.constant 0 : index
    %c0_185 = arith.constant 0 : index
    %c0_186 = arith.constant 0 : index
    %c0_187 = arith.constant 0 : index
    %297 = vector.load %arg1[%c0_184, %c0_185, %c0_186, %c0_187] : memref<1x8x8x32xbf16, #tpu.memory_space<vmem>>, vector<1x8x8x32xbf16>
    %298 = vector.shape_cast %297 : vector<1x8x8x32xbf16> to vector<64x32xbf16>
    %c0_188 = arith.constant 0 : index
    %c0_189 = arith.constant 0 : index
    %299 = vector.load %arg18[%c0_188, %c0_189] : memref<32x64xbf16, #tpu.memory_space<vmem>>, vector<32x64xbf16>
    %cst_190 = arith.constant dense<0.000000e+00> : vector<64x64xf32>
    %300 = tpu.matmul %298, %299, %cst_190 {dimension_numbers = #tpu.dot_dimension_numbers<[1], [0], [0], [1], [0, 0, 1, 1], [], []>} : vector<64x32xbf16>, vector<32x64xbf16>, vector<64x64xf32> -> vector<64x64xf32>
    %c0_191 = arith.constant 0 : index
    %c0_192 = arith.constant 0 : index
    %301 = vector.load %arg19[%c0_191, %c0_192] : memref<1x64xf32, #tpu.memory_space<vmem>>, vector<1x64xf32>
    %302 = vector.broadcast %301 : vector<1x64xf32> to vector<64x64xf32>
    %303 = arith.addf %300, %302 : vector<64x64xf32>
    %304 = arith.addf %303, %296 : vector<64x64xf32>
    %305 = vector.shape_cast %304 : vector<64x64xf32> to vector<1x8x8x64xf32>
    %306 = arith.truncf %305 : vector<1x8x8x64xf32> to vector<1x8x8x64xbf16>
    %c0_193 = arith.constant 0 : index
    %c0_194 = arith.constant 0 : index
    %c0_195 = arith.constant 0 : index
    %c0_196 = arith.constant 0 : index
    %307 = vector.load %arg20[%c0_193, %c0_194, %c0_195, %c0_196] : memref<1x8x8x64xbf16, #tpu.memory_space<vmem>>, vector<1x8x8x64xbf16>
    tpu.vector_store %arg20[%c0_193, %c0_194, %c0_195, %c0_196], %306 {strides = array<i32>} : memref<1x8x8x64xbf16, #tpu.memory_space<vmem>>, vector<1x8x8x64xbf16>,
    return
  }
  func.func @transform_0(%arg0: i32) -> (i32, i32, i32, i32) {
    %c0_i32 = arith.constant 0 : i32
    %c0_i32_0 = arith.constant 0 : i32
    %c0_i32_1 = arith.constant 0 : i32
    %c0_i32_2 = arith.constant 0 : i32
    return %arg0, %c0_i32, %c0_i32_0, %c0_i32_1 : i32, i32, i32, i32
  }
  func.func @transform_1(%arg0: i32) -> (i32, i32, i32) {
    %c0_i32 = arith.constant 0 : i32
    %c0_i32_0 = arith.constant 0 : i32
    %c0_i32_1 = arith.constant 0 : i32
    return %arg0, %c0_i32, %c0_i32_0 : i32, i32, i32
  }
  func.func @transform_2(%arg0: i32) -> (i32, i32, i32) {
    %c0_i32 = arith.constant 0 : i32
    %c0_i32_0 = arith.constant 0 : i32
    %c0_i32_1 = arith.constant 0 : i32
    %c0_i32_2 = arith.constant 0 : i32
    return %c0_i32, %c0_i32_0, %c0_i32_1 : i32, i32, i32
  }
  func.func @transform_3(%arg0: i32) -> (i32, i32) {
    %c0_i32 = arith.constant 0 : i32
    %c0_i32_0 = arith.constant 0 : i32
    %c0_i32_1 = arith.constant 0 : i32
    return %c0_i32, %c0_i32_0 : i32, i32
  }
  func.func @transform_4(%arg0: i32) -> (i32, i32) {
    %c0_i32 = arith.constant 0 : i32
    %c0_i32_0 = arith.constant 0 : i32
    %c0_i32_1 = arith.constant 0 : i32
    return %c0_i32, %c0_i32_0 : i32, i32
  }
  func.func @transform_5(%arg0: i32) -> (i32, i32) {
    %c0_i32 = arith.constant 0 : i32
    %c0_i32_0 = arith.constant 0 : i32
    %c0_i32_1 = arith.constant 0 : i32
    return %c0_i32, %c0_i32_0 : i32, i32
  }
  func.func @transform_6(%arg0: i32) -> (i32, i32) {
    %c0_i32 = arith.constant 0 : i32
    %c0_i32_0 = arith.constant 0 : i32
    %c0_i32_1 = arith.constant 0 : i32
    return %c0_i32, %c0_i32_0 : i32, i32
  }
  func.func @transform_7(%arg0: i32) -> (i32, i32, i32) {
    %c0_i32 = arith.constant 0 : i32
    %c0_i32_0 = arith.constant 0 : i32
    %c0_i32_1 = arith.constant 0 : i32
    %c0_i32_2 = arith.constant 0 : i32
    return %c0_i32, %c0_i32_0, %c0_i32_1 : i32, i32, i32
  }
  func.func @transform_8(%arg0: i32) -> (i32, i32) {
    %c0_i32 = arith.constant 0 : i32
    %c0_i32_0 = arith.constant 0 : i32
    %c0_i32_1 = arith.constant 0 : i32
    return %c0_i32, %c0_i32_0 : i32, i32
  }
  func.func @transform_9(%arg0: i32) -> (i32, i32) {
    %c0_i32 = arith.constant 0 : i32
    %c0_i32_0 = arith.constant 0 : i32
    %c0_i32_1 = arith.constant 0 : i32
    return %c0_i32, %c0_i32_0 : i32, i32
  }
  func.func @transform_10(%arg0: i32) -> (i32, i32) {
    %c0_i32 = arith.constant 0 : i32
    %c0_i32_0 = arith.constant 0 : i32
    %c0_i32_1 = arith.constant 0 : i32
    return %c0_i32, %c0_i32_0 : i32, i32
  }
  func.func @transform_11(%arg0: i32) -> (i32, i32) {
    %c0_i32 = arith.constant 0 : i32
    %c0_i32_0 = arith.constant 0 : i32
    %c0_i32_1 = arith.constant 0 : i32
    return %c0_i32, %c0_i32_0 : i32, i32
  }
  func.func @transform_12(%arg0: i32) -> (i32, i32) {
    %c0_i32 = arith.constant 0 : i32
    %c0_i32_0 = arith.constant 0 : i32
    %c0_i32_1 = arith.constant 0 : i32
    return %c0_i32, %c0_i32_0 : i32, i32
  }
  func.func @transform_13(%arg0: i32) -> (i32, i32) {
    %c0_i32 = arith.constant 0 : i32
    %c0_i32_0 = arith.constant 0 : i32
    %c0_i32_1 = arith.constant 0 : i32
    return %c0_i32, %c0_i32_0 : i32, i32
  }
  func.func @transform_14(%arg0: i32) -> (i32, i32) {
    %c0_i32 = arith.constant 0 : i32
    %c0_i32_0 = arith.constant 0 : i32
    %c0_i32_1 = arith.constant 0 : i32
    return %c0_i32, %c0_i32_0 : i32, i32
  }
  func.func @transform_15(%arg0: i32) -> (i32, i32, i32) {
    %c0_i32 = arith.constant 0 : i32
    %c0_i32_0 = arith.constant 0 : i32
    %c0_i32_1 = arith.constant 0 : i32
    %c0_i32_2 = arith.constant 0 : i32
    return %c0_i32, %c0_i32_0, %c0_i32_1 : i32, i32, i32
  }
  func.func @transform_16(%arg0: i32) -> (i32, i32) {
    %c0_i32 = arith.constant 0 : i32
    %c0_i32_0 = arith.constant 0 : i32
    %c0_i32_1 = arith.constant 0 : i32
    return %c0_i32, %c0_i32_0 : i32, i32
  }
  func.func @transform_17(%arg0: i32) -> (i32, i32) {
    %c0_i32 = arith.constant 0 : i32
    %c0_i32_0 = arith.constant 0 : i32
    %c0_i32_1 = arith.constant 0 : i32
    return %c0_i32, %c0_i32_0 : i32, i32
  }
  func.func @transform_18(%arg0: i32) -> (i32, i32) {
    %c0_i32 = arith.constant 0 : i32
    %c0_i32_0 = arith.constant 0 : i32
    %c0_i32_1 = arith.constant 0 : i32
    return %c0_i32, %c0_i32_0 : i32, i32
  }
  func.func @transform_19(%arg0: i32) -> (i32, i32, i32, i32) {
    %c0_i32 = arith.constant 0 : i32
    %c0_i32_0 = arith.constant 0 : i32
    %c0_i32_1 = arith.constant 0 : i32
    %c0_i32_2 = arith.constant 0 : i32
    return %arg0, %c0_i32, %c0_i32_0, %c0_i32_1 : i32, i32, i32, i32
  }
}

</mosaic_0001>

<bundles_post_ra>
// kernel: tpu_custom_call.1
= control target key start
LH: loop header
LB: loop body
LE: loop exit
PB: predicated region body
PF: predicated region fallthrough
CT: control target
= control target key end

     0   :  { %s9177_s0 = inlined_call_operand.vmem [shape: bf16[2,8,8,32], index: 0, kind: input, shape index: {}]   ;;  %s9178_s1 = inlined_call_operand.hbm [shape: f32[2,1,128], index: 1, kind: input, shape index: {}]   ;;  %s9179_s2 = inlined_call_operand.vmem [shape: bf16[9,64,1], index: 2, kind: input, shape index: {}]   ;;  %s9180_s3 = inlined_call_operand.hbm [shape: f32[1,32], index: 3, kind: input, shape index: {}]   ;;  %s9181_s4 = inlined_call_operand.hbm [shape: f32[1,32], index: 4, kind: input, shape index: {}]   ;;  %s9182_s5 = inlined_call_operand.vmem [shape: f32[32,32], index: 5, kind: input, shape index: {}]   ;;  %s9183_s6 = inlined_call_operand.hbm [shape: f32[32,32], index: 6, kind: input, shape index: {}]   ;;  %s9184_s7 = inlined_call_operand.vmem [shape: bf16[9,32,64], index: 7, kind: input, shape index: {}]   ;;  %s9185_s8 = inlined_call_operand.hbm [shape: f32[1,64], index: 8, kind: input, shape index: {}]   ;;  %s9186_s9 = inlined_call_operand.vmem [shape: bf16[128,64], index: 9, kind: input, shape index: {}]   ;;  %s9187_s10 = inlined_call_operand.hbm [shape: f32[1,64], index: 10, kind: input, shape index: {}]   ;;  %s9188_s11 = inlined_call_operand.hbm [shape: f32[1,64], index: 11, kind: input, shape index: {}]   ;;  %s9189_s12 = inlined_call_operand.hbm [shape: f32[1,64], index: 12, kind: input, shape index: {}]   ;;  %s9190_s13 = inlined_call_operand.vmem [shape: f32[64,32], index: 13, kind: input, shape index: {}]   ;;  %s9191_s14 = inlined_call_operand.hbm [shape: f32[32,64], index: 14, kind: input, shape index: {}]   ;;  %s9192_s15 = inlined_call_operand.vmem [shape: bf16[9,64,64], index: 15, kind: input, shape index: {}]   ;;  %s9193_s16 = inlined_call_operand.vmem [shape: f32[1,64], index: 16, kind: input, shape index: {}]   ;;  %s9194_s17 = inlined_call_operand.vmem [shape: bf16[32,64], index: 17, kind: input, shape index: {}]   ;;  %s9195_s18 = inlined_call_operand.vmem [shape: f32[1,64], index: 18, kind: input, shape index: {}]   ;;  %s9196_s19 = inlined_call_operand.hbm [shape: bf16[2,8,8,64], index: 19, kind: output, shape index: {}]  }
   0x1   :  { %9315 = sst [smem:[#allocation84_spill]] %s9177_s0 }
   0x2   :  { %9316 = sst [smem:[#allocation85_spill]] %s9178_s1 }
   0x3   :  { %9317 = sst [smem:[#allocation86_spill]] %s9179_s2 }
   0x4   :  { %9318 = sst [smem:[#allocation87_spill]] %s9180_s3 }
   0x5   :  { %9319 = sst [smem:[#allocation88_spill]] %s9181_s4 }
   0x6   :  { %9320 = sst [smem:[#allocation89_spill]] %s9182_s5 }
   0x7   :  { %9321 = sst [smem:[#allocation90_spill]] %s9183_s6 }
   0x8   :  { %9322 = sst [smem:[#allocation91_spill]] %s9184_s7 }
   0x9   :  { %9323 = sst [smem:[#allocation92_spill]] %s9190_s13 }
   0xa   :  { %9324 = sst [smem:[#allocation93_spill]] %s9192_s15 }
   0xb   :  { %9325 = sst [smem:[#allocation94_spill]] %s9193_s16 }
   0xc   :  { %9326 = sst [smem:[#allocation95_spill]] %s9194_s17 }
   0xd   :  { %9327 = sst [smem:[#allocation96_spill]] %s9195_s18 }
   0xe   :  { %9328 = sst [smem:[#allocation97_spill]] %s9196_s19 }
   0xf   :  { %24 = vsyncpa [#allocation3], 0 }
  0x10   :  { %26 = vsyncpa [#allocation3 + $0x1], 0 }
  0x11   :  { %27 = vsyncpa [#allocation6], 0 }
  0x12   :  { %28 = vsyncpa [#allocation9], 0 }
  0x13   :  { %29 = vsyncpa [#allocation12], 0 }
  0x14   :  { %30 = vsyncpa [#allocation15], 0 }
  0x15   :  { %31 = vsyncpa [#allocation4], 0 }
  0x16   :  { %33 = vsyncpa [#allocation4 + $0x1], 0  ;;  %s6984_s0 = smov 0   ;;  %s6986_s30 = smov 0  }
  0x17   :  { %s6988_s20 = smov 0   ;;  %s6990_s21 = smov 0  }
  0x18 LB: > { %s6866_s1 = smov [#allocation5]   ;;  %s7005_s2 = sadd.s32 4294967295, %s6864_s21   ;;  %s6864_s21 = sphi %s6990_s21, %s9672_s21   ;;  %s6860_s20 = sphi %s6988_s20, %s9671_s20   ;;  %s6856_s30 = sphi %s6986_s30, %s9670_s30   ;;  %s6852_s0 = sphi %s6984_s0, %s9669_s0  }
  0x19   : > { %s495_s22 = sshll.u32 %s6866_s1, 4  ;;  %p4796_p0 = scmp.ge.s32.totalorder %s6864_s21, 1  ;;  %s7010_s22 = int_to_ptr.vmem [resolvable:$true] %s495_s22 }
  0x1a   : > { %p9207_p1 = scmp.eq.s32.totalorder %s7005_s2, 0  ;;  %p479_p2 = scmp.lt.s32.totalorder %s6864_s21, 3 }
  0x1b   : > { %s6867_s24 = smov [#allocation8]   ;;  %s6868_s26 = smov [#allocation11]  }
  0x1c   : > { %p7012_p3 = pnand %p4796_p0, %p479_p2  ;;  %s519_s25 = sshll.u32 %s6867_s24, 4  ;;  %s7019_s25 = int_to_ptr.vmem [resolvable:$true] %s519_s25 }
  0x1d   : > { %s550_s27 = sshll.u32 %s6868_s26, 4  ;;  %s9331_s1 = sld [smem:[#allocation87_spill]]  ;;  %s7027_s27 = int_to_ptr.vmem [resolvable:$true] %s550_s27 }
  0x1e   : > { %s9329_s23 = scalar_select %p7012_p3, 1, 0 }
  0x1f   : > { %p6119_p5 = pneg %p7012_p3 }
  0x21   : > { %p7023_p6 = pnand %p6119_p5, %p9207_p1 }
  0x23   : > { %s6528_s19 = scalar_lea.hbm %s9331_s1, 16  ;;  %p7037_p8 = pneg %p7023_p6 }
  0x24   : > { %p6529_p7 = scmp.ne.s32.totalorder %s9331_s1, %s6528_s19  ;;  %p6535_p11 = scmp.lt.u32.totalorder %s6528_s19, %s9331_s1 }
  0x26   : > { %p6531_p9 = pnand %p7037_p8, %p6529_p7 }
  0x28   : > { %p6532_p10 = pneg %p6531_p9 }
  0x2a   : > { %p6537_p12 = pnand %p6535_p11, %p6532_p10 }
  0x2c   : > { %6540 = shalt.err (!%p6537_p12)
}
  0x2d   : > { %s6541_s16 = scalar_lea.vmem %s7010_s22, 16  ;;  %s6548_s18 = scalar_lea.vmem %s7010_s22, 32 }
  0x2e   : > { %p6542_p13 = scmp.ne.s32.totalorder %s7010_s22, %s6541_s16  ;;  %p6549_p5 = scmp.lt.s32.totalorder %s7010_s22, %s7010_s22 }
  0x2f   : > { %p6550_p7 = scmp.lt.s32.totalorder %s6548_s18, %s6541_s16 }
  0x30   : > { %p6544_p0 = pnand %p6542_p13, %p7037_p8 }
  0x31   : > { %p6551_p9 = por %p6550_p7, %p6549_p5 }
  0x32   : > { %p6545_p2 = pneg %p6544_p0 }
  0x34   : > { %p6552_p4 = pnand %p6551_p9, %p6545_p2 }
  0x36   : > { %6555 = shalt.err (!%p6552_p4)
}
  0x37   : > { %6122 = dma.hbm_to_vmem [thread:$0]  (!%p7023_p6), %s9331_s1, 16, %s7010_s22, [#allocation6]  }
  0x38   : > { %s9333_s6 = sld [smem:[#allocation90_spill]] }
  0x3e   : > { %s6556_s26 = scalar_lea.hbm %s9333_s6, 512 }
  0x3f   : > { %p6557_p10 = scmp.ne.s32.totalorder %s9333_s6, %s6556_s26  ;;  %p6563_p4 = scmp.lt.u32.totalorder %s6556_s26, %s9333_s6 }
  0x41   : > { %p6559_p11 = pnand %p6557_p10, %p7037_p8 }
  0x43   : > { %p6560_p12 = pneg %p6559_p11 }
  0x45   : > { %p6565_p13 = pnand %p6563_p4, %p6560_p12 }
  0x47   : > { %6568 = shalt.err (!%p6565_p13)
}
  0x48   : > { %s6569_s22 = scalar_lea.vmem %s7019_s25, 512  ;;  %p6577_p7 = scmp.lt.s32.totalorder %s7019_s25, %s7019_s25 }
  0x49   : > { %p6570_p0 = scmp.ne.s32.totalorder %s7019_s25, %s6569_s22  ;;  %p6578_p9 = scmp.lt.s32.totalorder %s6569_s22, %s6569_s22 }
  0x4b   : > { %p6572_p2 = pnand %p6570_p0, %p7037_p8  ;;  %p6579_p10 = por %p6578_p9, %p6577_p7 }
  0x4d   : > { %p6573_p5 = pneg %p6572_p2 }
  0x4f   : > { %p6580_p11 = pnand %p6579_p10, %p6573_p5 }
  0x51   : > { %6583 = shalt.err (!%p6580_p11)
}
  0x52   : > { %s9205_s13 = smov 128   ;;  %s9206_s15 = smov 8  }
  0x53   : > { %6128 = dma.hbm_to_vmem [thread:$0]  (!%p7023_p6), %s9333_s6, 512, %s7019_s25, [#allocation9], %s9205_s13, %s9205_s13, %s9206_s15  }
  0x54   : > { %s6584_s26 = scalar_lea.hbm %s9187_s10, 16 }
  0x55   : > { %p6585_p12 = scmp.ne.s32.totalorder %s9187_s10, %s6584_s26  ;;  %p6591_p0 = scmp.lt.u32.totalorder %s6584_s26, %s9187_s10 }
  0x57   : > { %p6587_p4 = pnand %p6585_p12, %p7037_p8 }
  0x59   : > { %p6588_p13 = pneg %p6587_p4 }
  0x5b   : > { %p6593_p2 = pnand %p6591_p0, %p6588_p13 }
  0x5d   : > { %6596 = shalt.err (!%p6593_p2)
}
  0x5e   : > { %s6597_s25 = scalar_lea.vmem %s7027_s27, 16  ;;  %s6604_s17 = scalar_lea.vmem %s7027_s27, 32 }
  0x5f   : > { %p6598_p5 = scmp.ne.s32.totalorder %s7027_s27, %s6597_s25  ;;  %p6605_p10 = scmp.lt.s32.totalorder %s7027_s27, %s7027_s27 }
  0x60   : > { %p6606_p11 = scmp.lt.s32.totalorder %s6604_s17, %s6597_s25 }
  0x61   : > { %p6600_p7 = pnand %p6598_p5, %p7037_p8 }
  0x62   : > { %p6607_p12 = por %p6606_p11, %p6605_p10 }
  0x63   : > { %p6601_p9 = pneg %p6600_p7 }
  0x65   : > { %p6608_p4 = pnand %p6607_p12, %p6601_p9 }
  0x67   : > { %6611 = shalt.err (!%p6608_p4)
}
  0x68   : > { %6134 = dma.hbm_to_vmem [thread:$0]  (!%p7023_p6), %s9187_s10, 16, %s7027_s27, [#allocation12]  }
  0x69   : > { %s6871_s28 = smov [#allocation14]   ;;  %s6872_s26 = smov [#allocation7]  }
  0x6a   : > { %s572_s29 = sshll.u32 %s6871_s28, 4  ;;  %s506_s16 = sshll.u32 %s6872_s26, 4  ;;  %s573_s29 = int_to_ptr.vmem [resolvable:$true] %s572_s29  ;;  %s507_s16 = int_to_ptr.vmem [resolvable:$true] %s506_s16 }
  0x6b   : > { %s6612_s25 = scalar_lea.hbm %s9189_s12, 16 }
  0x6c   : > { %p6613_p13 = scmp.ne.s32.totalorder %s9189_s12, %s6612_s25  ;;  %p6619_p5 = scmp.lt.u32.totalorder %s6612_s25, %s9189_s12 }
  0x6e   : > { %p6615_p0 = pnand %p6613_p13, %p7037_p8 }
  0x70   : > { %p6616_p2 = pneg %p6615_p0 }
  0x72   : > { %p6621_p7 = pnand %p6619_p5, %p6616_p2 }
  0x74   : > { %6624 = shalt.err (!%p6621_p7)
}
  0x75   : > { %s6625_s27 = scalar_lea.vmem %s573_s29, 16  ;;  %s6632_s19 = scalar_lea.vmem %s573_s29, 32 }
  0x76   : > { %p6626_p9 = scmp.ne.s32.totalorder %s573_s29, %s6625_s27  ;;  %p6633_p12 = scmp.lt.s32.totalorder %s573_s29, %s573_s29 }
  0x77   : > { %p6634_p4 = scmp.lt.s32.totalorder %s6632_s19, %s6625_s27 }
  0x78   : > { %p6628_p10 = pnand %p6626_p9, %p7037_p8 }
  0x79   : > { %p6635_p1 = por %p6634_p4, %p6633_p12 }
  0x7a   : > { %p6629_p11 = pneg %p6628_p10 }
  0x7c   : > { %p6636_p3 = pnand %p6635_p1, %p6629_p11 }
  0x7e   : > { %6639 = shalt.err (!%p6636_p3)
}
  0x7f   : > { %6140 = dma.hbm_to_vmem [thread:$0]  (!%p7023_p6), %s9189_s12, 16, %s573_s29, [#allocation15]  }
  0x80   : > { %s9334_s4 = sld [smem:[#allocation88_spill]] }
  0x86   : > { %s6640_s18 = scalar_lea.hbm %s9334_s4, 16 }
  0x87   : > { %p6641_p13 = scmp.ne.s32.totalorder %s9334_s4, %s6640_s18  ;;  %p6647_p3 = scmp.lt.u32.totalorder %s6640_s18, %s9334_s4 }
  0x89   : > { %p6643_p0 = pnand %p6641_p13, %p7037_p8 }
  0x8b   : > { %p6644_p1 = pneg %p6643_p0 }
  0x8d   : > { %p6649_p2 = pnand %p6647_p3, %p6644_p1 }
  0x8f   : > { %6652 = shalt.err (!%p6649_p2)
}
  0x90   : > { %s6653_s27 = scalar_lea.vmem %s507_s16, 16  ;;  %s6660_s29 = scalar_lea.vmem %s507_s16, 32 }
  0x91   : > { %p6654_p5 = scmp.ne.s32.totalorder %s507_s16, %s6653_s27  ;;  %p6661_p10 = scmp.lt.s32.totalorder %s507_s16, %s507_s16 }
  0x92   : > { %p6662_p11 = scmp.lt.s32.totalorder %s6660_s29, %s6653_s27 }
  0x93   : > { %p6656_p7 = pnand %p6654_p5, %p7037_p8 }
  0x94   : > { %p6663_p12 = por %p6662_p11, %p6661_p10 }
  0x95   : > { %p6657_p9 = pneg %p6656_p7 }
  0x97   : > { %p6664_p4 = pnand %p6663_p12, %p6657_p9 }
  0x99   : > { %6667 = shalt.err (!%p6664_p4)
}
  0x9a   : > { %6125 = dma.hbm_to_vmem [thread:$0]  (!%p7023_p6), %s9334_s4, 16, %s507_s16, [#allocation6]  }
  0x9b   : > { %s6873_s28 = smov [#allocation10]   ;;  %s6874_s26 = smov [#allocation13]  }
  0x9c   : > { %s536_s15 = sshll.u32 %s6873_s28, 4  ;;  %s561_s18 = sshll.u32 %s6874_s26, 4  ;;  %s537_s15 = int_to_ptr.vmem [resolvable:$true] %s536_s15  ;;  %s562_s18 = int_to_ptr.vmem [resolvable:$true] %s561_s18 }
  0x9d   : > { %s6668_s17 = scalar_lea.hbm %s9185_s8, 16 }
  0x9e   : > { %p6669_p13 = scmp.ne.s32.totalorder %s9185_s8, %s6668_s17  ;;  %p6675_p3 = scmp.lt.u32.totalorder %s6668_s17, %s9185_s8 }
  0xa0   : > { %p6671_p0 = pnand %p6669_p13, %p7037_p8 }
  0xa2   : > { %p6672_p1 = pneg %p6671_p0 }
  0xa4   : > { %p6677_p2 = pnand %p6675_p3, %p6672_p1 }
  0xa6   : > { %6680 = shalt.err (!%p6677_p2)
}
  0xa7   : > { %s6681_s16 = scalar_lea.vmem %s537_s15, 16  ;;  %s6688_s13 = scalar_lea.vmem %s537_s15, 32 }
  0xa8   : > { %p6682_p5 = scmp.ne.s32.totalorder %s537_s15, %s6681_s16  ;;  %p6689_p10 = scmp.lt.s32.totalorder %s537_s15, %s537_s15 }
  0xa9   : > { %p6690_p11 = scmp.lt.s32.totalorder %s6688_s13, %s6681_s16 }
  0xaa   : > { %p6684_p7 = pnand %p6682_p5, %p7037_p8 }
  0xab   : > { %p6691_p12 = por %p6690_p11, %p6689_p10 }
  0xac   : > { %p6685_p9 = pneg %p6684_p7 }
  0xae   : > { %p6692_p4 = pnand %p6691_p12, %p6685_p9 }
  0xb0   : > { %6695 = shalt.err (!%p6692_p4)
}
  0xb1   : > { %6131 = dma.hbm_to_vmem [thread:$0]  (!%p7023_p6), %s9185_s8, 16, %s537_s15, [#allocation9]  }
  0xb2   : > { %s6696_s17 = scalar_lea.hbm %s9188_s11, 16 }
  0xb3   : > { %p6697_p13 = scmp.ne.s32.totalorder %s9188_s11, %s6696_s17  ;;  %p6703_p3 = scmp.lt.u32.totalorder %s6696_s17, %s9188_s11 }
  0xb5   : > { %p6699_p0 = pnand %p6697_p13, %p7037_p8 }
  0xb7   : > { %p6700_p1 = pneg %p6699_p0 }
  0xb9   : > { %p6705_p2 = pnand %p6703_p3, %p6700_p1 }
  0xbb   : > { %6708 = shalt.err (!%p6705_p2)
}
  0xbc   : > { %s6709_s16 = scalar_lea.vmem %s562_s18, 16  ;;  %s6716_s15 = scalar_lea.vmem %s562_s18, 32 }
  0xbd   : > { %p6710_p5 = scmp.ne.s32.totalorder %s562_s18, %s6709_s16  ;;  %p6717_p10 = scmp.lt.s32.totalorder %s562_s18, %s562_s18 }
  0xbe   : > { %p6718_p11 = scmp.lt.s32.totalorder %s6716_s15, %s6709_s16 }
  0xbf   : > { %p6712_p7 = pnand %p6710_p5, %p7037_p8 }
  0xc0   : > { %p6719_p12 = por %p6718_p11, %p6717_p10 }
  0xc1   : > { %p6713_p9 = pneg %p6712_p7 }
  0xc3   : > { %p6720_p4 = pnand %p6719_p12, %p6713_p9 }
  0xc5   : > { %6723 = shalt.err (!%p6720_p4)
}
  0xc6   : > { %6137 = dma.hbm_to_vmem [thread:$0]  (!%p7023_p6), %s9188_s11, 16, %s562_s18, [#allocation12]  }
  0xc7   : > { %s6875_s26 = smov [#allocation16]   ;;  %s6724_s1 = scalar_lea.hbm %s9191_s14, 512 }
  0xc8   : > { %s585_s22 = sshll.u32 %s6875_s26, 4  ;;  %p6725_p13 = scmp.ne.s32.totalorder %s9191_s14, %s6724_s1  ;;  %s586_s22 = int_to_ptr.vmem [resolvable:$true] %s585_s22 }
  0xc9   : > { %p6731_p3 = scmp.lt.u32.totalorder %s6724_s1, %s9191_s14 }
  0xca   : > { %p6727_p0 = pnand %p6725_p13, %p7037_p8 }
  0xcc   : > { %p6728_p1 = pneg %p6727_p0 }
  0xce   : > { %p6733_p2 = pnand %p6731_p3, %p6728_p1 }
  0xd0   : > { %6736 = shalt.err (!%p6733_p2)
}
  0xd1   : > { %s6737_s18 = scalar_lea.vmem %s586_s22, 512  ;;  %p6745_p10 = scmp.lt.s32.totalorder %s586_s22, %s586_s22 }
  0xd2   : > { %p6738_p5 = scmp.ne.s32.totalorder %s586_s22, %s6737_s18  ;;  %p6746_p11 = scmp.lt.s32.totalorder %s6737_s18, %s6737_s18 }
  0xd4   : > { %p6740_p7 = pnand %p6738_p5, %p7037_p8  ;;  %p6747_p12 = por %p6746_p11, %p6745_p10 }
  0xd6   : > { %p6741_p9 = pneg %p6740_p7 }
  0xd8   : > { %p6748_p4 = pnand %p6747_p12, %p6741_p9 }
  0xda   : > { %6751 = shalt.err (!%p6748_p4)
}
  0xdb   : > { %s9335_s15 = smov 8   ;;  %s9336_s13 = smov 128  }
  0xdc   : > { %6143 = dma.hbm_to_vmem [thread:$0]  (!%p7023_p6), %s9191_s14, 512, %s586_s22, [#allocation15], %s9336_s13, %s9336_s13, %s9335_s15  }
  0xdd   : > { %s4795_s3 = sadd.s32 4294967294, %s6864_s21   ;;  %s7204_s24 = sadd.s32 1, %s6864_s21  }
  0xde   : > { %s69_s25 = ssub.s32 %s6864_s21, %s7204_s24  ;;  %s72_s17 = sadd.s32 1, %s6860_s20 }
  0xdf   : > { %p70_p8 = scmp.eq.s32.totalorder %s69_s25, 0  ;;  %p79_p13 = scmp.ne.s32.totalorder %s6860_s20, %s6856_s30 }
  0xe0   : > { %p80_p0 = scmp.eq.s32.totalorder %s6864_s21, 0  ;;  %p85_p1 = scmp.ne.s32.totalorder %s6856_s30, %s6852_s0 }
  0xe1   : > { %s7215_s1 = scalar_select %p70_p8, %s6860_s20, %s72_s17  }
  0xe2   : > { %p7217_p3 = por %p80_p0, %p79_p13  ;;  %p9338_p2 = scmp.eq.s32.totalorder %s7005_s2, 0 }
  0xe3   : > { %p466_p5 = scmp.eq.s32.totalorder %s7005_s2, 1  ;;  %p472_p7 = scmp.eq.s32.totalorder %s4795_s3, 1 }
  0xe4   : > { %p7223_p6 = por %p9338_p2, %p85_p1  ;;  %p6160_p9 = scmp.lt.s32.totalorder %s6864_s21, 2 }
  0xe5   : > { %s619_s29 = sand.u32 1, %s6860_s20   ;;  %p7230_p10 = por %p466_p5, %p79_p13 }
  0xe6   : > { %p7234_p11 = por %p472_p7, %p85_p1  ;;  %s4806_s18 = sshll.u32 %s6864_s21, 4 }
  0xe7   : > { %s9340_s19 = scalar_select %p7230_p10, 1, 0 }
  0xe8   : > { %s9341_s16 = scalar_select %p7234_p11, 1, 0 }
  0xe9   : > { %s622_s15 = scalar_lea.vmem [#allocation2], %s619_s29  ;;  %s9342_s25 = sld [smem:[#allocation85_spill]] }
  0xea   : > { %s629_s13 = sshll.u32 %s622_s15, 4  ;;  %p7248_p12 = pnand %p6160_p9, %p7217_p3  ;;  %s7244_s13 = int_to_ptr.vmem [resolvable:$true] %s629_s13 }
  0xeb   : > { %s620_s4 = scalar_lea.sflag [#allocation3], %s619_s29 }
  0xec   : > { %p6754_p8 = pneg %p7248_p12 }
  0xef   : > { %s7242_s17 = scalar_lea.hbm %s9342_s25, %s4806_s18  ;;  %s6757_s26 = scalar_lea.hbm %s9342_s25, 32 }
  0xf0   : > { %s6752_s15 = scalar_lea.hbm %s7242_s17, 16  ;;  %p6758_p1 = scmp.lt.u32.totalorder %s7242_s17, %s9342_s25 }
  0xf1   : > { %p6753_p4 = scmp.ne.s32.totalorder %s7242_s17, %s6752_s15  ;;  %p6759_p3 = scmp.lt.u32.totalorder %s6757_s26, %s6752_s15 }
  0xf2   : > { %p6761_p5 = scmp.lt.u32.totalorder %s6752_s15, %s7242_s17 }
  0xf3   : > { %p6755_p13 = pnand %p6754_p8, %p6753_p4  ;;  %p6760_p2 = por %p6759_p3, %p6758_p1 }
  0xf5   : > { %p6756_p0 = pneg %p6755_p13  ;;  %p6762_p7 = por %p6761_p5, %p6760_p2 }
  0xf7   : > { %p6763_p9 = pnand %p6762_p7, %p6756_p0 }
  0xf9   : > { %6766 = shalt.err (!%p6763_p9)
}
  0xfa   : > { %s6767_s29 = scalar_lea.vmem %s7244_s13, 16  ;;  %s6876_s18 = smov [#allocation2]  }
  0xfb   : > { %p6768_p4 = scmp.ne.s32.totalorder %s7244_s13, %s6767_s29  ;;  %s6772_s28 = sshll.u32 %s6876_s18, 4  ;;  %s6773_s28 = int_to_ptr.vmem [resolvable:$false] %s6772_s28 }
  0xfc   : > { %s6774_s6 = scalar_lea.vmem %s6773_s28, 32  ;;  %p6775_p10 = scmp.lt.s32.totalorder %s7244_s13, %s6773_s28 }
  0xfd   : > { %p6770_p13 = pnand %p6768_p4, %p6754_p8  ;;  %p6776_p1 = scmp.lt.s32.totalorder %s6774_s6, %s6767_s29 }
  0xff   : > { %p6771_p11 = pneg %p6770_p13  ;;  %p6777_p3 = por %p6776_p1, %p6775_p10 }
 0x101   : > { %p6778_p2 = pnand %p6777_p3, %p6771_p11 }
 0x103   : > { %6781 = shalt.err (!%p6778_p2)
}
 0x104   : > { %6147 = dma.hbm_to_vmem [thread:$0]  (!%p7248_p12), %s7242_s17, 16, %s7244_s13, %s620_s4  }
 0x105   : > { %p9344_p0 = scmp.ne.s32.totalorder %s9329_s23, 0 }
 0x107   : > { %638 = sbr.rel (%p9344_p0) target bundleno = 2145 (0x861), region = 96 }
 0x10e   : > { %s7280_s15 = sand.u32 1, %s6856_s30  }
 0x10f   : > { %s641_s26 = scalar_lea.sflag [#allocation3], %s7280_s15 }
 0x110   : > { %6827 = dma.done.wait (%p7223_p6), %s641_s26, 16  }
 0x111   : > { %6829 = vsyncadd (%p7223_p6), %s641_s26, 4294967280  ;;  %p9345_p10 = scmp.eq.s32.totalorder %s7005_s2, 0 }
 0x113   : > { %6831 = dma.done.wait (%p9345_p10), [#allocation6], 32   ;;  %p9346_p11 = pmov %p9345_p10 }
 0x114   : > { %p9347_p12 = pmov %p9345_p10 }
 0x115   : > { %6833 = vsyncadd (%p9346_p11), [#allocation6], 4294967264 }
 0x116   : > { %6835 = dma.done.wait (%p9347_p12), [#allocation9], 528   ;;  %p9348_p8 = pmov %p9345_p10 }
 0x118   : > { %6837 = vsyncadd (%p9348_p8), [#allocation9], 4294966768  ;;  %p9349_p5 = pmov %p9348_p8 }
 0x11a   : > { %6839 = dma.done.wait (%p9349_p5), [#allocation12], 32   ;;  %p9350_p7 = pmov %p9349_p5 }
 0x11b   : > { %p9351_p6 = pmov %p9349_p5 }
 0x11c   : > { %6841 = vsyncadd (%p9350_p7), [#allocation12], 4294967264 }
 0x11d   : > { %6843 = dma.done.wait (%p9351_p6), [#allocation15], 528   ;;  %p9352_p9 = pmov %p9349_p5 }
 0x11e   : > { %p734_p4 = scmp.lt.s32.totalorder %s7005_s2, 1  ;;  %v9210_v0 = vmov 0.0|0.0   ;;  %vm6878_vm0 = vmmov 0   ;;  %v9212_v1 = vmov 0.0   ;;  %s9353_s17 = sld [smem:[#allocation84_spill]]  ;;  %vm758_vm1 = vcmask 261120  }
 0x11f   : > { %6845 = vsyncadd (%p9352_p9), [#allocation15], 4294966768  ;;  %5871 = vmatprep.subr.bf16.mxu0 %v9210_v0  ;;  %5491 = vmatprep.mubr.msk.f32.mxu0 %vm6878_vm0, %v9212_v1  ;;  %s9354_s5 = sld [smem:[#allocation89_spill]]  ;;  %v966_v28 = vld [vmem:[#allocation8] sm:$0xff]  ;;  %v967_v29 = vld [vmem:[#allocation8 + $0x8] sm:$0xff]  ;;  %s9355_s13 = sld [smem:[#allocation86_spill]] }
 0x120   : > { %s735_s4 = scalar_select %p734_p4, %s7005_s2, 1  ;;  %5889 = vmatprep.subr.bf16.mxu1 %v9210_v0  ;;  %5524 = vmatprep.mubr.msk.f32.mxu1 %vm6878_vm0, %v9212_v1  ;;  %v5884_v49 = vpack.c.bf16 %v967_v29, %v966_v28  ;;  %vm2837_vm4 = vcmask 523264   ;;  %vm4614_vm5 = vcmask 519168  }
 0x121   : > { %s9356_s7 = sld [smem:[#allocation91_spill]]  ;;  %s9512_s27 = scalar_lea.vmem [#allocation2], %s7280_s15 }
 0x122   : > { %s5133_s23 = sshll.u32 %s735_s4, 5  ;;  %5891 = vmatpush3.bf16.msra.mxu1 %v5884_v49  ;;  %s9530_s26 = sld [smem:[#allocation93_spill]] }
 0x123   : > { %5892 = vmatprep.subr.bf16.mxu1 %v9210_v0  ;;  %s9658_s4 = sld [smem:[#allocation95_spill]]  ;;  %s9662_s18 = sld [smem:[#allocation94_spill]] }
 0x124   : > { %s7315_s3 = scalar_lea.vmem %s9353_s17, %s5133_s23  ;;  %s9528_s23 = sld [smem:[#allocation92_spill]] }
 0x125   : > { %v809_v2 = vld [vmem:[%s9354_s5] sm:$0xff]  ;;  %v810_v3 = vld [vmem:[%s9354_s5 + $0x8] sm:$0xff]  ;;  %v811_v4 = vld [vmem:[%s9354_s5 + $0x10] sm:$0xff]  ;;  %s4816_s22 = sshll.u32 %s7280_s15, 5  ;;  %s5134_s17 = sshll.u32 %s7005_s2, 9 }
 0x126   : > { %v7326_v5 = vpack.c.bf16 %v810_v3, %v809_v2  ;;  %v812_v6 = vld [vmem:[%s9354_s5 + $0x18] sm:$0xff]  ;;  %v740_v7 = vld [vmem:[%s7315_s3] sm:$0xff]   ;;  %v742_v8 = vld [vmem:[%s7315_s3 + $0x8] sm:$0xff]   ;;  %s9664_s6 = sld [smem:[#allocation97_spill]]  ;;  %p9665_p1 = scmp.ne.s32.totalorder %s9340_s19, 0 }
 0x127   : > { %v744_v9 = vld [vmem:[%s7315_s3 + $0x10] sm:$0xff]   ;;  %v746_v10 = vld [vmem:[%s7315_s3 + $0x18] sm:$0xff]   ;;  %v7335_v11 = vunpack.c.l.bf16 %v740_v7  ;;  %v7337_v12 = vunpack.c.h.bf16 %v740_v7  ;;  %v7339_v13 = vunpack.c.l.bf16 %v742_v8  ;;  %v7342_v14 = vpack.c.bf16 %v812_v6, %v811_v4 }
 0x128   : > { %5873 = vmatpush3.bf16.msra.mxu0 %v7326_v5  ;;  %v7344_v15 = vunpack.c.h.bf16 %v742_v8  ;;  %v7346_v16 = vunpack.c.l.bf16 %v744_v9  ;;  %v7349_v17 = vunpack.c.h.bf16 %v744_v9  ;;  %v7357_v21 = vunpack.c.l.bf16 %v746_v10 }
 0x129   : > { %5874 = vmatprep.subr.bf16.mxu0 %v9210_v0  ;;  %v759_v18 = vsel %vm758_vm1, %v7335_v11, 0.0  ;;  %v760_v19 = vsel %vm758_vm1, %v7337_v12, 0.0  ;;  %v762_v20 = vsel %vm758_vm1, %v7339_v13, 0.0  ;;  %v7359_v22 = vunpack.c.h.bf16 %v746_v10 }
 0x12a   : > { %v761_v23 = vadd.f32 %v760_v19, %v759_v18  ;;  %v764_v24 = vsel %vm758_vm1, %v7344_v15, 0.0  ;;  %v766_v25 = vsel %vm758_vm1, %v7346_v16, 0.0  ;;  %v780_v26 = vmul.f32 %v7335_v11, %v7335_v11  ;;  %v969_v19 = vld [vmem:[#allocation8 + $0x18] sm:$0xff] }
 0x12b   : > { %v781_v27 = vmul.f32 %v7337_v12, %v7337_v12  ;;  %v782_v31 = vmul.f32 %v7339_v13, %v7339_v13  ;;  %v783_v32 = vmul.f32 %v7344_v15, %v7344_v15  ;;  %v784_v33 = vmul.f32 %v7346_v16, %v7346_v16 }
 0x12c   : > { %5876 = vmatpush3.bf16.msra.mxu0 %v7342_v14  ;;  %v763_v30 = vadd.f32 %v762_v20, %v761_v23  ;;  %v768_v34 = vsel %vm758_vm1, %v7349_v17, 0.0  ;;  %v785_v35 = vmul.f32 %v7349_v17, %v7349_v17  ;;  %v786_v36 = vmul.f32 %v7357_v21, %v7357_v21  ;;  %v5267_v23 = vld [vmem:[%s9355_s13 + $0x28] sm:$0xff]  }
 0x12d   : > { %5877 = vmatprep.subr.bf16.mxu0 %v9210_v0  ;;  %v788_v37 = vsel %vm758_vm1, %v780_v26, 0.0  ;;  %v770_v39 = vsel %vm758_vm1, %v7357_v21, 0.0  ;;  %v789_v40 = vsel %vm758_vm1, %v781_v27, 0.0  ;;  %v791_v41 = vsel %vm758_vm1, %v782_v31, 0.0 }
 0x12e   : > { %v765_v38 = vadd.f32 %v764_v24, %v763_v30  ;;  %v772_v42 = vsel %vm758_vm1, %v7359_v22, 0.0  ;;  %v790_v43 = vadd.f32 %v789_v40, %v788_v37  ;;  %v793_v44 = vsel %vm758_vm1, %v783_v32, 0.0  ;;  %v5268_v24 = vld [vmem:[%s9355_s13 + $0x30] sm:$0xff]   ;;  %v5269_v30 = vld [vmem:[%s9355_s13 + $0x38] sm:$0xff]   ;;  %v5263_v37 = vld [vmem:[%s9355_s13 + $0x8] sm:$0xff]  }
 0x12f   : > { %v795_v45 = vsel %vm758_vm1, %v784_v33, 0.0  ;;  %v797_v47 = vsel %vm758_vm1, %v785_v35, 0.0  ;;  %v799_v48 = vsel %vm758_vm1, %v786_v36, 0.0  ;;  %v787_v54 = vmul.f32 %v7359_v22, %v7359_v22  ;;  %v5136_v33 = vld [vmem:[%s9355_s13] sm:$0xff]  }
 0x130   : > { %v767_v46 = vadd.f32 %v766_v25, %v765_v38  ;;  %v792_v50 = vadd.f32 %v791_v41, %v790_v43  ;;  %v6880_v25 = vmov 0   ;;  %v5157_v28 = vunpack.c.l.bf16 %v5267_v23  ;;  %v5264_v43 = vld [vmem:[%s9355_s13 + $0x10] sm:$0xff]  }
 0x131   : > { %v801_v59 = vsel %vm758_vm1, %v787_v54, 0.0  ;;  %6218 = vset.pattern.permute.xlu0 %v6880_v25  ;;  %v5158_v29 = vunpack.c.h.bf16 %v5267_v23  ;;  %6229 = vset.pattern.permute.xlu1 %v6880_v25  ;;  %v5161_v31 = vunpack.c.l.bf16 %v5268_v24  ;;  %v5162_v32 = vunpack.c.h.bf16 %v5268_v24  ;;  %v5271_v54 = vld [vmem:[%s9355_s13 + $0x48] sm:$0xff]   ;;  %v5277_v24 = vld [vmem:[%s9355_s13 + $0x78] sm:$0xff]  }
 0x132   : > { %v769_v51 = vadd.f32 %v768_v34, %v767_v46  ;;  %v794_v52 = vadd.f32 %v793_v44, %v792_v50  ;;  %v5165_v35 = vunpack.c.l.bf16 %v5269_v30  ;;  %v5166_v36 = vunpack.c.h.bf16 %v5269_v30  ;;  %v5265_v46 = vld [vmem:[%s9355_s13 + $0x18] sm:$0xff]  }
 0x133   : > { %v6230_v38 = vpack.i.bf16 %v5162_v32, %v5161_v31  ;;  %v5137_v40 = vunpack.c.l.bf16 %v5136_v33  ;;  %v5138_v41 = vunpack.c.h.bf16 %v5136_v33  ;;  %v5141_v44 = vunpack.c.l.bf16 %v5263_v37  ;;  %v5279_v32 = vld [vmem:[%s9355_s13 + $0xa8] sm:$0xff]  }
 0x134   : > { %v771_v53 = vadd.f32 %v770_v39, %v769_v51  ;;  %v796_v55 = vadd.f32 %v795_v45, %v794_v52  ;;  %v6224_v39 = vpack.i.bf16 %v5158_v29, %v5157_v28  ;;  %v5142_v45 = vunpack.c.h.bf16 %v5263_v37  ;;  %v5270_v51 = vld [vmem:[%s9355_s13 + $0x40] sm:$0xff]   ;;  %v5280_v37 = vld [vmem:[%s9355_s13 + $0xb0] sm:$0xff]  }
 0x135   : > { %6231 = vperm.xlu1 %6229, %v6230_v38   ;;  %v5149_v52 = vunpack.c.l.bf16 %v5265_v46  ;;  %v5278_v29 = vld [vmem:[%s9355_s13 + $0xa0] sm:$0xff]   ;;  %v5197_v30 = vunpack.c.l.bf16 %v5277_v24  ;;  %v5198_v31 = vunpack.c.h.bf16 %v5277_v24  ;;  %v5205_v38 = vunpack.c.l.bf16 %v5279_v32 }
 0x136   : > { %v773_v56 = vadd.f32 %v772_v42, %v771_v53  ;;  %v798_v57 = vadd.f32 %v797_v47, %v796_v55  ;;  %v6235_v42 = vpack.i.bf16 %v5166_v36, %v5165_v35  ;;  %v6240_v47 = vpack.i.bf16 %v5138_v41, %v5137_v40  ;;  %v5281_v40 = vld [vmem:[%s9355_s13 + $0xb8] sm:$0xff]  }
 0x137   : > { %v6245_v50 = vpack.i.bf16 %v5142_v45, %v5141_v44  ;;  %v5150_v53 = vunpack.c.h.bf16 %v5265_v46  ;;  %v5202_v35 = vunpack.c.h.bf16 %v5278_v29  ;;  %v6295_v36 = vpack.i.bf16 %v5198_v31, %v5197_v30  ;;  %v5282_v45 = vld [vmem:[%s9355_s13 + $0xc0] sm:$0xff]   ;;  %v5292_v31 = vld [vmem:[%s9355_s13 + $0x110] sm:$0xff]  }
 0x138   : > { %v774_v58 = vrot.slane %v773_v56, 4  ;;  %v800_v60 = vadd.f32 %v799_v48, %v798_v57  ;;  %v5145_v48 = vunpack.c.l.bf16 %v5264_v43  ;;  %v5170_v57 = vunpack.c.h.bf16 %v5270_v51 }
 0x139   : > { %6236 = vperm.xlu1 %6229, %v6235_v42   ;;  %v5209_v42 = vunpack.c.l.bf16 %v5280_v37  ;;  %v5213_v46 = vunpack.c.l.bf16 %v5281_v40 }
 0x13a   : > { %v775_v61 = vadd.f32 %v774_v58, %v773_v56  ;;  %v802_v62 = vadd.f32 %v801_v59, %v800_v60  ;;  %v5169_v56 = vunpack.c.l.bf16 %v5270_v51  ;;  %v6255_v58 = vpack.i.bf16 %v5150_v53, %v5149_v52  ;;  %v5272_v59 = vld [vmem:[%s9355_s13 + $0x50] sm:$0xff]  }
 0x13b   : > { %v5173_v60 = vunpack.c.l.bf16 %v5271_v54  ;;  %v5218_v51 = vunpack.c.h.bf16 %v5282_v45  ;;  %v5284_v53 = vld [vmem:[%s9355_s13 + $0xd0] sm:$0xff]  }
 0x13c   : > { %v776_v63 = vrot.slane %v775_v61, 2  ;;  %v803_v2 = vrot.slane %v802_v62, 4 }
 0x13d   : > { %6246 = vperm.xlu1 %6229, %v6245_v50   ;;  %v5217_v50 = vunpack.c.l.bf16 %v5282_v45 }
 0x13e   : > { %v777_v3 = vadd.f32 %v776_v63, %v775_v61  ;;  %v804_v4 = vadd.f32 %v803_v2, %v802_v62  ;;  %v5174_v61 = vunpack.c.h.bf16 %v5271_v54  ;;  %v5273_v62 = vld [vmem:[%s9355_s13 + $0x58] sm:$0xff]   ;;  %v6260_v63 = vpack.i.bf16 %v5170_v57, %v5169_v56 }
 0x13f   : > { %v5177_v2 = vunpack.c.l.bf16 %v5272_v59  ;;  %v5285_v56 = vld [vmem:[%s9355_s13 + $0xd8] sm:$0xff]   ;;  %v6320_v57 = vpack.i.bf16 %v5218_v51, %v5217_v50 }
 0x140   : > { %v778_v6 = vrot.slane %v777_v3, 1  ;;  %v805_v7 = vrot.slane %v804_v4, 2 }
 0x141   : > { %6256 = vperm.xlu1 %6229, %v6255_v58   ;;  %v5225_v58 = vunpack.c.l.bf16 %v5284_v53 }
 0x142   : > { %v779_v8 = vadd.f32 %v778_v6, %v777_v3  ;;  %v806_v9 = vadd.f32 %v805_v7, %v804_v4  ;;  %v5178_v3 = vunpack.c.h.bf16 %v5272_v59  ;;  %v6265_v4 = vpack.i.bf16 %v5174_v61, %v5173_v60  ;;  %v5274_v6 = vld [vmem:[%s9355_s13 + $0x60] sm:$0xff]  }
 0x143   : > { %v5181_v7 = vunpack.c.l.bf16 %v5273_v62  ;;  %v5226_v59 = vunpack.c.h.bf16 %v5284_v53  ;;  %v5286_v61 = vld [vmem:[%s9355_s13 + $0xe0] sm:$0xff]   ;;  %v6380_v53 = vld [vmem:[%s9356_s7 + $0x10] sm:$0xff]  }
 0x144   : > { %5492 = vmatmul.mubr.msk.f32.vlgmr.msra.gmra.mrb[0].mxu0 %vm758_vm1, %v779_v8  ;;  %v807_v10 = vrot.slane %v806_v9, 1  ;;  %v5182_v8 = vunpack.c.h.bf16 %v5273_v62  ;;  %v5229_v62 = vunpack.c.l.bf16 %v5285_v56 }
 0x145   : > { %5879 = vmatpush3.bf16.msra.mxu0 %v7326_v5  ;;  %5502 = vmatprep.mubr.msk.f32.mxu0 %vm6878_vm0, %v9212_v1  ;;  %v968_v5 = vld [vmem:[#allocation8 + $0x10] sm:$0xff] }
 0x146   : > { %5880 = vmatprep.subr.bf16.mxu0 %v9210_v0  ;;  %v808_v18 = vadd.f32 %v807_v10, %v806_v9  ;;  %v5887_v20 = vpack.c.bf16 %v969_v19, %v968_v5  ;;  %v5275_v9 = vld [vmem:[%s9355_s13 + $0x68] sm:$0xff]   ;;  %v6270_v10 = vpack.i.bf16 %v5178_v3, %v5177_v2  ;;  %v5186_v5 = vunpack.c.h.bf16 %v5274_v6  ;;  %6266 = vperm.xlu1 %6229, %v6265_v4  }
 0x147   : > { %v6275_v19 = vpack.i.bf16 %v5182_v8, %v5181_v7  ;;  %v5190_v23 = vunpack.c.h.bf16 %v5275_v9  ;;  %v5287_v2 = vld [vmem:[%s9355_s13 + $0xe8] sm:$0xff]   ;;  %v6330_v3 = vpack.i.bf16 %v5226_v59, %v5225_v58  ;;  %v5233_v4 = vunpack.c.l.bf16 %v5286_v61  ;;  %v5288_v8 = vld [vmem:[%s9355_s13 + $0xf0] sm:$0xff]  }
 0x148   : > { %5894 = vmatpush3.bf16.msra.mxu1 %v5887_v20 }
 0x149   : > { %5882 = vmatpush3.bf16.msra.mxu0 %v7342_v14  ;;  %5907 = vmatprep.subr.bf16.mxu1 %v9210_v0  ;;  %v5266_v14 = vld [vmem:[%s9355_s13 + $0x20] sm:$0xff]  }
 0x14a   : > { %5883 = vmatprep.subr.bf16.mxu0 %v9210_v0  ;;  %v5153_v26 = vunpack.c.l.bf16 %v5266_v14  ;;  %v5154_v27 = vunpack.c.h.bf16 %v5266_v14  ;;  %v5189_v14 = vunpack.c.l.bf16 %v5275_v9  ;;  %6276 = vperm.xlu1 %6229, %v6275_v19   ;;  %v5237_v9 = vunpack.c.l.bf16 %v5287_v2 }
 0x14b   : > { %v5241_v19 = vunpack.c.l.bf16 %v5288_v8 }
 0x14c   : > { %5503 = vmatmul.mubr.msk.f32.vlgmr.msra.gmra.mrb[2].mxu0 %vm758_vm1, %v808_v18  ;;  %v6219_v34 = vpack.i.bf16 %v5154_v27, %v5153_v26  ;;  %v5185_v18 = vunpack.c.l.bf16 %v5274_v6  ;;  %v6285_v28 = vpack.i.bf16 %v5190_v23, %v5189_v14  ;;  %v5234_v6 = vunpack.c.h.bf16 %v5286_v61  ;;  %v5290_v23 = vld [vmem:[%s9355_s13 + $0x100] sm:$0xff]  }
 0x14d   : > { %5885 = vmatpush3.bf16.msra.mxu0 %v5884_v49  ;;  %5513 = vmatprep.mubr.msk.f32.mxu0 %vm6878_vm0, %v9212_v1  ;;  %v5146_v49 = vunpack.c.h.bf16 %v5264_v43  ;;  %v5210_v43 = vunpack.c.h.bf16 %v5280_v37  ;;  %v5258_v37 = vunpack.c.h.bf16 %v5292_v31 }
 0x14e   : > { %5886 = vmatprep.subr.bf16.mxu0 %v9210_v0  ;;  %6220 = vperm.xlu0 %6218, %v6219_v34   ;;  %v6280_v25 = vpack.i.bf16 %v5186_v5, %v5185_v18  ;;  %v5201_v34 = vunpack.c.l.bf16 %v5278_v29  ;;  %v5289_v18 = vld [vmem:[%s9355_s13 + $0xf8] sm:$0xff]   ;;  %v6340_v5 = vpack.i.bf16 %v5234_v6, %v5233_v4  ;;  %v5250_v29 = vunpack.c.h.bf16 %v5290_v23 }
 0x14f   : > { %v6250_v55 = vpack.i.bf16 %v5146_v49, %v5145_v48  ;;  %6286 = vperm.xlu1 %6229, %v6285_v28   ;;  %v5283_v48 = vld [vmem:[%s9355_s13 + $0xc8] sm:$0xff]   ;;  %v6310_v49 = vpack.i.bf16 %v5210_v43, %v5209_v42  ;;  %v5245_v24 = vunpack.c.l.bf16 %v5289_v18  ;;  %v5249_v28 = vunpack.c.l.bf16 %v5290_v23 }
 0x150   : > { %v6300_v41 = vpack.i.bf16 %v5202_v35, %v5201_v34  ;;  %v5221_v54 = vunpack.c.l.bf16 %v5283_v48  ;;  %v5293_v34 = vld [vmem:[%s9355_s13 + $0x118] sm:$0xff]  }
 0x151   : > { %5888 = vmatpush3.bf16.msra.mxu0 %v5887_v20  ;;  %v5276_v20 = vld [vmem:[%s9355_s13 + $0x70] sm:$0xff]   ;;  %v6360_v35 = vpack.i.bf16 %v5250_v29, %v5249_v28 }
 0x152   : > { %6225 = vperm.xlu0 %6218, %v6224_v39   ;;  %v5193_v26 = vunpack.c.l.bf16 %v5276_v20  ;;  %v5194_v27 = vunpack.c.h.bf16 %v5276_v20  ;;  %v5206_v39 = vunpack.c.h.bf16 %v5279_v32  ;;  %v5242_v20 = vunpack.c.h.bf16 %v5288_v8  ;;  %5527 = vmatprep.subr.bf16.mxu0 %v6380_v53 }
 0x153   : > { %6296 = vperm.xlu1 %6229, %v6295_v36   ;;  %v5257_v36 = vunpack.c.l.bf16 %v5292_v31 }
 0x154   : > { %v6290_v33 = vpack.i.bf16 %v5194_v27, %v5193_v26  ;;  %v6305_v44 = vpack.i.bf16 %v5206_v39, %v5205_v38  ;;  %v5291_v26 = vld [vmem:[%s9355_s13 + $0x108] sm:$0xff]   ;;  %v6350_v27 = vpack.i.bf16 %v5242_v20, %v5241_v19  ;;  %v5261_v39 = vunpack.c.l.bf16 %v5293_v34 }
 0x155   : > { %v5253_v32 = vunpack.c.l.bf16 %v5291_v26 }
 0x156   : > { %6241 = vperm.xlu0 %6218, %v6240_v47   ;;  %v5214_v47 = vunpack.c.h.bf16 %v5281_v40  ;;  %v5262_v40 = vunpack.c.h.bf16 %v5293_v34 }
 0x157   : > { %6306 = vperm.xlu1 %6229, %v6305_v44  }
 0x158   : > { %v6315_v52 = vpack.i.bf16 %v5214_v47, %v5213_v46  ;;  %v6375_v42 = vpack.i.bf16 %v5262_v40, %v5261_v39 }
 0x15a   : > { %6251 = vperm.xlu0 %6218, %v6250_v55   ;;  %v5222_v55 = vunpack.c.h.bf16 %v5283_v48 }
 0x15b   : > { %6316 = vperm.xlu1 %6229, %v6315_v52  }
 0x15c   : > { %v6325_v60 = vpack.i.bf16 %v5222_v55, %v5221_v54  ;;  %v6381_v54 = vld [vmem:[%s9356_s7 + $0x18] sm:$0xff]  }
 0x15e   : > { %6261 = vperm.xlu0 %6218, %v6260_v63   ;;  %v5230_v63 = vunpack.c.h.bf16 %v5285_v56  ;;  %v7521_v56 = vld [vmem:[%s9356_s7] sm:$0xff]  }
 0x15f   : > { %6326 = vperm.xlu1 %6229, %v6325_v60   ;;  %9358 = vst [vmem:[#allocation25_spill] sm:$0xff] %v7521_v56 }
 0x160   : > { %v6335_v7 = vpack.i.bf16 %v5230_v63, %v5229_v62 }
 0x162   : > { %6271 = vperm.xlu0 %6218, %v6270_v10   ;;  %v5238_v10 = vunpack.c.h.bf16 %v5287_v2 }
 0x163   : > { %6336 = vperm.xlu1 %6229, %v6335_v7  }
 0x164   : > { %v6345_v14 = vpack.i.bf16 %v5238_v10, %v5237_v9 }
 0x166   : > { %6281 = vperm.xlu0 %6218, %v6280_v25   ;;  %v5246_v25 = vunpack.c.h.bf16 %v5289_v18 }
 0x167   : > { %6346 = vperm.xlu1 %6229, %v6345_v14  }
 0x168   : > { %v6355_v30 = vpack.i.bf16 %v5246_v25, %v5245_v24 }
 0x16a   : > { %6291 = vperm.xlu0 %6218, %v6290_v33   ;;  %v5254_v33 = vunpack.c.h.bf16 %v5291_v26 }
 0x16b   : > { %6356 = vperm.xlu1 %6229, %v6355_v30  }
 0x16c   : > { %v6365_v38 = vpack.i.bf16 %v5254_v33, %v5253_v32 }
 0x16e   : > { %6301 = vperm.xlu0 %6218, %v6300_v41   ;;  %v6370_v41 = vpack.i.bf16 %v5258_v37, %v5257_v36 }
 0x16f   : > { %6366 = vperm.xlu1 %6229, %v6365_v38   ;;  %v4823_v38 = vld [vmem:[#allocation7] ss:$0 sm:$0xff] }
 0x172   : > { %6311 = vperm.xlu0 %6218, %v6310_v49  }
 0x173   : > { %6376 = vperm.xlu1 %6229, %v6375_v42  }
 0x176   : > { %6321 = vperm.xlu0 %6218, %v6320_v57  }
 0x17a   : > { %6331 = vperm.xlu0 %6218, %v6330_v3  }
 0x17e   : > { %6341 = vperm.xlu0 %6218, %v6340_v5   ;;  %v1116_v5 = vlaneseq }
 0x180   : > { %v7554_v20 = vshrl.u32 %v1116_v5, 7 }
 0x182   : > { %6351 = vperm.xlu0 %6218, %v6350_v27   ;;  %9374 = vst [vmem:[#allocation41_spill] sm:$0xff] %v7554_v20  ;;  %v7561_v24 = vsub.s32 0, %v7554_v20  ;;  %v756_v27 = vld [vmem:[#allocation5] sm:$0x1]  ;;  %vm1213_vm2 = vcmp.lt.s32.totalorder %v7554_v20, 1  ;;  %vm1554_vm3 = vcmp.lt.s32.totalorder %v7554_v20, 7 }
 0x184   : > { %9377 = vst [vmem:[#allocation44_spill] sm:$0xff] %v7561_v24 }
 0x186   : > { %6361 = vperm.xlu0 %6218, %v6360_v35  }
 0x18a   : > { %6371 = vperm.xlu0 %6218, %v6370_v41  }
 0x1b4   : > { %v7523_v57 = vpop.permute.xlu1 %6231 }
 0x1b5   : > { %9359 = vst [vmem:[#allocation26_spill] sm:$0xff] %v7523_v57 }
 0x1b8   : > { %v7528_v59 = vpop.permute.xlu1 %6236 }
 0x1b9   : > { %9361 = vst [vmem:[#allocation28_spill] sm:$0xff] %v7528_v59 }
 0x1bc   : > { %v7532_v61 = vpop.permute.xlu1 %6246 }
 0x1bd   : > { %9363 = vst [vmem:[#allocation30_spill] sm:$0xff] %v7532_v61 }
 0x1c0   : > { %v7536_v63 = vpop.permute.xlu1 %6256  ;;  %v9478_v20 = vld [vmem:[#allocation28_spill] sm:$0xff] }
 0x1c1   : > { %9365 = vst [vmem:[#allocation32_spill] sm:$0xff] %v7536_v63 }
 0x1c5   : > { %v7540_v3 = vpop.permute.xlu1 %6266 }
 0x1c6   : > { %9367 = vst [vmem:[#allocation34_spill] sm:$0xff] %v7540_v3 }
 0x1c9   : > { %v7544_v6 = vpop.permute.xlu1 %6276 }
 0x1ca   : > { %9369 = vst [vmem:[#allocation36_spill] sm:$0xff] %v7544_v6 }
 0x1cd   : > { %v7516_v55 = vpop.permute.xlu0 %6220 }
 0x1ce   : > { %9357 = vst [vmem:[#allocation24_spill] sm:$0xff] %v7516_v55  ;;  %v7548_v10 = vpop.permute.xlu1 %6286 }
 0x1cf   : > { %9371 = vst [vmem:[#allocation38_spill] sm:$0xff] %v7548_v10 }
 0x1d1   : > { %v7526_v58 = vpop.permute.xlu0 %6225 }
 0x1d2   : > { %9360 = vst [vmem:[#allocation27_spill] sm:$0xff] %v7526_v58  ;;  %v7552_v19 = vpop.permute.xlu1 %6296 }
 0x1d3   : > { %9373 = vst [vmem:[#allocation40_spill] sm:$0xff] %v7552_v19 }
 0x1d5   : > { %v7530_v60 = vpop.permute.xlu0 %6241 }
 0x1d6   : > { %9362 = vst [vmem:[#allocation29_spill] sm:$0xff] %v7530_v60  ;;  %v7558_v23 = vpop.permute.xlu1 %6306 }
 0x1d7   : > { %9376 = vst [vmem:[#allocation43_spill] sm:$0xff] %v7558_v23 }
 0x1d9   : > { %v7534_v62 = vpop.permute.xlu0 %6251 }
 0x1da   : > { %9364 = vst [vmem:[#allocation31_spill] sm:$0xff] %v7534_v62  ;;  %v7566_v28 = vpop.permute.xlu1 %6316 }
 0x1db   : > { %9379 = vst [vmem:[#allocation46_spill] sm:$0xff] %v7566_v28 }
 0x1dd   : > { %v7538_v2 = vpop.permute.xlu0 %6261 }
 0x1de   : > { %9366 = vst [vmem:[#allocation33_spill] sm:$0xff] %v7538_v2 }
 0x1e1   : > { %v7542_v4 = vpop.permute.xlu0 %6271 }
 0x1e2   : > { %9368 = vst [vmem:[#allocation35_spill] sm:$0xff] %v7542_v4 }
 0x1e5   : > { %v7546_v9 = vpop.permute.xlu0 %6281 }
 0x1e6   : > { %9370 = vst [vmem:[#allocation37_spill] sm:$0xff] %v7546_v9 }
 0x1e9   : > { %v7550_v18 = vpop.permute.xlu0 %6291 }
 0x1ea   : > { %9372 = vst [vmem:[#allocation39_spill] sm:$0xff] %v7550_v18 }
 0x1ed   : > { %v7556_v14 = vpop.permute.xlu0 %6301 }
 0x1ee   : > { %9375 = vst [vmem:[#allocation42_spill] sm:$0xff] %v7556_v14 }
 0x1f1   : > { %v7563_v25 = vpop.permute.xlu0 %6311 }
 0x1f2   : > { %9378 = vst [vmem:[#allocation45_spill] sm:$0xff] %v7563_v25 }
 0x1f5   : > { %v7569_v33 = vpop.permute.xlu0 %6321 }
 0x1f6   : > { %9380 = vst [vmem:[#allocation47_spill] sm:$0xff] %v7569_v33 }
 0x217   : > { %v882_v43 = vpop.f32.mrb[0].mxu0 }
 0x218   : > { %v887_v44 = vmul.f32 0.015625, %v882_v43  ;;  %v5493_v45 = vpop.f32.mrb[1].mxu0 }
 0x21a   : > { %5514 = vmatmul.mubr.msk.f32.vlgmr.msra.gmra.mrb[4].mxu0 %vm758_vm1, %v887_v44  ;;  %v962_v47 = vmul.f32 %v887_v44, %v887_v44 }
 0x21b   : > { %5528 = vmatpush3.bf16.msra.mxu0 %v6380_v53 }
 0x21c   : > { %5529 = vmatprep.subr.bf16.mxu0 %v6381_v54 }
 0x21f   : > { %v957_v46 = vpop.f32.mrb[2].mxu0  ;;  %5530 = vmatpush3.bf16.msra.mxu0 %v6381_v54 }
 0x220   : > { %v961_v48 = vmul.f32 0.015625, %v957_v46  ;;  %v5504_v49 = vpop.f32.mrb[3].mxu0  ;;  %5539 = vmatprep.subr.bf16.mxu0 %v7521_v56  ;;  %v7579_v46 = vpop.permute.xlu1 %6326 }
 0x221   : > { %9381 = vst [vmem:[#allocation48_spill] sm:$0xff] %v7579_v46 }
 0x222   : > { %v963_v50 = vsub.f32 %v961_v48, %v962_v47 }
 0x224   : > { %v964_v51 = vadd.f32 1e-06, %v963_v50 }
 0x226   : > { %6452 = vrsqrt.f32 %v964_v51 }
 0x230   : > { %v6453_v52 = vpop.eup %6452 }
 0x231   : > { %5525 = vmatmul.mubr.msk.f32.vlgmr.msra.gmra.mrb[0].mxu1 %vm758_vm1, %v6453_v52  ;;  %v7597_v52 = vpop.permute.xlu0 %6331 }
 0x232   : > { %5690 = vmatprep.mubr.msk.f32.mxu1 %vm6878_vm0, %v9212_v1  ;;  %9382 = vst [vmem:[#allocation49_spill] sm:$0xff] %v7597_v52 }
 0x2ed   : > { %v1039_v7 = vpop.f32.mrb[4].mxu0 }
 0x2ee   : > { %v5515_v8 = vpop.f32.mrb[5].mxu0  ;;  %v1119_v26 = vrot.slane %v1039_v7, %v7561_v24 }
 0x2f0   : > { %v1123_v32 = vsub.f32 %v7344_v15, %v1119_v26  ;;  %v1124_v35 = vsub.f32 %v7346_v16, %v1119_v26  ;;  %v1125_v36 = vsub.f32 %v7349_v17, %v1119_v26  ;;  %v1121_v37 = vsub.f32 %v7337_v12, %v1119_v26 }
 0x2f1   : > { %v1122_v39 = vsub.f32 %v7339_v13, %v1119_v26  ;;  %v1120_v40 = vsub.f32 %v7335_v11, %v1119_v26  ;;  %v1126_v41 = vsub.f32 %v7357_v21, %v1119_v26  ;;  %v1127_v42 = vsub.f32 %v7359_v22, %v1119_v26 }
 0x304   : > { %v1112_v29 = vpop.f32.mrb[0].mxu1 }
 0x305   : > { %v1128_v30 = vmul.f32 %v1112_v29, %v756_v27  ;;  %v5526_v31 = vpop.f32.mrb[1].mxu1 }
 0x307   : > { %v1132_v34 = vrot.slane %v1128_v30, %v7561_v24  ;;  %v9399_v24 = vunpack.i.h.bf16 %v7550_v18 }
 0x309   : > { %v1136_v15 = vmul.f32 %v1132_v34, %v1123_v32  ;;  %v1137_v43 = vmul.f32 %v1132_v34, %v1124_v35  ;;  %v1138_v44 = vmul.f32 %v1132_v34, %v1125_v36  ;;  %v1134_v45 = vmul.f32 %v1132_v34, %v1121_v37  ;;  %v7606_v32 = vpop.permute.xlu1 %6336 }
 0x30a   : > { %v1135_v16 = vmul.f32 %v1132_v34, %v1122_v39  ;;  %v1133_v47 = vmul.f32 %v1132_v34, %v1120_v40  ;;  %v1139_v17 = vmul.f32 %v1132_v34, %v1126_v41  ;;  %v1140_v48 = vmul.f32 %v1132_v34, %v1127_v42  ;;  %9383 = vst [vmem:[#allocation50_spill] sm:$0xff] %v7606_v32 }
 0x30b   : > { %v7581_v12 = vadd.f32 %v4823_v38, %v1136_v15  ;;  %v7583_v49 = vadd.f32 %v4823_v38, %v1137_v43  ;;  %v7585_v13 = vadd.f32 %v4823_v38, %v1138_v44  ;;  %v7587_v11 = vadd.f32 %v4823_v38, %v1134_v45 }
 0x30c   : > { %v7589_v21 = vadd.f32 %v4823_v38, %v1135_v16  ;;  %v7591_v22 = vadd.f32 %v4823_v38, %v1133_v47  ;;  %v7593_v50 = vadd.f32 %v4823_v38, %v1139_v17  ;;  %v7595_v51 = vadd.f32 %v4823_v38, %v1140_v48  ;;  %v7609_v38 = vpop.permute.xlu0 %6341 }
 0x30d   : > { %v1158_v53 = vsub.f32 0.0, %v7581_v12  ;;  %v1159_v54 = vsub.f32 0.0, %v7583_v49  ;;  %v1160_v7 = vsub.f32 0.0, %v7585_v13  ;;  %v1156_v8 = vsub.f32 0.0, %v7587_v11  ;;  %9384 = vst [vmem:[#allocation51_spill] sm:$0xff] %v7609_v38  ;;  %v7612_v42 = vpop.permute.xlu1 %6346 }
 0x30e   : > { %v1157_v5 = vsub.f32 0.0, %v7589_v21  ;;  %v1155_v26 = vsub.f32 0.0, %v7591_v22  ;;  %v1161_v27 = vsub.f32 0.0, %v7593_v50  ;;  %v1162_v35 = vsub.f32 0.0, %v7595_v51  ;;  %9385 = vst [vmem:[#allocation52_spill] sm:$0xff] %v7612_v42 }
 0x30f   : > { %v1169_v29 = vmul.f32 1.442695, %v1158_v53  ;;  %v1171_v30 = vmul.f32 1.442695, %v1159_v54  ;;  %v1173_v31 = vmul.f32 1.442695, %v1160_v7  ;;  %v9222_v7 = vunpack.i.h.bf16 %v7534_v62 }
 0x310   : > { %v1165_v34 = vmul.f32 1.442695, %v1156_v8  ;;  %v1167_v36 = vmul.f32 1.442695, %v1157_v5  ;;  %v1163_v37 = vmul.f32 1.442695, %v1155_v26  ;;  %v7623_v54 = vpop.permute.xlu0 %6351  ;;  %v9223_v41 = vunpack.i.l.bf16 %v7550_v18 }
 0x311   : > { %6454 = vpow2.f32 %v1169_v29  ;;  %v1175_v39 = vmul.f32 1.442695, %v1161_v27  ;;  %v1177_v40 = vmul.f32 1.442695, %v1162_v35  ;;  %9386 = vst [vmem:[#allocation53_spill] sm:$0xff] %v7623_v54  ;;  %v9401_v18 = vunpack.i.h.bf16 %v7532_v61 }
 0x312   : > { %6456 = vpow2.f32 %v1171_v30  ;;  %v9214_v30 = vunpack.i.l.bf16 %v7612_v42 }
 0x313   : > { %6458 = vpow2.f32 %v1173_v31 }
 0x314   : > { %6460 = vpow2.f32 %v1165_v34 }
 0x315   : > { %6462 = vpow2.f32 %v1167_v36  ;;  %v7647_v36 = vpop.permute.xlu0 %6361 }
 0x316   : > { %6464 = vpow2.f32 %v1163_v37  ;;  %9388 = vst [vmem:[#allocation55_spill] sm:$0xff] %v7647_v36 }
 0x317   : > { %6466 = vpow2.f32 %v1175_v39 }
 0x318   : > { %6468 = vpow2.f32 %v1177_v40  ;;  %v7637_v40 = vpop.permute.xlu1 %6356 }
 0x319   : > { %9387 = vst [vmem:[#allocation54_spill] sm:$0xff] %v7637_v40 }
 0x31b   : > { %v6455_v34 = vpop.eup %6454 }
 0x31c   : > { %v6457_v0 = vpop.eup %6456  ;;  %v1182_v45 = vadd.f32 1.0, %v6455_v34 }
 0x31d   : > { %v6459_v16 = vpop.eup %6458  ;;  %v1183_v15 = vadd.f32 1.0, %v6457_v0  ;;  %v9216_v0 = vunpack.i.l.bf16 %v7623_v54 }
 0x31e   : > { %v6461_v47 = vpop.eup %6460  ;;  %v1184_v29 = vadd.f32 1.0, %v6459_v16  ;;  %6470 = vrcp.f32 %v1182_v45 }
 0x31f   : > { %v6463_v48 = vpop.eup %6462  ;;  %6472 = vrcp.f32 %v1183_v15  ;;  %v1180_v37 = vadd.f32 1.0, %v6461_v47  ;;  %v7655_v15 = vpop.permute.xlu1 %6366 }
 0x320   : > { %v6465_v43 = vpop.eup %6464  ;;  %6474 = vrcp.f32 %v1184_v29  ;;  %v1181_v17 = vadd.f32 1.0, %v6463_v48  ;;  %9389 = vst [vmem:[#allocation56_spill] sm:$0xff] %v7655_v15 }
 0x321   : > { %v6467_v16 = vpop.eup %6466  ;;  %6476 = vrcp.f32 %v1180_v37  ;;  %v1179_v35 = vadd.f32 1.0, %v6465_v43 }
 0x322   : > { %v6469_v1 = vpop.eup %6468  ;;  %6478 = vrcp.f32 %v1181_v17  ;;  %v1185_v39 = vadd.f32 1.0, %v6467_v16  ;;  %v7665_v16 = vpop.permute.xlu0 %6371 }
 0x323   : > { %6480 = vrcp.f32 %v1179_v35  ;;  %v1186_v29 = vadd.f32 1.0, %v6469_v1  ;;  %9390 = vst [vmem:[#allocation57_spill] sm:$0xff] %v7665_v16  ;;  %v7678_v43 = vpop.permute.xlu1 %6376 }
 0x324   : > { %6482 = vrcp.f32 %v1185_v39  ;;  %9391 = vst [vmem:[#allocation58_spill] sm:$0xff] %v7678_v43  ;;  %v9215_v39 = vunpack.i.h.bf16 %v7612_v42 }
 0x325   : > { %6484 = vrcp.f32 %v1186_v29 }
 0x328   : > { %v6471_v47 = vpop.eup %6470 }
 0x329   : > { %v6473_v45 = vpop.eup %6472  ;;  %v7686_v17 = vmul.f32 %v6471_v47, %v7581_v12 }
 0x32a   : > { %v6475_v27 = vpop.eup %6474  ;;  %v7692_v34 = vmul.f32 %v6473_v45, %v7583_v49 }
 0x32b   : > { %9392 = vst [vmem:[#allocation59_spill] sm:$0xff] %v7686_v17  ;;  %v6477_v53 = vpop.eup %6476  ;;  %v7698_v12 = vmul.f32 %v6475_v27, %v7585_v13  ;;  %v1206_v47 = vrot.slane %v7686_v17, 7  ;;  %v1549_v29 = vrot.slane %v7686_v17, 1  ;;  %v7705_v26 = vmul.f32 %v9214_v30, %v7686_v17 }
 0x32c   : > { %9393 = vst [vmem:[#allocation60_spill] sm:$0xff] %v7692_v34  ;;  %v6479_v49 = vpop.eup %6478  ;;  %v1207_v45 = vrot.slane %v7692_v34, 7  ;;  %v7709_v35 = vmul.f32 %v6477_v53, %v7587_v11  ;;  %v1550_v37 = vrot.slane %v7692_v34, 1  ;;  %v7715_v13 = vmul.f32 %v9215_v39, %v7692_v34 }
 0x32d   : > { %9394 = vst [vmem:[#allocation61_spill] sm:$0xff] %v7698_v12  ;;  %v6481_v27 = vpop.eup %6480  ;;  %v1208_v1 = vrot.slane %v7698_v12, 7  ;;  %v7719_v48 = vmul.f32 %v6479_v49, %v7589_v21  ;;  %v1551_v30 = vrot.slane %v7698_v12, 1  ;;  %v7725_v11 = vmul.f32 %v9216_v0, %v7698_v12 }
 0x32e   : > { %v6483_v53 = vpop.eup %6482  ;;  %v7729_v8 = vsel %vm1213_vm2, %v1206_v47, %v1207_v45  ;;  %v1204_v39 = vrot.slane %v7709_v35, 7  ;;  %v7733_v5 = vmul.f32 %v6481_v27, %v7591_v22  ;;  %v1547_v21 = vrot.slane %v7709_v35, 1 }
 0x32f   : > { %v6485_v49 = vpop.eup %6484  ;;  %v1216_v44 = vsel %vm1213_vm2, %v1207_v45, %v1208_v1  ;;  %v7741_v0 = vmul.f32 %v9222_v7, %v7729_v8  ;;  %v7746_v31 = vmul.f32 %v9223_v41, %v7729_v8  ;;  %v1205_v42 = vrot.slane %v7719_v48, 7 }
 0x330   : > { %v9397_v22 = vunpack.i.l.bf16 %v7536_v63  ;;  %v7755_v56 = vmul.f32 %v9399_v24, %v1216_v44  ;;  %v1546_v45 = vrot.slane %v7733_v5, 1  ;;  %v1548_v7 = vrot.slane %v7719_v48, 1 }
 0x331   : > { %9395 = vst [vmem:[#allocation62_spill] sm:$0xff] %v7741_v0  ;;  %9396 = vst [vmem:[#allocation63_spill] sm:$0xff] %v7746_v31  ;;  %v1218_v0 = vsel %vm1213_vm2, %v1205_v42, %v1206_v47  ;;  %v1219_v41 = vsel %vm1213_vm2, %v1204_v39, %v1205_v42  ;;  %v7764_v59 = vmul.f32 %v6483_v53, %v7593_v50  ;;  %v9402_v12 = vunpack.i.l.bf16 %v7534_v62 }
 0x332   : > { %v7751_v27 = vmul.f32 %v9397_v22, %v1216_v44  ;;  %9400 = vst [vmem:[#allocation65_spill] sm:$0xff] %v7755_v56  ;;  %v7767_v22 = vmul.f32 %v6485_v49, %v7595_v51  ;;  %v9404_v47 = vunpack.i.l.bf16 %v7548_v10  ;;  %v9406_v50 = vunpack.i.h.bf16 %v7548_v10 }
 0x333   : > { %v7777_v34 = vmul.f32 %v9402_v12, %v1218_v0  ;;  %v7789_v51 = vsel %vm1554_vm3, %v1547_v21, %v1548_v7  ;;  %v1209_v49 = vrot.slane %v7764_v59, 7  ;;  %v9408_v12 = vunpack.i.h.bf16 %v7538_v2 }
 0x334   : > { %9398 = vst [vmem:[#allocation64_spill] sm:$0xff] %v7751_v27  ;;  %v7773_v27 = vmul.f32 %v9401_v18, %v1219_v41  ;;  %v7781_v42 = vmul.f32 %v9404_v47, %v1219_v41  ;;  %v7785_v53 = vmul.f32 %v9406_v50, %v1218_v0  ;;  %v7793_v18 = vsel %vm1554_vm3, %v1546_v45, %v1547_v21 }
 0x335   : > { %9403 = vst [vmem:[#allocation66_spill] sm:$0xff] %v7777_v34  ;;  %v7799_v24 = vmul.f32 %v9408_v12, %v7793_v18  ;;  %v9410_v47 = vunpack.i.l.bf16 %v7540_v3  ;;  %v9411_v62 = vunpack.i.l.bf16 %v7556_v14  ;;  %v9413_v21 = vunpack.i.h.bf16 %v7556_v14 }
 0x336   : > { %9405 = vst [vmem:[#allocation67_spill] sm:$0xff] %v7781_v42  ;;  %9407 = vst [vmem:[#allocation68_spill] sm:$0xff] %v7785_v53  ;;  %v1210_v12 = vrot.slane %v7767_v22, 7  ;;  %v1557_v56 = vsel %vm1554_vm3, %v1550_v37, %v1551_v30  ;;  %v9418_v53 = vunpack.i.h.bf16 %v7542_v4 }
 0x337   : > { %9409 = vst [vmem:[#allocation69_spill] sm:$0xff] %v7799_v24  ;;  %v7804_v50 = vmul.f32 %v9410_v47, %v7789_v51  ;;  %v7809_v10 = vmul.f32 %v9411_v62, %v7793_v18  ;;  %v7814_v31 = vmul.f32 %v9413_v21, %v7789_v51  ;;  %v1215_v24 = vsel %vm1213_vm2, %v1208_v1, %v1209_v49 }
 0x338   : > { %v1552_v47 = vrot.slane %v7764_v59, 1  ;;  %v9415_v62 = vunpack.i.h.bf16 %v7536_v63  ;;  %v9417_v21 = vunpack.i.l.bf16 %v7552_v19  ;;  %v1214_v42 = vsel %vm1213_vm2, %v1209_v49, %v1210_v12 }
 0x339   : > { %9412 = vst [vmem:[#allocation70_spill] sm:$0xff] %v7809_v10  ;;  %9414 = vst [vmem:[#allocation71_spill] sm:$0xff] %v7814_v31  ;;  %v7840_v34 = vmul.f32 %v9418_v53, %v1557_v56  ;;  %v9424_v31 = vunpack.i.h.bf16 %v7552_v19  ;;  %v9425_v49 = vunpack.i.l.bf16 %v7544_v6  ;;  %v9429_v19 = vunpack.i.h.bf16 %v7569_v33 }
 0x33a   : > { %v7826_v57 = vmul.f32 %v9415_v62, %v1215_v24  ;;  %v7830_v14 = vmul.f32 %v9417_v21, %v1215_v24  ;;  %v1556_v1 = vsel %vm1554_vm3, %v1551_v30, %v1552_v47  ;;  %v9420_v62 = vunpack.i.l.bf16 %v7563_v25 }
 0x33b   : > { %9419 = vst [vmem:[#allocation73_spill] sm:$0xff] %v7840_v34  ;;  %v9422_v21 = vunpack.i.l.bf16 %v7530_v60  ;;  %v7856_v17 = vmul.f32 %v9425_v49, %v1556_v1  ;;  %v9427_v30 = vunpack.i.h.bf16 %v7563_v25  ;;  %v1559_v34 = vsel %vm1554_vm3, %v1548_v7, %v1549_v29 }
 0x33c   : > { %9416 = vst [vmem:[#allocation72_spill] sm:$0xff] %v7826_v57  ;;  %v7844_v63 = vmul.f32 %v9420_v62, %v1557_v56  ;;  %v7852_v57 = vmul.f32 %v9424_v31, %v1214_v42  ;;  %v1558_v62 = vsel %vm1554_vm3, %v1549_v29, %v1550_v37  ;;  %v7869_v31 = vmul.f32 %v9429_v19, %v1219_v41 }
 0x33d   : > { %v7848_v10 = vmul.f32 %v9422_v21, %v1214_v42  ;;  %9426 = vst [vmem:[#allocation76_spill] sm:$0xff] %v7856_v17  ;;  %v7860_v53 = vmul.f32 %v9427_v30, %v1556_v1  ;;  %v1203_v21 = vrot.slane %v7733_v5, 7  ;;  %v9430_v30 = vunpack.i.h.bf16 %v7540_v3 }
 0x33e   : > { %9421 = vst [vmem:[#allocation74_spill] sm:$0xff] %v7844_v63  ;;  %v9431_v37 = vunpack.i.l.bf16 %v7542_v4  ;;  %v9432_v7 = vunpack.i.l.bf16 %v7558_v23  ;;  %v9433_v19 = vunpack.i.h.bf16 %v7558_v23  ;;  %v1553_v25 = vrot.slane %v7767_v22, 1 }
 0x33f   : > { %9423 = vst [vmem:[#allocation75_spill] sm:$0xff] %v7848_v10  ;;  %9428 = vst [vmem:[#allocation77_spill] sm:$0xff] %v7860_v53  ;;  %v7877_v17 = vmul.f32 %v9430_v30, %v1559_v34  ;;  %v1220_v49 = vsel %vm1213_vm2, %v1203_v21, %v1204_v39  ;;  %v9434_v4 = vunpack.i.l.bf16 %v7532_v61  ;;  %v9435_v3 = vunpack.i.h.bf16 %v7546_v9 }
 0x340   : > { %v7881_v10 = vmul.f32 %v9431_v37, %v1558_v62  ;;  %v7885_v29 = vmul.f32 %v9432_v7, %v1559_v34  ;;  %v7889_v41 = vmul.f32 %v9433_v19, %v1558_v62  ;;  %v9436_v23 = vunpack.i.l.bf16 %v7569_v33 }
 0x341   : > { %v7898_v37 = vmul.f32 %v9434_v4, %v1220_v49  ;;  %v7902_v7 = vmul.f32 %v9435_v3, %v1220_v49  ;;  %v1555_v63 = vsel %vm1554_vm3, %v1552_v47, %v1553_v25  ;;  %v1562_v30 = vsel %vm1554_vm3, %v1553_v25, %v1546_v45 }
 0x342   : > { %v7906_v19 = vmul.f32 %v9436_v23, %v1220_v49  ;;  %v9437_v4 = vunpack.i.l.bf16 %v7597_v52  ;;  %v9438_v49 = vunpack.i.l.bf16 %v7538_v2  ;;  %v9439_v39 = vunpack.i.h.bf16 %v7544_v6 }
 0x343   : > { %v9440_v25 = vunpack.i.l.bf16 %v7566_v28  ;;  %v9442_v3 = vunpack.i.h.bf16 %v7597_v52  ;;  %v9443_v23 = vunpack.i.l.bf16 %v7579_v46 }
 0x344   : > { %v7916_v61 = vmul.f32 %v9437_v4, %v1216_v44  ;;  %v7924_v33 = vmul.f32 %v9438_v49, %v1562_v30  ;;  %v7928_v47 = vmul.f32 %v9439_v39, %v1555_v63  ;;  %v9441_v44 = vunpack.i.h.bf16 %v7566_v28 }
 0x345   : > { %v7932_v45 = vmul.f32 %v9440_v25, %v1555_v63  ;;  %v7940_v53 = vmul.f32 %v9442_v3, %v1215_v24  ;;  %v7944_v49 = vmul.f32 %v9443_v23, %v1218_v0  ;;  %v9444_v39 = vunpack.i.h.bf16 %v7579_v46 }
 0x346   : > { %v7936_v4 = vmul.f32 %v9441_v44, %v1562_v30  ;;  %v9445_v25 = vunpack.i.l.bf16 %v7609_v38  ;;  %v9446_v44 = vunpack.i.h.bf16 %v7609_v38  ;;  %v1221_v24 = vsel %vm1213_vm2, %v1210_v12, %v1203_v21 }
 0x347   : > { %v7949_v6 = vmul.f32 %v9444_v39, %v7729_v8  ;;  %v9447_v3 = vunpack.i.h.bf16 %v7530_v60  ;;  %v9448_v39 = vunpack.i.l.bf16 %v7546_v9  ;;  %v9449_v12 = vunpack.i.l.bf16 %v7606_v32 }
 0x348   : > { %v7954_v2 = vmul.f32 %v9445_v25, %v7709_v35  ;;  %v7959_v52 = vmul.f32 %v9446_v44, %v7719_v48  ;;  %v9450_v0 = vunpack.i.h.bf16 %v7606_v32  ;;  %v9452_v44 = vunpack.i.l.bf16 %v7647_v36 }
 0x349   : > { %v1279_v23 = vmul.f32 %v9447_v3, %v1221_v24  ;;  %v7971_v25 = vmul.f32 %v9448_v39, %v1221_v24  ;;  %v7979_v21 = vmul.f32 %v9449_v12, %v1214_v42  ;;  %v9451_v3 = vunpack.i.h.bf16 %v7623_v54 }
 0x34a   : > { %v7983_v8 = vmul.f32 %v9450_v0, %v1221_v24  ;;  %v7995_v38 = vmul.f32 %v9452_v44, %v7789_v51  ;;  %v9453_v42 = vunpack.i.h.bf16 %v7647_v36  ;;  %v9454_v0 = vunpack.i.l.bf16 %v7637_v40 }
 0x34b   : > { %v7988_v28 = vmul.f32 %v9451_v3, %v7764_v59  ;;  %v9455_v39 = vunpack.i.h.bf16 %v7637_v40  ;;  %v9456_v51 = vunpack.i.l.bf16 %v7665_v16  ;;  %v9458_v24 = vunpack.i.h.bf16 %v7665_v16 }
 0x34c   : > { %v7999_v12 = vmul.f32 %v9453_v42, %v1559_v34  ;;  %v8006_v3 = vmul.f32 %v9454_v0, %v7767_v22  ;;  %v9460_v0 = vunpack.i.l.bf16 %v7655_v15  ;;  %v9464_v34 = vunpack.i.l.bf16 %v7678_v43 }
 0x34d   : > { %v8011_v54 = vmul.f32 %v9455_v39, %v7733_v5  ;;  %v8015_v44 = vmul.f32 %v9456_v51, %v1556_v1  ;;  %v8023_v36 = vmul.f32 %v9458_v24, %v1555_v63  ;;  %v9462_v1 = vunpack.i.h.bf16 %v7655_v15 }
 0x34e   : > { %v8027_v32 = vmul.f32 %v9460_v0, %v1558_v62  ;;  %v8037_v40 = vmul.f32 %v9464_v34, %v1562_v30  ;;  %v9466_v42 = vunpack.i.h.bf16 %v7678_v43  ;;  %v9468_v24 = vunpack.i.l.bf16 %v7516_v55  ;;  %v9472_v43 = vld [vmem:[#allocation59_spill] sm:$0xff] }
 0x34f   : > { %9457 = vst [vmem:[#allocation78_spill] sm:$0xff] %v8015_v44  ;;  %9459 = vst [vmem:[#allocation79_spill] sm:$0xff] %v8023_v36  ;;  %v8033_v51 = vmul.f32 %v9462_v1, %v1557_v56  ;;  %v9469_v56 = vunpack.i.h.bf16 %v7516_v55  ;;  %v9470_v30 = vunpack.i.l.bf16 %v7526_v58  ;;  %v9479_v55 = vunpack.i.l.bf16 %v9478_v20 }
 0x350   : > { %9461 = vst [vmem:[#allocation80_spill] sm:$0xff] %v8027_v32  ;;  %9465 = vst [vmem:[#allocation82_spill] sm:$0xff] %v8037_v40  ;;  %v8042_v63 = vmul.f32 %v9466_v42, %v7793_v18  ;;  %v1351_v0 = vmul.f32 %v9468_v24, %v7767_v22  ;;  %v9471_v42 = vunpack.i.h.bf16 %v7526_v58  ;;  %v9473_v24 = vld [vmem:[#allocation26_spill] sm:$0xff]  ;;  %v9480_v18 = vunpack.i.h.bf16 %v9478_v20  ;;  %v9481_v58 = vld [vmem:[#allocation75_spill] sm:$0xff] }
 0x351   : > { %9463 = vst [vmem:[#allocation81_spill] sm:$0xff] %v8033_v51  ;;  %v1352_v1 = vmul.f32 %v9469_v56, %v7733_v5  ;;  %v1353_v34 = vmul.f32 %v9470_v30, %v7709_v35  ;;  %v9474_v16 = vunpack.i.l.bf16 %v9473_v24  ;;  %v9475_v56 = vld [vmem:[#allocation60_spill] sm:$0xff]  ;;  %v9476_v46 = vunpack.i.h.bf16 %v9473_v24  ;;  %v9477_v30 = vld [vmem:[#allocation61_spill] sm:$0xff] }
 0x352   : > { %9467 = vst [vmem:[#allocation83_spill] sm:$0xff] %v8042_v63  ;;  %v1354_v62 = vmul.f32 %v9471_v42, %v7719_v48  ;;  %v1357_v39 = vmul.f32 %v9479_v55, %v9477_v30  ;;  %v1358_v40 = vmul.f32 %v9480_v18, %v7764_v59  ;;  %v6383_v42 = vld [vmem:[%s9356_s7 + $0x8] sm:$0xff]   ;;  %v9486_v20 = vld [vmem:[#allocation69_spill] sm:$0xff] }
 0x353   : > { %v1355_v9 = vmul.f32 %v9474_v16, %v9472_v43  ;;  %v1359_v15 = vpack.c.bf16 %v1352_v1, %v1351_v0  ;;  %v1356_v60 = vmul.f32 %v9476_v46, %v9475_v56  ;;  %v1286_v16 = vpack.c.bf16 %v1279_v23, %v9481_v58  ;;  %v9482_v0 = vld [vmem:[#allocation66_spill] sm:$0xff]  ;;  %v9484_v24 = vld [vmem:[#allocation64_spill] sm:$0xff] }
 0x354   : > { %v1360_v63 = vpack.c.bf16 %v1354_v62, %v1353_v34  ;;  %v9483_v1 = vld [vmem:[#allocation62_spill] sm:$0xff]  ;;  %v9485_v46 = vld [vmem:[#allocation72_spill] sm:$0xff]  ;;  %v1362_v32 = vpack.c.bf16 %v1358_v40, %v1357_v39  ;;  %v1628_v18 = vpack.c.bf16 %v9486_v20, %v7924_v33  ;;  %v9487_v62 = vld [vmem:[#allocation73_spill] sm:$0xff]  ;;  %v1799_v23 = vpack.c.bf16 %v7902_v7, %v7971_v25 }
 0x355   : > { %v1288_v44 = vpack.c.bf16 %v9483_v1, %v9482_v0  ;;  %v1289_v36 = vpack.c.bf16 %v9485_v46, %v9484_v24  ;;  %5531 = vmatprep.mubr.msk.bf16.mxu0 %vm758_vm1, %v1359_v15  ;;  %v1361_v55 = vpack.c.bf16 %v1356_v60, %v1355_v9  ;;  %v1630_v34 = vpack.c.bf16 %v9487_v62, %v7881_v10  ;;  %v9488_v51 = vld [vmem:[#allocation76_spill] sm:$0xff]  ;;  %v9489_v9 = vld [vmem:[#allocation25_spill] sm:$0xff]  ;;  %v6384_v33 = vld [vmem:[%s9356_s7 + $0x20] sm:$0xff]  }
 0x356   : > { %5532 = vmatmul.mubr.msk.bf16.vlgmr.msra.gmra.mrb[8].mxu0 %vm758_vm1, %v1360_v63  ;;  %v1631_v58 = vpack.c.bf16 %v7928_v47, %v9488_v51  ;;  %v1905_v24 = vpack.c.bf16 %v7709_v35, %v7733_v5  ;;  %v1906_v60 = vpack.c.bf16 %v9472_v43, %v7719_v48  ;;  %v1907_v10 = vpack.c.bf16 %v9477_v30, %v9475_v56  ;;  %v6385_v5 = vld [vmem:[%s9356_s7 + $0x28] sm:$0xff]   ;;  %v6388_v48 = vld [vmem:[%s9356_s7 + $0x40] sm:$0xff]   ;;  %v6391_v47 = vld [vmem:[%s9356_s7 + $0x58] sm:$0xff]  }
 0x357   : > { %5540 = vmatpush3.bf16.msra.mxu0 %v9489_v9  ;;  %5535 = vmatprep.mubr.msk.bf16.mxu0 %vm758_vm1, %v1361_v55  ;;  %v1908_v20 = vpack.c.bf16 %v7767_v22, %v7764_v59  ;;  %v9490_v40 = vpack.c.bf16 %v7773_v27, %v7898_v37  ;;  %v6386_v59 = vld [vmem:[%s9356_s7 + $0x30] sm:$0xff]   ;;  %v9491_v15 = vpack.c.bf16 %v7877_v17, %v7804_v50  ;;  %v9493_v17 = vld [vmem:[#allocation67_spill] sm:$0xff]  ;;  %v9504_v56 = vld [vmem:[#allocation74_spill] sm:$0xff] }
 0x358   : > { %5541 = vmatprep.subr.bf16.mxu0 %v6383_v42  ;;  %v9492_v43 = vld [vmem:[#allocation68_spill] sm:$0xff]  ;;  %v9495_v27 = vld [vmem:[#allocation65_spill] sm:$0xff]  ;;  %v9496_v22 = vld [vmem:[#allocation63_spill] sm:$0xff]  ;;  %v9498_v7 = vpack.c.bf16 %v7852_v57, %v7830_v14  ;;  %v9502_v51 = vpack.c.bf16 %v7889_v41, %v7885_v29  ;;  %v9507_v29 = vpack.c.bf16 %v7869_v31, %v7906_v19  ;;  %v9508_v0 = vpack.c.bf16 %v7949_v6, %v7944_v49 }
 0x359   : > { %v9494_v35 = vpack.c.bf16 %v9492_v43, %v9493_v17  ;;  %v9497_v50 = vpack.c.bf16 %v9495_v27, %v9496_v22  ;;  %v6390_v37 = vld [vmem:[%s9356_s7 + $0x50] sm:$0xff]   ;;  %v6392_v25 = vld [vmem:[%s9356_s7 + $0x60] sm:$0xff]   ;;  %v6393_v39 = vld [vmem:[%s9356_s7 + $0x68] sm:$0xff]   ;;  %v9510_v19 = vpack.c.bf16 %v7983_v8, %v7979_v21  ;;  %v9511_v6 = vpack.c.bf16 %v7959_v52, %v7954_v2 }
 0x35a   : > { %v9499_v57 = vld [vmem:[#allocation71_spill] sm:$0xff]  ;;  %v9500_v14 = vld [vmem:[#allocation70_spill] sm:$0xff]  ;;  %v9503_v63 = vld [vmem:[#allocation77_spill] sm:$0xff]  ;;  %v9514_v49 = vpack.c.bf16 %v7988_v28, %v7725_v11  ;;  %v9515_v52 = vmov 0.0   ;;  %v9516_v21 = vpack.c.bf16 %v8011_v54, %v8006_v3 }
 0x35b   : > { %5542 = vmatpush3.bf16.msra.mxu0 %v6383_v42  ;;  %v9505_v30 = vpack.c.bf16 %v9503_v63, %v9504_v56  ;;  %v6394_v42 = vld [vmem:[%s9356_s7 + $0x70] sm:$0xff]   ;;  %v6395_v41 = vld [vmem:[%s9356_s7 + $0x78] sm:$0xff]   ;;  %v6396_v31 = vld [vmem:[%s9356_s7 + $0x80] sm:$0xff]  }
 0x35c   : > { %5551 = vmatprep.subr.bf16.mxu0 %v6384_v33  ;;  %v6398_v28 = vld [vmem:[%s9186_s9] sm:$0xff]   ;;  %v9519_v11 = vld [vmem:[#allocation80_spill] sm:$0xff]  ;;  %v2734_v63 = vld [vmem:[#allocation11] sm:$0x1] }
 0x35d   : > { %v9521_v46 = vld [vmem:[#allocation79_spill] sm:$0xff]  ;;  %v9522_v54 = vld [vmem:[#allocation78_spill] sm:$0xff]  ;;  %v6400_v55 = vld [vmem:[%s9186_s9 + $0x10] sm:$0xff]  }
 0x35e   : > { %5536 = vmatmul.mubr.msk.bf16.gmra.mrb[12].mxu0 %vm758_vm1, %v1362_v32  ;;  %v6387_v32 = vld [vmem:[%s9356_s7 + $0x38] sm:$0xff]   ;;  %v9523_v3 = vpack.c.bf16 %v9521_v46, %v9522_v54  ;;  %v9524_v62 = vld [vmem:[#allocation83_spill] sm:$0xff]  ;;  %v2894_v22 = vld [vmem:[%s9528_s23 + $0x30] sm:$0xff] }
 0x35f   : > { %5543 = vmatprep.mubr.msk.bf16.mxu0 %vm758_vm1, %v1286_v16  ;;  %v9506_v16 = vpack.c.bf16 %v7936_v4, %v7932_v45  ;;  %v9509_v45 = vpack.c.bf16 %v7940_v53, %v7916_v61  ;;  %v6397_v61 = vld [vmem:[%s9356_s7 + $0x88] sm:$0xff]   ;;  %v2710_v53 = vld [vmem:[%s9512_s27] sm:$0x1]  ;;  %v9513_v4 = vpack.c.bf16 %v7715_v13, %v7705_v26  ;;  %v9517_v26 = vpack.c.bf16 %v7999_v12, %v7995_v38  ;;  %v9518_v13 = vld [vmem:[#allocation81_spill] sm:$0xff]  ;;  %s9663_s27 = sld [smem:[#allocation96_spill]] }
 0x360   : > { %v2711_v2 = vsub.f32 0.0, %v2710_v53  ;;  %v9520_v1 = vpack.c.bf16 %v9518_v13, %v9519_v11  ;;  %v6399_v38 = vld [vmem:[%s9186_s9 + $0x8] sm:$0xff]   ;;  %v2892_v17 = vld [vmem:[%s9528_s23 + $0x20] sm:$0xff] }
 0x361   : > { %v4966_v56 = vld [vmem:[#allocation10] ss:$0 sm:$0xff] }
 0x362   : > { %v2712_v8 = vmul.f32 1.442695, %v2711_v2 }
 0x364   : > { %6486 = vpow2.f32 %v2712_v8 }
 0x366   : > { %5544 = vmatmul.mubr.msk.bf16.vlgmr.msra.gmra.mrb[8].mxu0 %vm758_vm1, %v9490_v40  ;;  %v9527_v40 = vmov 0.0|0.0  }
 0x367   : > { %5552 = vmatpush3.bf16.msra.mxu0 %v6384_v33  ;;  %5547 = vmatprep.mubr.msk.bf16.mxu0 %vm758_vm1, %v1288_v44  ;;  %v9501_v44 = vpack.c.bf16 %v9499_v57, %v9500_v14  ;;  %v6405_v33 = vld [vmem:[%s9186_s9 + $0x38] sm:$0xff]  }
 0x368   : > { %5553 = vmatprep.subr.bf16.mxu0 %v6385_v5 }
 0x36b   : > { %5554 = vmatpush3.bf16.msra.mxu0 %v6385_v5 }
 0x36c   : > { %5563 = vmatprep.subr.bf16.mxu0 %v6386_v59 }
 0x36e   : > { %5548 = vmatmul.mubr.msk.bf16.gmra.mrb[12].mxu0 %vm758_vm1, %v1289_v36  ;;  %v6389_v36 = vld [vmem:[%s9356_s7 + $0x48] sm:$0xff]   ;;  %v6487_v12 = vpop.eup %6486 }
 0x36f   : > { %5555 = vmatprep.mubr.msk.bf16.mxu0 %vm758_vm1, %v1628_v18  ;;  %v2714_v18 = vadd.f32 1.0, %v6487_v12 }
 0x371   : > { %6488 = vrcp.f32 %v2714_v18 }
 0x376   : > { %5556 = vmatmul.mubr.msk.bf16.vlgmr.msra.gmra.mrb[8].mxu0 %vm758_vm1, %v9491_v15  ;;  %v2890_v15 = vld [vmem:[%s9528_s23 + $0x10] sm:$0xff] }
 0x377   : > { %5564 = vmatpush3.bf16.msra.mxu0 %v6386_v59  ;;  %5559 = vmatprep.mubr.msk.bf16.mxu0 %vm758_vm1, %v1630_v34  ;;  %v9525_v34 = vld [vmem:[#allocation82_spill] sm:$0xff] }
 0x378   : > { %5565 = vmatprep.subr.bf16.mxu0 %v6387_v32  ;;  %v2888_v59 = vld [vmem:[%s9528_s23] sm:$0xff] }
 0x37b   : > { %5566 = vmatpush3.bf16.msra.mxu0 %v6387_v32  ;;  %v6489_v9 = vpop.eup %6488  ;;  %v2889_v32 = vld [vmem:[%s9528_s23 + $0x8] sm:$0xff] }
 0x37c   : > { %5575 = vmatprep.subr.bf16.mxu0 %v6388_v48 }
 0x37e   : > { %5560 = vmatmul.mubr.msk.bf16.gmra.mrb[12].mxu0 %vm758_vm1, %v1631_v58  ;;  %v9526_v58 = vpack.c.bf16 %v9524_v62, %v9525_v34 }
 0x37f   : > { %5567 = vmatprep.mubr.msk.bf16.mxu0 %vm758_vm1, %v1799_v23  ;;  %v6401_v23 = vld [vmem:[%s9186_s9 + $0x18] sm:$0xff]  }
 0x386   : > { %5568 = vmatmul.mubr.msk.bf16.vlgmr.msra.gmra.mrb[8].mxu0 %vm758_vm1, %v9494_v35  ;;  %v2893_v35 = vld [vmem:[%s9528_s23 + $0x28] sm:$0xff] }
 0x387   : > { %5576 = vmatpush3.bf16.msra.mxu0 %v6388_v48  ;;  %5571 = vmatprep.mubr.msk.bf16.mxu0 %vm758_vm1, %v9497_v50  ;;  %v5896_v48 = vpack.c.bf16 %v2889_v32, %v2888_v59  ;;  %v5902_v27 = vpack.c.bf16 %v2893_v35, %v2892_v17  ;;  %v2895_v50 = vld [vmem:[%s9528_s23 + $0x38] sm:$0xff] }
 0x388   : > { %5577 = vmatprep.subr.bf16.mxu0 %v6389_v36 }
 0x389   : > { %5909 = vmatpush3.bf16.msra.mxu1 %v5896_v48 }
 0x38a   : > { %5910 = vmatprep.subr.bf16.mxu1 %v9527_v40 }
 0x38b   : > { %5578 = vmatpush3.bf16.msra.mxu0 %v6389_v36  ;;  %v2891_v36 = vld [vmem:[%s9528_s23 + $0x18] sm:$0xff] }
 0x38c   : > { %5587 = vmatprep.subr.bf16.mxu0 %v6390_v37  ;;  %v5899_v43 = vpack.c.bf16 %v2891_v36, %v2890_v15 }
 0x38e   : > { %5572 = vmatmul.mubr.msk.bf16.gmra.mrb[12].mxu0 %vm758_vm1, %v9498_v7  ;;  %5912 = vmatpush3.bf16.msra.mxu1 %v5899_v43 }
 0x38f   : > { %5579 = vmatprep.mubr.msk.bf16.mxu0 %vm758_vm1, %v1905_v24  ;;  %v6402_v24 = vld [vmem:[%s9186_s9 + $0x20] sm:$0xff]   ;;  %5913 = vmatprep.subr.bf16.mxu1 %v9527_v40 }
 0x392   : > { %5915 = vmatpush3.bf16.msra.mxu1 %v5902_v27 }
 0x393   : > { %5916 = vmatprep.subr.bf16.mxu1 %v9527_v40 }
 0x396   : > { %5580 = vmatmul.mubr.msk.bf16.vlgmr.msra.gmra.mrb[8].mxu0 %vm758_vm1, %v1906_v60  ;;  %v6403_v60 = vld [vmem:[%s9186_s9 + $0x28] sm:$0xff]  }
 0x397   : > { %5588 = vmatpush3.bf16.msra.mxu0 %v6390_v37  ;;  %5583 = vmatprep.mubr.msk.bf16.mxu0 %vm758_vm1, %v1907_v10  ;;  %v6404_v10 = vld [vmem:[%s9186_s9 + $0x30] sm:$0xff]   ;;  %v5905_v37 = vpack.c.bf16 %v2895_v50, %v2894_v22 }
 0x398   : > { %5589 = vmatprep.subr.bf16.mxu0 %v6391_v47 }
 0x399   : > { %5918 = vmatpush3.bf16.msra.mxu1 %v5905_v37 }
 0x39a   : > { %5919 = vmatprep.subr.bf16.mxu1 %v9527_v40 }
 0x39b   : > { %5590 = vmatpush3.bf16.msra.mxu0 %v6391_v47 }
 0x39c   : > { %5599 = vmatprep.subr.bf16.mxu0 %v6392_v25 }
 0x39e   : > { %5584 = vmatmul.mubr.msk.bf16.gmra.mrb[12].mxu0 %vm758_vm1, %v1908_v20  ;;  %v2716_v20 = vmul.f32 %v6489_v9, %v2710_v53 }
 0x39f   : > { %5591 = vmatprep.mubr.msk.bf16.mxu0 %vm758_vm1, %v9501_v44 }
 0x3a0   : > { %v2717_v5 = vpack.c.bf16 %v2716_v20, %v2716_v20 }
 0x3a6   : > { %5592 = vmatmul.mubr.msk.bf16.vlgmr.msra.gmra.mrb[8].mxu0 %vm758_vm1, %v9502_v51 }
 0x3a7   : > { %5600 = vmatpush3.bf16.msra.mxu0 %v6392_v25  ;;  %5595 = vmatprep.mubr.msk.bf16.mxu0 %vm758_vm1, %v9505_v30 }
 0x3a8   : > { %5601 = vmatprep.subr.bf16.mxu0 %v6393_v39 }
 0x3ab   : > { %5602 = vmatpush3.bf16.msra.mxu0 %v6393_v39 }
 0x3ac   : > { %5611 = vmatprep.subr.bf16.mxu0 %v6394_v42 }
 0x3ae   : > { %5596 = vmatmul.mubr.msk.bf16.gmra.mrb[12].mxu0 %vm758_vm1, %v9506_v16 }
 0x3af   : > { %5603 = vmatprep.mubr.msk.bf16.mxu0 %vm758_vm1, %v9507_v29 }
 0x3b6   : > { %5604 = vmatmul.mubr.msk.bf16.vlgmr.msra.gmra.mrb[8].mxu0 %vm758_vm1, %v9508_v0 }
 0x3b7   : > { %5612 = vmatpush3.bf16.msra.mxu0 %v6394_v42  ;;  %5607 = vmatprep.mubr.msk.bf16.mxu0 %vm758_vm1, %v9509_v45 }
 0x3b8   : > { %5613 = vmatprep.subr.bf16.mxu0 %v6395_v41 }
 0x3bb   : > { %5614 = vmatpush3.bf16.msra.mxu0 %v6395_v41 }
 0x3bc   : > { %5623 = vmatprep.subr.bf16.mxu0 %v6396_v31 }
 0x3be   : > { %5608 = vmatmul.mubr.msk.bf16.gmra.mrb[12].mxu0 %vm758_vm1, %v9510_v19  ;;  %v9529_v19 = vld [vmem:[#allocation44_spill] sm:$0xff] }
 0x3bf   : > { %5615 = vmatprep.mubr.msk.bf16.mxu0 %vm758_vm1, %v9511_v6 }
 0x3c6   : > { %5616 = vmatmul.mubr.msk.bf16.vlgmr.msra.gmra.mrb[8].mxu0 %vm758_vm1, %v9513_v4 }
 0x3c7   : > { %5624 = vmatpush3.bf16.msra.mxu0 %v6396_v31  ;;  %5619 = vmatprep.mubr.msk.bf16.mxu0 %vm758_vm1, %v9514_v49 }
 0x3c8   : > { %5625 = vmatprep.subr.bf16.mxu0 %v6397_v61 }
 0x3cb   : > { %5626 = vmatpush3.bf16.msra.mxu0 %v6397_v61 }
 0x3cc   : > { %5635 = vmatprep.subr.bf16.mxu0 %v9515_v52 }
 0x3ce   : > { %5620 = vmatmul.mubr.msk.bf16.gmra.mrb[12].mxu0 %vm758_vm1, %v9516_v21 }
 0x3cf   : > { %5627 = vmatprep.mubr.msk.bf16.mxu0 %vm758_vm1, %v9517_v26 }
 0x3d6   : > { %5628 = vmatmul.mubr.msk.bf16.vlgmr.msra.gmra.mrb[8].mxu0 %vm758_vm1, %v9520_v1 }
 0x3d7   : > { %5636 = vmatpush3.bf16.msra.mxu0 %v6398_v28  ;;  %5631 = vmatprep.mubr.msk.bf16.mxu0 %vm758_vm1, %v9523_v3 }
 0x3d8   : > { %5637 = vmatprep.subr.bf16.mxu0 %v9515_v52 }
 0x3db   : > { %5638 = vmatpush3.bf16.msra.mxu0 %v6399_v38 }
 0x3dc   : > { %5639 = vmatprep.subr.bf16.mxu0 %v9515_v52 }
 0x3de   : > { %5632 = vmatmul.mubr.msk.bf16.gmra.mrb[12].mxu0 %vm758_vm1, %v9526_v58 }
 0x3df   : > { %5640 = vmatpush3.bf16.msra.mxu0 %v6400_v55  ;;  %5651 = vmatprep.mubr.msk.bf16.mxu0 %vm6878_vm0, %v9515_v52 }
 0x3e0   : > { %5641 = vmatprep.subr.bf16.mxu0 %v9515_v52 }
 0x3e3   : > { %5642 = vmatpush3.bf16.msra.mxu0 %v6401_v23 }
 0x3e4   : > { %5643 = vmatprep.subr.bf16.mxu0 %v9515_v52 }
 0x3e7   : > { %5644 = vmatpush3.bf16.msra.mxu0 %v6402_v24 }
 0x3e8   : > { %5645 = vmatprep.subr.bf16.mxu0 %v9515_v52 }
 0x3eb   : > { %5646 = vmatpush3.bf16.msra.mxu0 %v6403_v60 }
 0x3ec   : > { %5647 = vmatprep.subr.bf16.mxu0 %v9515_v52 }
 0x3ef   : > { %5648 = vmatpush3.bf16.msra.mxu0 %v6404_v10 }
 0x3f0   : > { %5649 = vmatprep.subr.bf16.mxu0 %v9515_v52 }
 0x3f3   : > { %5650 = vmatpush3.bf16.msra.mxu0 %v6405_v33 }
 0x3f4   : > { %5895 = vmatprep.subr.bf16.mxu0 %v9527_v40 }
 0x3f6   : > { %5652 = vmatmul.mubr.bf16.vlgmr.msra.gmra.mrb[16].mxu0 %v2717_v5 }
 0x3f7   : > { %5671 = vmatprep.mubr.msk.f32.mxu0 %vm6878_vm0, %v9515_v52  ;;  %5897 = vmatpush3.bf16.msra.mxu0 %v5896_v48 }
 0x3f8   : > { %5898 = vmatprep.subr.bf16.mxu0 %v9527_v40 }
 0x3fb   : > { %5900 = vmatpush3.bf16.msra.mxu0 %v5899_v43 }
 0x3fc   : > { %5901 = vmatprep.subr.bf16.mxu0 %v9527_v40 }
 0x3ff   : > { %5903 = vmatpush3.bf16.msra.mxu0 %v5902_v27 }
 0x400   : > { %5904 = vmatprep.subr.bf16.mxu0 %v9527_v40 }
 0x403   : > { %5906 = vmatpush3.bf16.msra.mxu0 %v5905_v37 }
 0x4a9   : > { %v5629_v7 = vpop.f32.mrb[8].mxu0 }
 0x4aa   : > { %v2656_v47 = vpop.f32.mrb[9].mxu0  ;;  %v2704_v29 = vadd.f32 %v5629_v7, %v4966_v56 }
 0x4ab   : > { %v5630_v25 = vpop.f32.mrb[10].mxu0  ;;  %v2702_v0 = vadd.f32 %v4966_v56, %v2656_v47 }
 0x4ac   : > { %v2659_v57 = vpop.f32.mrb[11].mxu0  ;;  %v2705_v45 = vadd.f32 %v5630_v25, %v4966_v56 }
 0x4ad   : > { %v2703_v31 = vadd.f32 %v4966_v56, %v2659_v57 }
 0x4b1   : > { %v5633_v14 = vpop.f32.mrb[12].mxu0 }
 0x4b2   : > { %v2672_v44 = vpop.f32.mrb[13].mxu0  ;;  %v2708_v53 = vadd.f32 %v5633_v14, %v4966_v56 }
 0x4b3   : > { %v5634_v39 = vpop.f32.mrb[14].mxu0  ;;  %v2706_v4 = vadd.f32 %v4966_v56, %v2672_v44 }
 0x4b4   : > { %v2675_v51 = vpop.f32.mrb[15].mxu0  ;;  %v2709_v49 = vadd.f32 %v5634_v39, %v4966_v56 }
 0x4b5   : > { %v2707_v2 = vadd.f32 %v4966_v56, %v2675_v51 }
 0x4c9   : > { %v2817_v30 = vpop.f32.mrb[16].mxu0 }
 0x4ca   : > { %v2818_v42 = vadd.f32 %v2817_v30, %v2734_v63  ;;  %v5653_v16 = vpop.f32.mrb[17].mxu0 }
 0x4cb   : > { %v2820_v41 = vpop.f32.mrb[18].mxu0 }
 0x4cc   : > { %v2826_v6 = vrot.slane %v2818_v42, %v9529_v19  ;;  %v5654_v61 = vpop.f32.mrb[19].mxu0 }
 0x4cd   : > { %v3049_v61 = vld [vmem:[#allocation16] sm:$0xff] }
 0x4ce   : > { %v8311_v8 = vadd.f32 %v2826_v6, %v2702_v0  ;;  %v8313_v21 = vadd.f32 %v2826_v6, %v2703_v31  ;;  %v8315_v26 = vadd.f32 %v2826_v6, %v2704_v29  ;;  %v8317_v28 = vadd.f32 %v2826_v6, %v2705_v45 }
 0x4cf   : > { %v8319_v13 = vadd.f32 %v2826_v6, %v2706_v4  ;;  %v8321_v11 = vadd.f32 %v2826_v6, %v2707_v2  ;;  %v8323_v1 = vadd.f32 %v2826_v6, %v2708_v53  ;;  %v8325_v46 = vadd.f32 %v2826_v6, %v2709_v49  ;;  %v3050_v53 = vld [vmem:[#allocation16 + $0x8] sm:$0xff] }
 0x4d0   : > { %v2838_v54 = vsel %vm2837_vm4, %v8311_v8, 0.0  ;;  %v2839_v3 = vsel %vm2837_vm4, %v8313_v21, 0.0  ;;  %v2841_v12 = vsel %vm2837_vm4, %v8315_v26, 0.0  ;;  %v2859_v55 = vmul.f32 %v8311_v8, %v8311_v8 }
 0x4d1   : > { %v2840_v38 = vadd.f32 %v2839_v3, %v2838_v54  ;;  %v2860_v18 = vmul.f32 %v8313_v21, %v8313_v21  ;;  %v2861_v62 = vmul.f32 %v8315_v26, %v8315_v26  ;;  %v2843_v58 = vsel %vm2837_vm4, %v8317_v28, 0.0  ;;  %v3051_v54 = vld [vmem:[#allocation16 + $0x10] sm:$0xff]  ;;  %v3052_v3 = vld [vmem:[#allocation16 + $0x18] sm:$0xff] }
 0x4d2   : > { %v2862_v23 = vmul.f32 %v8317_v28, %v8317_v28  ;;  %v2867_v24 = vsel %vm2837_vm4, %v2859_v55, 0.0  ;;  %v2845_v20 = vsel %vm2837_vm4, %v8319_v13, 0.0  ;;  %v2863_v33 = vmul.f32 %v8319_v13, %v8319_v13 }
 0x4d3   : > { %v2842_v34 = vadd.f32 %v2841_v12, %v2840_v38  ;;  %v2868_v60 = vsel %vm2837_vm4, %v2860_v18, 0.0  ;;  %v2870_v5 = vsel %vm2837_vm4, %v2861_v62, 0.0  ;;  %v2847_v15 = vsel %vm2837_vm4, %v8321_v11, 0.0 }
 0x4d4   : > { %v2869_v10 = vadd.f32 %v2868_v60, %v2867_v24  ;;  %v2864_v48 = vmul.f32 %v8321_v11, %v8321_v11  ;;  %v2872_v36 = vsel %vm2837_vm4, %v2862_v23, 0.0  ;;  %v2849_v35 = vsel %vm2837_vm4, %v8323_v1, 0.0 }
 0x4d5   : > { %v2844_v9 = vadd.f32 %v2843_v58, %v2842_v34  ;;  %v2865_v27 = vmul.f32 %v8323_v1, %v8323_v1  ;;  %v2874_v22 = vsel %vm2837_vm4, %v2863_v33, 0.0  ;;  %v2851_v7 = vsel %vm2837_vm4, %v8325_v46, 0.0  ;;  %v8393_v33 = vld [vmem:[%s9530_s26] sm:$0xff]  }
 0x4d6   : > { %v2871_v32 = vadd.f32 %v2870_v5, %v2869_v10  ;;  %v2866_v47 = vmul.f32 %v8325_v46, %v8325_v46  ;;  %v2876_v25 = vsel %vm2837_vm4, %v2864_v48, 0.0  ;;  %v5920_v49 = vpack.c.bf16 %v3050_v53, %v3049_v61  ;;  %v6406_v10 = vld [vmem:[%s9530_s26 + $0x20] sm:$0xff]  }
 0x4d7   : > { %v2846_v59 = vadd.f32 %v2845_v20, %v2844_v9  ;;  %v2878_v44 = vsel %vm2837_vm4, %v2865_v27, 0.0  ;;  %v5923_v38 = vpack.c.bf16 %v3052_v3, %v3051_v54  ;;  %v6407_v20 = vld [vmem:[%s9530_s26 + $0x28] sm:$0xff]  }
 0x4d8   : > { %v2873_v17 = vadd.f32 %v2872_v36, %v2871_v32  ;;  %v2880_v63 = vsel %vm2837_vm4, %v2866_v47, 0.0 }
 0x4d9   : > { %v2848_v43 = vadd.f32 %v2847_v15, %v2846_v59  ;;  %v2835_v15 = vld [vmem:[#allocation13] sm:$0x1] }
 0x4da   : > { %v2875_v37 = vadd.f32 %v2874_v22, %v2873_v17 }
 0x4db   : > { %v2850_v50 = vadd.f32 %v2849_v35, %v2848_v43 }
 0x4dc   : > { %v2877_v14 = vadd.f32 %v2876_v25, %v2875_v37  ;;  %v4979_v37 = vld [vmem:[#allocation14] ss:$0 sm:$0xff] }
 0x4dd   : > { %v2852_v57 = vadd.f32 %v2851_v7, %v2850_v50 }
 0x4de   : > { %v2879_v51 = vadd.f32 %v2878_v44, %v2877_v14 }
 0x4df   : > { %v2853_v39 = vrot.slane %v2852_v57, 4 }
 0x4e0   : > { %v2881_v30 = vadd.f32 %v2880_v63, %v2879_v51 }
 0x4e1   : > { %v2854_v56 = vadd.f32 %v2853_v39, %v2852_v57 }
 0x4e2   : > { %v2882_v16 = vrot.slane %v2881_v30, 4 }
 0x4e3   : > { %v2855_v42 = vrot.slane %v2854_v56, 2 }
 0x4e4   : > { %v2883_v41 = vadd.f32 %v2882_v16, %v2881_v30 }
 0x4e5   : > { %v2856_v29 = vadd.f32 %v2855_v42, %v2854_v56 }
 0x4e6   : > { %v2884_v45 = vrot.slane %v2883_v41, 2 }
 0x4e7   : > { %v2857_v0 = vrot.slane %v2856_v29, 1 }
 0x4e8   : > { %v2885_v6 = vadd.f32 %v2884_v45, %v2883_v41 }
 0x4e9   : > { %v2858_v31 = vadd.f32 %v2857_v0, %v2856_v29 }
 0x4ea   : > { %v2886_v4 = vrot.slane %v2885_v6, 1 }
 0x4eb   : > { %5672 = vmatmul.mubr.msk.f32.vlgmr.msra.gmra.mrb[6].mxu0 %vm2837_vm4, %v2858_v31 }
 0x4ec   : > { %v2887_v2 = vadd.f32 %v2886_v4, %v2885_v6 }
 0x4ee   : > { %5691 = vmatmul.mubr.msk.f32.vlgmr.msra.gmra.mrb[2].mxu1 %vm2837_vm4, %v2887_v2 }
 0x4ef   : > { %5921 = vmatpush3.bf16.msra.mxu1 %v5920_v49  ;;  %5701 = vmatprep.mubr.msk.f32.mxu1 %vm6878_vm0, %v9515_v52 }
 0x4f0   : > { %5922 = vmatprep.subr.bf16.mxu1 %v9527_v40 }
 0x4f3   : > { %5924 = vmatpush3.bf16.msra.mxu1 %v5923_v38 }
 0x4f4   : > { %5925 = vmatprep.subr.bf16.mxu1 %v9527_v40 }
 0x5be   : > { %v2965_v12 = vpop.f32.mrb[6].mxu0 }
 0x5bf   : > { %v2970_v55 = vmul.f32 0.0078125, %v2965_v12  ;;  %v5673_v18 = vpop.f32.mrb[7].mxu0 }
 0x5c1   : > { %v3045_v62 = vmul.f32 %v2970_v55, %v2970_v55  ;;  %5702 = vmatmul.mubr.msk.f32.vlgmr.msra.gmra.mrb[4].mxu1 %vm758_vm1, %v2970_v55  ;;  %v3040_v34 = vpop.f32.mrb[2].mxu1 }
 0x5c2   : > { %5927 = vmatpush3.bf16.msra.mxu1 %v5920_v49  ;;  %5712 = vmatprep.mubr.msk.f32.mxu1 %vm6878_vm0, %v9515_v52  ;;  %v3044_v58 = vmul.f32 0.0078125, %v3040_v34  ;;  %v5692_v23 = vpop.f32.mrb[3].mxu1  ;;  %v6408_v52 = vld [vmem:[%s9530_s26 + $0x30] sm:$0xff]  }
 0x5c3   : > { %5928 = vmatprep.subr.bf16.mxu1 %v9527_v40  ;;  %v6409_v40 = vld [vmem:[%s9530_s26 + $0x38] sm:$0xff]  }
 0x5c4   : > { %v3046_v24 = vsub.f32 %v3044_v58, %v3045_v62 }
 0x5c6   : > { %5930 = vmatpush3.bf16.msra.mxu1 %v5923_v38  ;;  %v3047_v60 = vadd.f32 1e-06, %v3046_v24 }
 0x5c7   : > { %5715 = vmatprep.subr.bf16.mxu1 %v6406_v10 }
 0x5c8   : > { %6490 = vrsqrt.f32 %v3047_v60 }
 0x5d2   : > { %v6491_v9 = vpop.eup %6490 }
 0x5d3   : > { %5713 = vmatmul.mubr.msk.f32.vlgmr.msra.gmra.mrb[6].mxu1 %vm758_vm1, %v6491_v9 }
 0x5d4   : > { %5716 = vmatpush3.bf16.msra.mxu1 %v6406_v10 }
 0x5d5   : > { %5717 = vmatprep.subr.bf16.mxu1 %v6407_v20 }
 0x5d8   : > { %5718 = vmatpush3.bf16.msra.mxu1 %v6407_v20 }
 0x5d9   : > { %5719 = vmatprep.subr.bf16.mxu1 %v6408_v52 }
 0x5dc   : > { %5720 = vmatpush3.bf16.msra.mxu1 %v6408_v52 }
 0x5dd   : > { %5721 = vmatprep.subr.bf16.mxu1 %v6409_v40 }
 0x5e0   : > { %5722 = vmatpush3.bf16.msra.mxu1 %v6409_v40 }
 0x5e1   : > { %5731 = vmatprep.subr.bf16.mxu1 %v8393_v33 }
 0x694   : > { %v3122_v5 = vpop.f32.mrb[4].mxu1 }
 0x695   : > { %v5703_v59 = vpop.f32.mrb[5].mxu1  ;;  %v3202_v32 = vrot.slane %v3122_v5, %v9529_v19 }
 0x697   : > { %v3203_v17 = vsub.f32 %v8311_v8, %v3202_v32  ;;  %v3210_v27 = vsub.f32 %v8325_v46, %v3202_v32  ;;  %v3204_v22 = vsub.f32 %v8313_v21, %v3202_v32  ;;  %v3205_v50 = vsub.f32 %v8315_v26, %v3202_v32 }
 0x698   : > { %v3206_v7 = vsub.f32 %v8317_v28, %v3202_v32  ;;  %v3207_v47 = vsub.f32 %v8319_v13, %v3202_v32  ;;  %v3208_v25 = vsub.f32 %v8321_v11, %v3202_v32  ;;  %v3209_v57 = vsub.f32 %v8323_v1, %v3202_v32 }
 0x6a6   : > { %v3195_v48 = vpop.f32.mrb[6].mxu1 }
 0x6a7   : > { %v3211_v36 = vmul.f32 %v3195_v48, %v2835_v15  ;;  %v5714_v43 = vpop.f32.mrb[7].mxu1 }
 0x6a9   : > { %v3215_v35 = vrot.slane %v3211_v36, %v9529_v19 }
 0x6ab   : > { %v3216_v14 = vmul.f32 %v3215_v35, %v3203_v17  ;;  %v3223_v44 = vmul.f32 %v3215_v35, %v3210_v27  ;;  %v3217_v8 = vmul.f32 %v3215_v35, %v3204_v22  ;;  %v3218_v39 = vmul.f32 %v3215_v35, %v3205_v50 }
 0x6ac   : > { %v3219_v19 = vmul.f32 %v3215_v35, %v3206_v7  ;;  %v3220_v51 = vmul.f32 %v3215_v35, %v3207_v47  ;;  %v3221_v46 = vmul.f32 %v3215_v35, %v3208_v25  ;;  %v3222_v63 = vmul.f32 %v3215_v35, %v3209_v57  ;;  %v9531_v35 = vld [vmem:[#allocation24_spill] sm:$0xff] }
 0x6ad   : > { %v3230_v21 = vadd.f32 %v4979_v37, %v3216_v14  ;;  %v3237_v56 = vadd.f32 %v4979_v37, %v3223_v44  ;;  %v3231_v26 = vadd.f32 %v4979_v37, %v3217_v8  ;;  %v8406_v30 = vadd.f32 %v4979_v37, %v3218_v39 }
 0x6ae   : > { %v8408_v28 = vadd.f32 %v4979_v37, %v3219_v19  ;;  %v8410_v13 = vadd.f32 %v4979_v37, %v3220_v51  ;;  %v8412_v11 = vadd.f32 %v4979_v37, %v3221_v46  ;;  %v8414_v1 = vadd.f32 %v4979_v37, %v3222_v63  ;;  %v9534_v19 = vld [vmem:[#allocation27_spill] sm:$0xff] }
 0x6af   : > { %v3238_v42 = vsub.f32 0.0, %v3230_v21  ;;  %v3245_v16 = vsub.f32 0.0, %v3237_v56  ;;  %v3239_v29 = vsub.f32 0.0, %v3231_v26  ;;  %v3240_v41 = vsub.f32 0.0, %v8406_v30 }
 0x6b0   : > { %v3241_v0 = vsub.f32 0.0, %v8408_v28  ;;  %v3242_v45 = vsub.f32 0.0, %v8410_v13  ;;  %v3243_v31 = vsub.f32 0.0, %v8412_v11  ;;  %v3244_v49 = vsub.f32 0.0, %v8414_v1 }
 0x6b1   : > { %v3246_v6 = vmul.f32 1.442695, %v3238_v42  ;;  %v3260_v61 = vmul.f32 1.442695, %v3245_v16  ;;  %v3248_v53 = vmul.f32 1.442695, %v3239_v29  ;;  %v9532_v27 = vunpack.i.h.bf16 %v9531_v35 }
 0x6b2   : > { %v3250_v4 = vmul.f32 1.442695, %v3240_v41  ;;  %v3252_v2 = vmul.f32 1.442695, %v3241_v0  ;;  %v3254_v54 = vmul.f32 1.442695, %v3242_v45  ;;  %v9533_v25 = vunpack.i.l.bf16 %v9531_v35 }
 0x6b3   : > { %6492 = vpow2.f32 %v3246_v6  ;;  %v3256_v3 = vmul.f32 1.442695, %v3243_v31  ;;  %v3258_v38 = vmul.f32 1.442695, %v3244_v49  ;;  %v9535_v51 = vunpack.i.l.bf16 %v9534_v19  ;;  %v6415_v41 = vld [vmem:[%s9530_s26 + $0x48] sm:$0xff]  }
 0x6b4   : > { %6494 = vpow2.f32 %v3260_v61 }
 0x6b5   : > { %6496 = vpow2.f32 %v3248_v53 }
 0x6b6   : > { %6498 = vpow2.f32 %v3250_v4  ;;  %v9540_v4 = vld [vmem:[#allocation29_spill] sm:$0xff] }
 0x6b7   : > { %6500 = vpow2.f32 %v3252_v2 }
 0x6b8   : > { %6502 = vpow2.f32 %v3254_v54 }
 0x6b9   : > { %6504 = vpow2.f32 %v3256_v3 }
 0x6ba   : > { %6506 = vpow2.f32 %v3258_v38 }
 0x6bd   : > { %v6493_v12 = vpop.eup %6492 }
 0x6be   : > { %v6495_v55 = vpop.eup %6494  ;;  %v3262_v18 = vadd.f32 1.0, %v6493_v12 }
 0x6bf   : > { %v6497_v62 = vpop.eup %6496  ;;  %v3269_v34 = vadd.f32 1.0, %v6495_v55  ;;  %v9543_v55 = vld [vmem:[#allocation28_spill] sm:$0xff] }
 0x6c0   : > { %v6499_v58 = vpop.eup %6498  ;;  %6508 = vrcp.f32 %v3262_v18  ;;  %v3263_v23 = vadd.f32 1.0, %v6497_v62  ;;  %v9544_v18 = vunpack.i.l.bf16 %v9543_v55 }
 0x6c1   : > { %v6501_v24 = vpop.eup %6500  ;;  %6510 = vrcp.f32 %v3269_v34  ;;  %v3264_v60 = vadd.f32 1.0, %v6499_v58  ;;  %v9545_v34 = vld [vmem:[#allocation30_spill] sm:$0xff] }
 0x6c2   : > { %v6503_v9 = vpop.eup %6502  ;;  %6512 = vrcp.f32 %v3263_v23  ;;  %v3265_v10 = vadd.f32 1.0, %v6501_v24  ;;  %v9546_v58 = vunpack.i.l.bf16 %v9545_v34 }
 0x6c3   : > { %v6505_v20 = vpop.eup %6504  ;;  %6514 = vrcp.f32 %v3264_v60  ;;  %v3266_v52 = vadd.f32 1.0, %v6503_v9 }
 0x6c4   : > { %v6507_v40 = vpop.eup %6506  ;;  %6516 = vrcp.f32 %v3265_v10  ;;  %v3267_v5 = vadd.f32 1.0, %v6505_v20 }
 0x6c5   : > { %6518 = vrcp.f32 %v3266_v52  ;;  %v3268_v59 = vadd.f32 1.0, %v6507_v40  ;;  %v9548_v40 = vunpack.i.h.bf16 %v9545_v34 }
 0x6c6   : > { %6520 = vrcp.f32 %v3267_v5 }
 0x6c7   : > { %6522 = vrcp.f32 %v3268_v59 }
 0x6ca   : > { %v6509_v32 = vpop.eup %6508 }
 0x6cb   : > { %v6511_v15 = vpop.eup %6510  ;;  %v8421_v48 = vmul.f32 %v6509_v32, %v3230_v21 }
 0x6cc   : > { %v6513_v36 = vpop.eup %6512  ;;  %v8423_v43 = vmul.f32 %v6511_v15, %v3237_v56  ;;  %v9549_v15 = vld [vmem:[#allocation38_spill] sm:$0xff] }
 0x6cd   : > { %v6515_v17 = vpop.eup %6514  ;;  %v3323_v22 = vmul.f32 %v9532_v27, %v8421_v48  ;;  %v8428_v50 = vmul.f32 %v6513_v36, %v3231_v26  ;;  %v3286_v37 = vrot.slane %v8421_v48, 7  ;;  %v3545_v7 = vrot.slane %v8421_v48, 1 }
 0x6ce   : > { %v6517_v47 = vpop.eup %6516  ;;  %v3322_v57 = vmul.f32 %v9533_v25, %v8423_v43  ;;  %v8436_v14 = vmul.f32 %v6515_v17, %v8406_v30  ;;  %v3293_v44 = vrot.slane %v8423_v43, 7  ;;  %v3552_v8 = vrot.slane %v8423_v43, 1 }
 0x6cf   : > { %v6519_v39 = vpop.eup %6518  ;;  %v3324_v46 = vmul.f32 %v9535_v51, %v8428_v50  ;;  %v8444_v63 = vmul.f32 %v6517_v47, %v8408_v28  ;;  %v3287_v21 = vrot.slane %v8428_v50, 7  ;;  %v3546_v56 = vrot.slane %v8428_v50, 1  ;;  %v9538_v28 = vld [vmem:[#allocation26_spill] sm:$0xff] }
 0x6d0   : > { %v6521_v26 = vpop.eup %6520  ;;  %v3330_v42 = vpack.c.bf16 %v3323_v22, %v3322_v57  ;;  %v9536_v30 = vunpack.i.h.bf16 %v9534_v19  ;;  %v8452_v29 = vmul.f32 %v6519_v39, %v8410_v13  ;;  %v8456_v0 = vsel %vm1213_vm2, %v3293_v44, %v3286_v37  ;;  %v9551_v22 = vld [vmem:[#allocation31_spill] sm:$0xff] }
 0x6d1   : > { %v6523_v45 = vpop.eup %6522  ;;  %v9539_v31 = vunpack.i.l.bf16 %v9538_v28  ;;  %v8462_v61 = vmul.f32 %v6521_v26, %v8412_v11  ;;  %v8466_v53 = vsel %vm1213_vm2, %v3286_v37, %v3287_v21  ;;  %v9541_v13 = vunpack.i.h.bf16 %v9540_v4  ;;  %v6411_v11 = vld [vmem:[%s9530_s26 + $0x8] sm:$0xff]  }
 0x6d2   : > { %v3325_v16 = vmul.f32 %v9536_v30, %v8436_v14  ;;  %5723 = vmatprep.mubr.msk.bf16.mxu1 %vm2837_vm4, %v3330_v42  ;;  %v9542_v54 = vunpack.i.h.bf16 %v9538_v28  ;;  %v8479_v38 = vmul.f32 %v6523_v45, %v8414_v1  ;;  %v3288_v12 = vrot.slane %v8436_v14, 7  ;;  %v9556_v26 = vld [vmem:[#allocation48_spill] sm:$0xff] }
 0x6d3   : > { %v3326_v6 = vmul.f32 %v9539_v31, %v8444_v63  ;;  %v3303_v49 = vmul.f32 %v9541_v13, %v8456_v0  ;;  %v3328_v62 = vmul.f32 %v9544_v18, %v8462_v61  ;;  %v8488_v23 = vmul.f32 %v9546_v58, %v8466_v53  ;;  %v9562_v58 = vld [vmem:[#allocation33_spill] sm:$0xff]  ;;  %v9597_v13 = vld [vmem:[#allocation46_spill] sm:$0xff] }
 0x6d4   : > { %v3331_v2 = vpack.c.bf16 %v3325_v16, %v3324_v46  ;;  %v3327_v3 = vmul.f32 %v9542_v54, %v8452_v29  ;;  %v3289_v24 = vrot.slane %v8444_v63, 7  ;;  %v3290_v60 = vrot.slane %v8452_v29, 7 }
 0x6d5   : > { %v9547_v1 = vunpack.i.h.bf16 %v9543_v55  ;;  %v3292_v20 = vrot.slane %v8479_v38, 7  ;;  %v8499_v52 = vsel %vm1213_vm2, %v3287_v21, %v3288_v12  ;;  %v9550_v36 = vunpack.i.l.bf16 %v9549_v15 }
 0x6d6   : > { %5724 = vmatmul.mubr.msk.bf16.vlgmr.msra.gmra.mrb[8].mxu1 %vm2837_vm4, %v3331_v2  ;;  %v3332_v9 = vpack.c.bf16 %v3327_v3, %v3326_v6  ;;  %v8505_v5 = vmul.f32 %v9548_v40, %v8499_v52  ;;  %v8509_v59 = vsel %vm1213_vm2, %v3289_v24, %v3290_v60  ;;  %v3298_v32 = vsel %vm1213_vm2, %v3288_v12, %v3289_v24  ;;  %v9559_v2 = vld [vmem:[#allocation32_spill] sm:$0xff]  ;;  %v6413_v12 = vld [vmem:[%s9530_s26 + $0x18] sm:$0xff]  }
 0x6d7   : > { %v3329_v10 = vmul.f32 %v9547_v1, %v8479_v38  ;;  %5732 = vmatpush3.bf16.msra.mxu1 %v8393_v33  ;;  %v8516_v17 = vmul.f32 %v9550_v36, %v8499_v52  ;;  %v6412_v33 = vld [vmem:[%s9530_s26 + $0x10] sm:$0xff]   ;;  %v8524_v27 = vsel %vm1213_vm2, %v3292_v20, %v3293_v44  ;;  %v9552_v37 = vunpack.i.l.bf16 %v9551_v22 }
 0x6d8   : > { %5727 = vmatprep.mubr.msk.bf16.mxu1 %vm2837_vm4, %v3332_v9  ;;  %5733 = vmatprep.subr.bf16.mxu1 %v6411_v11  ;;  %v3291_v25 = vrot.slane %v8462_v61, 7  ;;  %v9553_v57 = vunpack.i.l.bf16 %v9540_v4  ;;  %v3311_v19 = vpack.c.bf16 %v8505_v5, %v8488_v23  ;;  %v9554_v51 = vunpack.i.h.bf16 %v9551_v22 }
 0x6d9   : > { %v3333_v35 = vpack.c.bf16 %v3329_v10, %v3328_v62  ;;  %v8528_v47 = vmul.f32 %v9552_v37, %v3298_v32  ;;  %v9555_v44 = vunpack.i.h.bf16 %v9549_v15  ;;  %v9557_v42 = vunpack.i.l.bf16 %v9556_v26 }
 0x6da   : > { %v3302_v39 = vmul.f32 %v9553_v57, %v8524_v27  ;;  %v8539_v46 = vmul.f32 %v9554_v51, %v8509_v59  ;;  %v9558_v16 = vunpack.i.h.bf16 %v9556_v26  ;;  %v8556_v28 = vsel %vm1213_vm2, %v3291_v25, %v3292_v20  ;;  %v9568_v57 = vld [vmem:[#allocation35_spill] sm:$0xff] }
 0x6db   : > { %v8543_v21 = vmul.f32 %v9555_v44, %v3298_v32  ;;  %v8547_v30 = vmul.f32 %v9557_v42, %v3298_v32  ;;  %v8560_v31 = vsel %vm1213_vm2, %v3290_v60, %v3291_v25  ;;  %5734 = vmatpush3.bf16.msra.mxu1 %v6411_v11  ;;  %v9560_v54 = vunpack.i.l.bf16 %v9559_v2  ;;  %v9565_v32 = vld [vmem:[#allocation34_spill] sm:$0xff]  ;;  %v9571_v26 = vld [vmem:[#allocation43_spill] sm:$0xff] }
 0x6dc   : > { %v8552_v45 = vmul.f32 %v9558_v16, %v8509_v59  ;;  %v3310_v6 = vpack.c.bf16 %v3303_v49, %v3302_v39  ;;  %v3312_v4 = vpack.c.bf16 %v8539_v46, %v8528_v47  ;;  %5735 = vmatprep.subr.bf16.mxu1 %v6412_v33  ;;  %v9561_v49 = vunpack.i.h.bf16 %v9559_v2  ;;  %v9591_v11 = vld [vmem:[#allocation42_spill] sm:$0xff] }
 0x6dd   : > { %v8569_v3 = vmul.f32 %v9560_v54, %v8560_v31  ;;  %v3547_v18 = vrot.slane %v8436_v14, 1  ;;  %v8588_v62 = vsel %vm1554_vm3, %v3545_v7, %v3546_v56  ;;  %v8596_v34 = vsel %vm1554_vm3, %v3552_v8, %v3545_v7  ;;  %v9574_v54 = vld [vmem:[#allocation56_spill] sm:$0xff] }
 0x6de   : > { %v8579_v55 = vmul.f32 %v9561_v49, %v8556_v28  ;;  %v9563_v23 = vunpack.i.h.bf16 %v9562_v58  ;;  %v3548_v60 = vrot.slane %v8444_v63, 1  ;;  %v3549_v9 = vrot.slane %v8452_v29, 1  ;;  %5728 = vmatmul.mubr.msk.bf16.gmra.mrb[12].mxu1 %vm2837_vm4, %v3333_v35 }
 0x6df   : > { %v8612_v7 = vsel %vm1554_vm3, %v3546_v56, %v3547_v18  ;;  %v9564_v10 = vunpack.i.l.bf16 %v9562_v58  ;;  %v3550_v40 = vrot.slane %v8462_v61, 1  ;;  %5736 = vmatpush3.bf16.msra.mxu1 %v6412_v33  ;;  %5739 = vmatprep.mubr.msk.bf16.mxu1 %vm2837_vm4, %v3310_v6  ;;  %v9566_v15 = vunpack.i.l.bf16 %v9565_v32  ;;  %v6414_v33 = vld [vmem:[%s9530_s26 + $0x40] sm:$0xff]  }
 0x6e0   : > { %v8601_v24 = vmul.f32 %v9563_v23, %v8588_v62  ;;  %v8623_v5 = vsel %vm1554_vm3, %v3547_v18, %v3548_v60  ;;  %v3556_v56 = vsel %vm1554_vm3, %v3548_v60, %v3549_v9  ;;  %v3551_v35 = vrot.slane %v8479_v38, 1  ;;  %5737 = vmatprep.subr.bf16.mxu1 %v6413_v12 }
 0x6e1   : > { %v8617_v20 = vmul.f32 %v9564_v10, %v8596_v34  ;;  %v8628_v36 = vmul.f32 %v9566_v15, %v8612_v7  ;;  %v9567_v37 = vunpack.i.h.bf16 %v9565_v32  ;;  %v3555_v25 = vsel %vm1554_vm3, %v3549_v9, %v3550_v40 }
 0x6e2   : > { %v9569_v39 = vunpack.i.l.bf16 %v9568_v57  ;;  %v9570_v46 = vunpack.i.h.bf16 %v9568_v57  ;;  %v9572_v42 = vunpack.i.l.bf16 %v9571_v26  ;;  %v9573_v6 = vunpack.i.h.bf16 %v9571_v26 }
 0x6e3   : > { %v8641_v47 = vmul.f32 %v9567_v37, %v8623_v5  ;;  %v9575_v49 = vunpack.i.l.bf16 %v9574_v54  ;;  %v9577_v23 = vunpack.i.h.bf16 %v9574_v54  ;;  %v8676_v9 = vsel %vm1554_vm3, %v3551_v35, %v3552_v8  ;;  %5738 = vmatpush3.bf16.msra.mxu1 %v6413_v12 }
 0x6e4   : > { %v8647_v51 = vmul.f32 %v9569_v39, %v3556_v56  ;;  %v8651_v44 = vmul.f32 %v9570_v46, %v3555_v25  ;;  %v8656_v16 = vmul.f32 %v9572_v42, %v8623_v5  ;;  %v8660_v2 = vmul.f32 %v9573_v6, %v3556_v56  ;;  %5747 = vmatprep.subr.bf16.mxu1 %v6414_v33  ;;  %v9585_v6 = vld [vmem:[#allocation39_spill] sm:$0xff] }
 0x6e5   : > { %v8664_v18 = vmul.f32 %v9575_v49, %v3556_v56  ;;  %v8670_v60 = vmul.f32 %v9577_v23, %v3555_v25  ;;  %v8680_v10 = vsel %vm1554_vm3, %v3550_v40, %v3551_v35  ;;  %v9579_v56 = vld [vmem:[#allocation36_spill] sm:$0xff]  ;;  %v9582_v40 = vld [vmem:[#allocation37_spill] sm:$0xff]  ;;  %v9586_v54 = vunpack.i.l.bf16 %v9585_v6 }
 0x6e6   : > { %v9580_v37 = vunpack.i.l.bf16 %v9579_v56  ;;  %v9581_v8 = vunpack.i.h.bf16 %v9579_v56  ;;  %v9583_v35 = vunpack.i.l.bf16 %v9582_v40  ;;  %v9584_v26 = vunpack.i.h.bf16 %v9582_v40  ;;  %5740 = vmatmul.mubr.msk.bf16.vlgmr.msra.gmra.mrb[8].mxu1 %vm2837_vm4, %v3311_v19 }
 0x6e7   : > { %9576 = vst [vmem:[#allocation59_spill] sm:$0xff] %v8664_v18  ;;  %9578 = vst [vmem:[#allocation60_spill] sm:$0xff] %v8670_v60  ;;  %v8714_v49 = vmul.f32 %v9586_v54, %v8509_v59  ;;  %v9587_v56 = vunpack.i.h.bf16 %v9585_v6  ;;  %5748 = vmatpush3.bf16.msra.mxu1 %v6414_v33  ;;  %5743 = vmatprep.mubr.msk.bf16.mxu1 %vm2837_vm4, %v3312_v4  ;;  %v9592_v15 = vunpack.i.l.bf16 %v9591_v11  ;;  %v9593_v4 = vunpack.i.h.bf16 %v9591_v11  ;;  %v9594_v54 = vld [vmem:[#allocation45_spill] sm:$0xff] }
 0x6e8   : > { %v8689_v57 = vmul.f32 %v9580_v37, %v8680_v10  ;;  %v8694_v39 = vmul.f32 %v9581_v8, %v8676_v9  ;;  %v8704_v46 = vmul.f32 %v9583_v35, %v8456_v0  ;;  %v8709_v42 = vmul.f32 %v9584_v26, %v8466_v53  ;;  %v9588_v8 = vld [vmem:[#allocation40_spill] sm:$0xff]  ;;  %5749 = vmatprep.subr.bf16.mxu1 %v6415_v41 }
 0x6e9   : > { %v8721_v37 = vmul.f32 %v9587_v56, %v8560_v31  ;;  %v9589_v35 = vunpack.i.l.bf16 %v9588_v8  ;;  %v9590_v40 = vunpack.i.h.bf16 %v9588_v8  ;;  %v8755_v33 = vmul.f32 %v9592_v15, %v8588_v62 }
 0x6ea   : > { %v8760_v56 = vmul.f32 %v9593_v4, %v8612_v7  ;;  %v9595_v6 = vunpack.i.l.bf16 %v9594_v54  ;;  %v9598_v59 = vunpack.i.l.bf16 %v9597_v13  ;;  %v9599_v15 = vunpack.i.h.bf16 %v9597_v13  ;;  %v9600_v4 = vld [vmem:[#allocation47_spill] sm:$0xff]  ;;  %v9603_v13 = vld [vmem:[#allocation49_spill] sm:$0xff] }
 0x6eb   : > { %v8726_v12 = vmul.f32 %v9589_v35, %v8556_v28  ;;  %v8731_v26 = vmul.f32 %v9590_v40, %v8524_v27  ;;  %v6416_v40 = vld [vmem:[%s9530_s26 + $0x50] sm:$0xff]   ;;  %v9596_v35 = vunpack.i.h.bf16 %v9594_v54  ;;  %v9601_v32 = vunpack.i.l.bf16 %v9600_v4  ;;  %5750 = vmatpush3.bf16.msra.mxu1 %v6415_v41 }
 0x6ec   : > { %v8764_v19 = vmul.f32 %v9595_v6, %v3555_v25  ;;  %v8774_v23 = vmul.f32 %v9598_v59, %v8676_v9  ;;  %v8779_v11 = vmul.f32 %v9599_v15, %v8596_v34  ;;  %v9602_v6 = vunpack.i.h.bf16 %v9600_v4  ;;  %5751 = vmatprep.subr.bf16.mxu1 %v6416_v40 }
 0x6ed   : > { %v8769_v8 = vmul.f32 %v9596_v35, %v8680_v10  ;;  %v8784_v25 = vmul.f32 %v9601_v32, %v8466_v53  ;;  %v9604_v15 = vunpack.i.l.bf16 %v9603_v13  ;;  %v9605_v53 = vunpack.i.h.bf16 %v9603_v13  ;;  %v9611_v13 = vld [vmem:[#allocation51_spill] sm:$0xff] }
 0x6ee   : > { %v8789_v54 = vmul.f32 %v9602_v6, %v8499_v52  ;;  %v9606_v6 = vld [vmem:[#allocation50_spill] sm:$0xff] }
 0x6ef   : > { %v8798_v58 = vmul.f32 %v9604_v15, %v8560_v31  ;;  %v8803_v32 = vmul.f32 %v9605_v53, %v8556_v28  ;;  %v9607_v59 = vunpack.i.l.bf16 %v9606_v6  ;;  %v9609_v31 = vunpack.i.h.bf16 %v9606_v6  ;;  %v6417_v28 = vld [vmem:[%s9530_s26 + $0x58] sm:$0xff]   ;;  %5752 = vmatpush3.bf16.msra.mxu1 %v6416_v40 }
 0x6f0   : > { %v9612_v53 = vunpack.i.l.bf16 %v9611_v13  ;;  %5753 = vmatprep.subr.bf16.mxu1 %v6417_v28 }
 0x6f1   : > { %v8812_v35 = vmul.f32 %v9607_v59, %v8524_v27  ;;  %v8817_v15 = vmul.f32 %v9609_v31, %v8456_v0  ;;  %v9613_v27 = vunpack.i.h.bf16 %v9611_v13  ;;  %v9614_v0 = vld [vmem:[#allocation52_spill] sm:$0xff] }
 0x6f2   : > { %v8827_v4 = vmul.f32 %v9612_v53, %v8428_v50  ;;  %v9615_v6 = vunpack.i.l.bf16 %v9614_v0  ;;  %v9616_v41 = vunpack.i.h.bf16 %v9614_v0  ;;  %v9617_v53 = vld [vmem:[#allocation53_spill] sm:$0xff] }
 0x6f3   : > { %9608 = vst [vmem:[#allocation61_spill] sm:$0xff] %v8812_v35  ;;  %9610 = vst [vmem:[#allocation75_spill] sm:$0xff] %v8817_v15  ;;  %v8832_v59 = vmul.f32 %v9613_v27, %v8436_v14  ;;  %v9618_v1 = vunpack.i.l.bf16 %v9617_v53  ;;  %v9619_v13 = vunpack.i.h.bf16 %v9617_v53  ;;  %v9624_v53 = vld [vmem:[#allocation55_spill] sm:$0xff]  ;;  %5754 = vmatpush3.bf16.msra.mxu1 %v6417_v28  ;;  %v6420_v28 = vld [vmem:[%s9530_s26 + $0x70] sm:$0xff]  }
 0x6f4   : > { %v8837_v31 = vmul.f32 %v9615_v6, %v8444_v63  ;;  %v8844_v22 = vmul.f32 %v9616_v41, %v8452_v29  ;;  %v9620_v6 = vpack.c.bf16 %v8579_v55, %v8569_v3  ;;  %v9621_v41 = vld [vmem:[#allocation54_spill] sm:$0xff]  ;;  %v9626_v3 = vpack.c.bf16 %v8601_v24, %v8617_v20  ;;  %v9628_v20 = vld [vmem:[#allocation57_spill] sm:$0xff] }
 0x6f5   : > { %v8849_v18 = vmul.f32 %v9618_v1, %v8462_v61  ;;  %v8854_v27 = vmul.f32 %v9619_v13, %v8479_v38  ;;  %v4211_v0 = vpack.c.bf16 %v8832_v59, %v8827_v4  ;;  %v9622_v52 = vunpack.i.l.bf16 %v9621_v41  ;;  %v6440_v59 = vld [vmem:[%s9530_s26 + $0x110] sm:$0xff]  }
 0x6f6   : > { %5744 = vmatmul.mubr.msk.bf16.gmra.mrb[12].mxu1 %vm2837_vm4, %v9620_v6  ;;  %v9623_v1 = vunpack.i.h.bf16 %v9621_v41  ;;  %v9625_v13 = vunpack.i.l.bf16 %v9624_v53  ;;  %v9627_v6 = vunpack.i.h.bf16 %v9624_v53  ;;  %v9629_v40 = vunpack.i.l.bf16 %v9628_v20 }
 0x6f7   : > { %v8865_v60 = vmul.f32 %v9622_v52, %v8423_v43  ;;  %5755 = vmatprep.mubr.msk.bf16.mxu1 %vm2837_vm4, %v9626_v3  ;;  %v9656_v4 = vpack.c.bf16 %v8854_v27, %v8849_v18  ;;  %v6442_v18 = vld [vmem:[%s9658_s4] sm:$0xff]  }
 0x6f8   : > { %v8870_v35 = vmul.f32 %v9623_v1, %v8421_v48  ;;  %v8875_v15 = vmul.f32 %v9625_v13, %v8612_v7  ;;  %v8888_v41 = vmul.f32 %v9627_v6, %v8623_v5  ;;  %v6418_v7 = vld [vmem:[%s9530_s26 + $0x60] sm:$0xff]   ;;  %v8898_v1 = vmul.f32 %v9629_v40, %v8680_v10 }
 0x6f9   : > { %v9630_v13 = vunpack.i.h.bf16 %v9628_v20  ;;  %v9631_v5 = vld [vmem:[#allocation58_spill] sm:$0xff]  ;;  %5763 = vmatprep.subr.bf16.mxu1 %v6418_v7  ;;  %v9634_v20 = vpack.c.bf16 %v8641_v47, %v8628_v36  ;;  %v9636_v36 = vpack.c.bf16 %v8694_v39, %v8689_v57  ;;  %v9637_v47 = vpack.c.bf16 %v8709_v42, %v8704_v46  ;;  %v6424_v46 = vld [vmem:[%s9530_s26 + $0x90] sm:$0xff]   ;;  %v9660_v27 = vld [vmem:[#allocation59_spill] sm:$0xff] }
 0x6fa   : > { %v9632_v53 = vunpack.i.l.bf16 %v9631_v5  ;;  %v4341_v52 = vpack.c.bf16 %v8888_v41, %v8875_v15  ;;  %v9633_v24 = vunpack.i.h.bf16 %v9631_v5  ;;  %v9638_v57 = vpack.c.bf16 %v8543_v21, %v8516_v17  ;;  %v6425_v42 = vld [vmem:[%s9530_s26 + $0x98] sm:$0xff]   ;;  %v6524_v15 = vld [vmem:[%s7315_s3] sm:$0xff]   ;;  %v6526_v41 = vld [vmem:[%s7315_s3 + $0x10] sm:$0xff]  }
 0x6fb   : > { %v8903_v3 = vmul.f32 %v9630_v13, %v8676_v9  ;;  %v9639_v39 = vpack.c.bf16 %v8721_v37, %v8714_v49  ;;  %v9640_v17 = vpack.c.bf16 %v8731_v26, %v8726_v12  ;;  %v9641_v21 = vpack.c.bf16 %v8428_v50, %v8421_v48  ;;  %v6426_v49 = vld [vmem:[%s9530_s26 + $0xa0] sm:$0xff]   ;;  %v6427_v37 = vld [vmem:[%s9530_s26 + $0xa8] sm:$0xff]   ;;  %v6428_v50 = vld [vmem:[%s9530_s26 + $0xb0] sm:$0xff]  }
 0x6fc   : > { %v8908_v6 = vmul.f32 %v9632_v53, %v8596_v34  ;;  %v8915_v55 = vmul.f32 %v9633_v24, %v8588_v62  ;;  %v6419_v34 = vld [vmem:[%s9530_s26 + $0x68] sm:$0xff]   ;;  %v9635_v62 = vpack.c.bf16 %v8651_v44, %v8647_v51  ;;  %v6421_v24 = vld [vmem:[%s9530_s26 + $0x78] sm:$0xff]   ;;  %v6422_v51 = vld [vmem:[%s9530_s26 + $0x80] sm:$0xff]   ;;  %v9642_v12 = vpack.c.bf16 %v8444_v63, %v8436_v14 }
 0x6fd   : > { %v4343_v10 = vpack.c.bf16 %v8903_v3, %v8898_v1  ;;  %v6423_v44 = vld [vmem:[%s9530_s26 + $0x88] sm:$0xff]   ;;  %v9643_v48 = vpack.c.bf16 %v8462_v61, %v8452_v29  ;;  %v6429_v26 = vld [vmem:[%s9530_s26 + $0xb8] sm:$0xff]   ;;  %v9644_v14 = vpack.c.bf16 %v8423_v43, %v8479_v38  ;;  %v9645_v63 = vpack.c.bf16 %v8760_v56, %v8755_v33  ;;  %v6430_v29 = vld [vmem:[%s9530_s26 + $0xc0] sm:$0xff]  }
 0x6fe   : > { %v4344_v9 = vpack.c.bf16 %v8915_v55, %v8908_v6  ;;  %5756 = vmatmul.mubr.msk.bf16.vlgmr.msra.gmra.mrb[8].mxu1 %vm2837_vm4, %v9634_v20  ;;  %v6431_v61 = vld [vmem:[%s9530_s26 + $0xc8] sm:$0xff]   ;;  %v9646_v43 = vpack.c.bf16 %v8660_v2, %v8656_v16  ;;  %v9647_v38 = vpack.c.bf16 %v8769_v8, %v8764_v19  ;;  %v6432_v56 = vld [vmem:[%s9530_s26 + $0xd0] sm:$0xff]   ;;  %v6433_v33 = vld [vmem:[%s9530_s26 + $0xd8] sm:$0xff]   ;;  %v9648_v16 = vpack.c.bf16 %v8779_v11, %v8774_v23 }
 0x6ff   : > { %5764 = vmatpush3.bf16.msra.mxu1 %v6418_v7  ;;  %5759 = vmatprep.mubr.msk.bf16.mxu1 %vm2837_vm4, %v9635_v62  ;;  %v9649_v2 = vpack.c.bf16 %v8789_v54, %v8784_v25  ;;  %v6434_v8 = vld [vmem:[%s9530_s26 + $0xe0] sm:$0xff]   ;;  %v6435_v19 = vld [vmem:[%s9530_s26 + $0xe8] sm:$0xff]   ;;  %v9650_v23 = vpack.c.bf16 %v8552_v45, %v8547_v30  ;;  %v9651_v11 = vpack.c.bf16 %v8803_v32, %v8798_v58  ;;  %v6436_v25 = vld [vmem:[%s9530_s26 + $0xf0] sm:$0xff]  }
 0x700   : > { %5765 = vmatprep.subr.bf16.mxu1 %v6419_v34  ;;  %v6437_v54 = vld [vmem:[%s9530_s26 + $0xf8] sm:$0xff]   ;;  %v9652_v30 = vld [vmem:[#allocation75_spill] sm:$0xff]  ;;  %v9655_v40 = vpack.c.bf16 %v8844_v22, %v8837_v31  ;;  %v9657_v31 = vpack.c.bf16 %v8870_v35, %v8865_v60  ;;  %v9659_v35 = vld [vmem:[#allocation60_spill] sm:$0xff] }
 0x701   : > { %v9653_v45 = vld [vmem:[#allocation61_spill] sm:$0xff]  ;;  %v6438_v58 = vld [vmem:[%s9530_s26 + $0x100] sm:$0xff]   ;;  %v6439_v32 = vld [vmem:[%s9530_s26 + $0x108] sm:$0xff]  }
 0x702   : > { %v9654_v7 = vpack.c.bf16 %v9652_v30, %v9653_v45  ;;  %v6441_v22 = vld [vmem:[%s9530_s26 + $0x118] sm:$0xff]   ;;  %v6443_v60 = vld [vmem:[%s9658_s4 + $0x8] sm:$0xff]   ;;  %v5116_v13 = vld [vmem:[%s9662_s18] ss:$0 sm:$0xff] }
 0x703   : > { %5766 = vmatpush3.bf16.msra.mxu1 %v6419_v34  ;;  %v6527_v1 = vld [vmem:[%s7315_s3 + $0x18] sm:$0xff]   ;;  %v5117_v55 = vld [vmem:[%s9663_s27] ss:$0 sm:$0xff]  ;;  %s9128_s27 = scalar_lea.hbm %s9664_s6, %s5134_s17  ;;  %s6881_s17 = smov [#allocation17]  }
 0x704   : > { %5767 = vmatprep.subr.bf16.mxu1 %v6420_v28  ;;  %v5937_v3 = vadd.f32 %v5117_v55, %v5116_v13  ;;  %s6786_s18 = sshll.u32 %s6881_s17, 4  ;;  %s6787_s18 = int_to_ptr.vmem [resolvable:$false] %s6786_s18 }
 0x705   : > { %s6788_s28 = scalar_lea.vmem %s6787_s18, 1024 }
 0x706   : > { %5760 = vmatmul.mubr.msk.bf16.gmra.mrb[12].mxu1 %vm2837_vm4, %v9636_v36 }
 0x707   : > { %5768 = vmatpush3.bf16.msra.mxu1 %v6420_v28  ;;  %5771 = vmatprep.mubr.msk.bf16.mxu1 %vm2837_vm4, %v9637_v47 }
 0x708   : > { %5769 = vmatprep.subr.bf16.mxu1 %v6421_v24 }
 0x70b   : > { %5770 = vmatpush3.bf16.msra.mxu1 %v6421_v24 }
 0x70c   : > { %5779 = vmatprep.subr.bf16.mxu1 %v6422_v51 }
 0x70e   : > { %5772 = vmatmul.mubr.msk.bf16.vlgmr.msra.gmra.mrb[8].mxu1 %vm2837_vm4, %v9638_v57 }
 0x70f   : > { %5780 = vmatpush3.bf16.msra.mxu1 %v6422_v51  ;;  %5775 = vmatprep.mubr.msk.bf16.mxu1 %vm2837_vm4, %v9639_v39 }
 0x710   : > { %5781 = vmatprep.subr.bf16.mxu1 %v6423_v44 }
 0x713   : > { %5782 = vmatpush3.bf16.msra.mxu1 %v6423_v44 }
 0x714   : > { %5783 = vmatprep.subr.bf16.mxu1 %v6424_v46 }
 0x716   : > { %5776 = vmatmul.mubr.msk.bf16.gmra.mrb[12].mxu1 %vm2837_vm4, %v9640_v17 }
 0x717   : > { %5784 = vmatpush3.bf16.msra.mxu1 %v6424_v46  ;;  %5787 = vmatprep.mubr.msk.bf16.mxu1 %vm2837_vm4, %v9641_v21 }
 0x718   : > { %5785 = vmatprep.subr.bf16.mxu1 %v6425_v42 }
 0x71b   : > { %5786 = vmatpush3.bf16.msra.mxu1 %v6425_v42 }
 0x71c   : > { %5795 = vmatprep.subr.bf16.mxu1 %v6426_v49 }
 0x71e   : > { %5788 = vmatmul.mubr.msk.bf16.vlgmr.msra.gmra.mrb[8].mxu1 %vm2837_vm4, %v9642_v12 }
 0x71f   : > { %5796 = vmatpush3.bf16.msra.mxu1 %v6426_v49  ;;  %5791 = vmatprep.mubr.msk.bf16.mxu1 %vm2837_vm4, %v9643_v48 }
 0x720   : > { %5797 = vmatprep.subr.bf16.mxu1 %v6427_v37 }
 0x723   : > { %5798 = vmatpush3.bf16.msra.mxu1 %v6427_v37 }
 0x724   : > { %5799 = vmatprep.subr.bf16.mxu1 %v6428_v50 }
 0x726   : > { %5792 = vmatmul.mubr.msk.bf16.gmra.mrb[12].mxu1 %vm2837_vm4, %v9644_v14 }
 0x727   : > { %5800 = vmatpush3.bf16.msra.mxu1 %v6428_v50  ;;  %5803 = vmatprep.mubr.msk.bf16.mxu1 %vm2837_vm4, %v9645_v63 }
 0x728   : > { %5801 = vmatprep.subr.bf16.mxu1 %v6429_v26 }
 0x72b   : > { %5802 = vmatpush3.bf16.msra.mxu1 %v6429_v26 }
 0x72c   : > { %5811 = vmatprep.subr.bf16.mxu1 %v6430_v29 }
 0x72e   : > { %5804 = vmatmul.mubr.msk.bf16.vlgmr.msra.gmra.mrb[8].mxu1 %vm2837_vm4, %v9646_v43 }
 0x72f   : > { %5812 = vmatpush3.bf16.msra.mxu1 %v6430_v29  ;;  %5807 = vmatprep.mubr.msk.bf16.mxu1 %vm2837_vm4, %v9647_v38 }
 0x730   : > { %5813 = vmatprep.subr.bf16.mxu1 %v6431_v61 }
 0x733   : > { %5814 = vmatpush3.bf16.msra.mxu1 %v6431_v61 }
 0x734   : > { %5815 = vmatprep.subr.bf16.mxu1 %v6432_v56 }
 0x736   : > { %5808 = vmatmul.mubr.msk.bf16.gmra.mrb[12].mxu1 %vm2837_vm4, %v9648_v16 }
 0x737   : > { %5816 = vmatpush3.bf16.msra.mxu1 %v6432_v56  ;;  %5819 = vmatprep.mubr.msk.bf16.mxu1 %vm2837_vm4, %v9649_v2 }
 0x738   : > { %5817 = vmatprep.subr.bf16.mxu1 %v6433_v33 }
 0x73b   : > { %5818 = vmatpush3.bf16.msra.mxu1 %v6433_v33 }
 0x73c   : > { %5827 = vmatprep.subr.bf16.mxu1 %v6434_v8 }
 0x73e   : > { %5820 = vmatmul.mubr.msk.bf16.vlgmr.msra.gmra.mrb[8].mxu1 %vm2837_vm4, %v9650_v23 }
 0x73f   : > { %5828 = vmatpush3.bf16.msra.mxu1 %v6434_v8  ;;  %5823 = vmatprep.mubr.msk.bf16.mxu1 %vm2837_vm4, %v9651_v11 }
 0x740   : > { %5829 = vmatprep.subr.bf16.mxu1 %v6435_v19 }
 0x743   : > { %5830 = vmatpush3.bf16.msra.mxu1 %v6435_v19 }
 0x744   : > { %5831 = vmatprep.subr.bf16.mxu1 %v6436_v25 }
 0x746   : > { %5824 = vmatmul.mubr.msk.bf16.gmra.mrb[12].mxu1 %vm2837_vm4, %v9654_v7 }
 0x747   : > { %5832 = vmatpush3.bf16.msra.mxu1 %v6436_v25  ;;  %5835 = vmatprep.mubr.msk.bf16.mxu1 %vm2837_vm4, %v4211_v0  ;;  %v9661_v0 = vpack.c.bf16 %v9659_v35, %v9660_v27 }
 0x748   : > { %5833 = vmatprep.subr.bf16.mxu1 %v6437_v54 }
 0x74b   : > { %5834 = vmatpush3.bf16.msra.mxu1 %v6437_v54 }
 0x74c   : > { %5843 = vmatprep.subr.bf16.mxu1 %v6438_v58 }
 0x74e   : > { %5836 = vmatmul.mubr.msk.bf16.vlgmr.msra.gmra.mrb[8].mxu1 %vm2837_vm4, %v9655_v40 }
 0x74f   : > { %5844 = vmatpush3.bf16.msra.mxu1 %v6438_v58  ;;  %5839 = vmatprep.mubr.msk.bf16.mxu1 %vm2837_vm4, %v9656_v4 }
 0x750   : > { %5845 = vmatprep.subr.bf16.mxu1 %v6439_v32 }
 0x753   : > { %5846 = vmatpush3.bf16.msra.mxu1 %v6439_v32 }
 0x754   : > { %5847 = vmatprep.subr.bf16.mxu1 %v6440_v59 }
 0x756   : > { %5840 = vmatmul.mubr.msk.bf16.gmra.mrb[12].mxu1 %vm2837_vm4, %v9657_v31 }
 0x757   : > { %5848 = vmatpush3.bf16.msra.mxu1 %v6440_v59  ;;  %5851 = vmatprep.mubr.msk.bf16.mxu1 %vm2837_vm4, %v4341_v52  ;;  %v6525_v52 = vld [vmem:[%s7315_s3 + $0x8] sm:$0xff]   ;;  %s733_s3 = scalar_lea.vmem [#allocation17], %s4816_s22 }
 0x758   : > { %5849 = vmatprep.subr.bf16.mxu1 %v6441_v22  ;;  %s4637_s29 = sshll.u32 %s733_s3, 4  ;;  %s9130_s29 = int_to_ptr.vmem [resolvable:$true] %s4637_s29 }
 0x759   : > { %s6782_s22 = scalar_lea.vmem %s9130_s29, 512  ;;  %p6789_p0 = scmp.lt.s32.totalorder %s9130_s29, %s6787_s18 }
 0x75a   : > { %p6783_p13 = scmp.ne.s32.totalorder %s9130_s29, %s6782_s22  ;;  %p6790_p10 = scmp.lt.s32.totalorder %s6788_s28, %s6782_s22 }
 0x75b   : > { %5850 = vmatpush3.bf16.msra.mxu1 %v6441_v22 }
 0x75c   : > { %5859 = vmatprep.subr.bf16.mxu1 %v6442_v18  ;;  %p6784_p3 = pnand %p6783_p13, %p9665_p1  ;;  %p6791_p11 = por %p6790_p10, %p6789_p0 }
 0x75e   : > { %5852 = vmatmul.mubr.msk.bf16.vlgmr.msra.gmra.mrb[8].mxu1 %vm2837_vm4, %v9661_v0  ;;  %p6785_p2 = pneg %p6784_p3 }
 0x75f   : > { %5860 = vmatpush3.bf16.msra.mxu1 %v6442_v18  ;;  %5855 = vmatprep.mubr.msk.bf16.mxu1 %vm2837_vm4, %v4343_v10 }
 0x760   : > { %5861 = vmatprep.subr.bf16.mxu1 %v6443_v60  ;;  %p6792_p12 = pnand %p6791_p11, %p6785_p2 }
 0x763   : > { %5862 = vmatpush3.bf16.msra.mxu1 %v6443_v60 }
 0x766   : > { %5856 = vmatmul.mubr.msk.bf16.gmra.mrb[12].mxu1 %vm2837_vm4, %v4344_v9 }
 0x767   : > { %5863 = vmatprep.mubr.msk.bf16.mxu1 %vm758_vm1, %v6524_v15 }
 0x76e   : > { %5864 = vmatmul.mubr.msk.bf16.vlgmr.msra.gmra.mrb[8].mxu1 %vm758_vm1, %v6525_v52 }
 0x76f   : > { %5867 = vmatprep.mubr.msk.bf16.mxu1 %vm758_vm1, %v6526_v41 }
 0x776   : > { %5868 = vmatmul.mubr.msk.bf16.gmra.mrb[12].mxu1 %vm758_vm1, %v6527_v1 }
 0x841   : > { %v5865_v5 = vpop.f32.mrb[8].mxu1 }
 0x842   : > { %v5931_v53 = vadd.f32 %v5865_v5, %v5116_v13  ;;  %v4567_v6 = vpop.f32.mrb[9].mxu1 }
 0x843   : > { %v5933_v10 = vadd.f32 %v5116_v13, %v4567_v6  ;;  %v5866_v9 = vpop.f32.mrb[10].mxu1 }
 0x844   : > { %v5932_v34 = vadd.f32 %v5931_v53, %v5117_v55  ;;  %v5936_v20 = vadd.f32 %v5937_v3, %v5866_v9  ;;  %v4570_v62 = vpop.f32.mrb[11].mxu1 }
 0x845   : > { %v5934_v28 = vadd.f32 %v5933_v10, %v5117_v55  ;;  %v5938_v24 = vadd.f32 %v5937_v3, %v4570_v62 }
 0x846   : > { %v4608_v36 = vpack.c.bf16 %v5932_v34, %v5932_v34  ;;  %v4609_v47 = vpack.c.bf16 %v5936_v20, %v5936_v20 }
 0x847   : > { %v4606_v51 = vpack.c.bf16 %v5934_v28, %v5934_v28  ;;  %v4607_v44 = vpack.c.bf16 %v5938_v24, %v5938_v24 }
 0x848   : > { %4617 = vst.msk [vmem:[%s733_s3 + $0x8] sm:$0xf] %vm4614_vm5, %v4608_v36  ;;  %4618 = vst.msk [vmem:[%s733_s3 + $0xc] sm:$0xf] %vm4614_vm5, %v4609_v47 }
 0x849   : > { %4615 = vst.msk [vmem:[%s733_s3] sm:$0xf] %vm4614_vm5, %v4606_v51  ;;  %4616 = vst.msk [vmem:[%s733_s3 + $0x4] sm:$0xf] %vm4614_vm5, %v4607_v44  ;;  %v5869_v57 = vpop.f32.mrb[12].mxu1 }
 0x84a   : > { %v5940_v39 = vadd.f32 %v5937_v3, %v5869_v57  ;;  %v4583_v46 = vpop.f32.mrb[13].mxu1 }
 0x84b   : > { %v5942_v42 = vadd.f32 %v5937_v3, %v4583_v46  ;;  %v5870_v17 = vpop.f32.mrb[14].mxu1 }
 0x84c   : > { %v4612_v21 = vpack.c.bf16 %v5940_v39, %v5940_v39  ;;  %v5944_v49 = vadd.f32 %v5937_v3, %v5870_v17  ;;  %v4586_v37 = vpop.f32.mrb[15].mxu1 }
 0x84d   : > { %v4610_v12 = vpack.c.bf16 %v5942_v42, %v5942_v42  ;;  %v5946_v48 = vadd.f32 %v5937_v3, %v4586_v37 }
 0x84e   : > { %4621 = vst.msk [vmem:[%s733_s3 + $0x18] sm:$0xf] %vm4614_vm5, %v4612_v21  ;;  %v4613_v50 = vpack.c.bf16 %v5944_v49, %v5944_v49 }
 0x84f   : > { %4619 = vst.msk [vmem:[%s733_s3 + $0x10] sm:$0xf] %vm4614_vm5, %v4610_v12  ;;  %v4611_v26 = vpack.c.bf16 %v5946_v48, %v5946_v48 }
 0x850   : > { %4622 = vst.msk [vmem:[%s733_s3 + $0x1c] sm:$0xf] %vm4614_vm5, %v4613_v50 }
 0x851   : > { %4620 = vst.msk [vmem:[%s733_s3 + $0x14] sm:$0xf] %vm4614_vm5, %v4611_v26 }
 0x852   : > { %6795 = shalt.err (!%p6792_p12)
}
 0x853   : > { %s6796_s3 = scalar_lea.hbm %s9128_s27, 512  ;;  %s6800_s17 = scalar_lea.hbm %s9664_s6, 1024 }
 0x854   : > { %p6797_p8 = scmp.ne.s32.totalorder %s9128_s27, %s6796_s3  ;;  %p6801_p6 = scmp.lt.u32.totalorder %s9128_s27, %s9664_s6 }
 0x855   : > { %p6802_p9 = scmp.lt.u32.totalorder %s6800_s17, %s6796_s3  ;;  %p6804_p13 = scmp.lt.u32.totalorder %s6796_s3, %s9128_s27 }
 0x856   : > { %p6798_p5 = pnand %p6797_p8, %p9665_p1 }
 0x857   : > { %p6803_p4 = por %p6802_p9, %p6801_p6 }
 0x858   : > { %p6799_p7 = pneg %p6798_p5 }
 0x859   : > { %p6805_p3 = por %p6804_p13, %p6803_p4 }
 0x85b   : > { %p6806_p2 = pnand %p6805_p3, %p6799_p7 }
 0x85d   : > { %6809 = shalt.err (!%p6806_p2)
}
 0x85e   : > { %s6882_s22 = smov 64   ;;  %s6883_s28 = smov 4  }
 0x85f   : > { %s9666_s7 = scalar_lea.sflag [#allocation4], %s7280_s15 }
 0x860   : > { %6117 = dma.vmem_to_hbm [thread:$0]  (%p9665_p1), %s9130_s29, 512, %s9128_s27, %s9666_s7, %s6882_s22, %s6882_s22, %s6883_s28  }
 0x861 PF: > { %s4652_s5 = sand.u32 1, %s6852_s0   ;;  %p9667_p0 = scmp.ne.s32.totalorder %s9341_s16, 0 }
 0x862   : > { %p9668_p10 = scmp.ge.s32.totalorder %s6864_s21, 2  ;;  %s4653_s4 = scalar_lea.sflag [#allocation4], %s4652_s5 }
 0x864   : > { %p6149_p11 = pnand %p9668_p10, %p9667_p0 }
 0x866   : > { %6847 = dma.done.wait (!%p6149_p11), %s4653_s4, 512  }
 0x867   : > { %6849 = vsyncadd (!%p6149_p11), %s4653_s4, 4294966784  ;;  %p36_p12 = scmp.ge.s32.totalorder %s7204_s24, 4   ;;  %s9669_s0 = smov %s6856_s30 }
 0x868   : > { %s9670_s30 = smov %s6860_s20  ;;  %s9671_s20 = smov %s7215_s1 }
 0x869   : > { %s9672_s21 = smov %s7204_s24  ;;  %38 = sbr.rel (!%p36_p12) target bundleno = 24 (0x18), region = 199 }
 0x870   :  { %4658 = vsyncpa [#allocation3], 1 }
 0x871   :  { %4660 = vsyncpa [#allocation3 + $0x1], 1 }
 0x872   :  { %4661 = vsyncpa [#allocation6], 1 }
 0x873   :  { %4662 = vsyncpa [#allocation9], 1 }
 0x874   :  { %4663 = vsyncpa [#allocation12], 1 }
 0x875   :  { %4664 = vsyncpa [#allocation15], 1 }
 0x876   :  { %4665 = vsyncpa [#allocation4], 1 }
 0x877   :  { %4667 = vsyncpa [#allocation4 + $0x1], 1 }

</bundles_post_ra>
